<compile_context>
chip_gen: v6e
topology: v6e:2x2x1
jax: 0.10.0
libtpu: 0.0.40
codegen_flags: <defaults>
</compile_context>

<pallas_src>
import jax
import jax.numpy as jnp
import numpy as np
from jax.experimental import pallas as pl
from jax.experimental.pallas import tpu as pltpu


# ---------------------------------------------------------------------------
# exact (erf-based) GELU built only from ops guaranteed to lower in Mosaic
# (exp / abs / where).  Single-precision erf approx, |err| < 1.2e-7, so the
# f32 path matches PyTorch's default nn.GELU() (exact form) to ~1e-6.
# The exp lands in the EUP slot; at Mixer-like shapes the MXU binds and this
# polynomial is free filler — revisit only if a bundle dump shows VALU binding.
# ---------------------------------------------------------------------------
def _erf(x):
    a = jnp.abs(x)
    t = 1.0 / (1.0 + 0.5 * a)
    poly = (-1.26551223 + t * (1.00002368 + t * (0.37409196 + t * (0.09678418 +
            t * (-0.18628806 + t * (0.27886807 + t * (-1.13520398 + t * (1.48851587 +
            t * (-0.82215223 + t * 0.17087277)))))))))
    tau = t * jnp.exp(-a * a + poly)
    return jnp.where(x >= 0.0, 1.0 - tau, tau - 1.0)


def _gelu_exact(x):
    return 0.5 * x * (1.0 + _erf(x * 0.7071067811865476))


# ---------------------------------------------------------------------------
# Pallas kernel: one grid step == one batch element; (S, C) tile resident.
#   x_ref / o_ref : (S, C)   activations, feature dim C on lanes
#   w1c_ref       : (M, S)   channel-mix Linear(S->M) weight (torch layout)
#   w2c_ref       : (S, M)   channel-mix Linear(M->S) weight (torch layout)
#   w1t_ref       : (C, M)   token-mix  Linear(C->M) weight, pre-transposed
#   w2t_ref       : (M, C)   token-mix  Linear(M->C) weight, pre-transposed
# In the (S, C) layout the channel mix (contraction over S) is a plain
# left-multiplication by the torch weights, so no transposes occur in-kernel.
# ---------------------------------------------------------------------------
def mixure_kernel(x_ref, gamma_ref, beta_ref,
                  w1c_ref, b1c_ref, w2c_ref, b2c_ref,
                  w1t_ref, b1t_ref, w2t_ref, b2t_ref,
                  o_ref):
    x = x_ref[...].astype(jnp.float32)          # (S, C)
    gamma = gamma_ref[...]                      # (1, C)
    beta = beta_ref[...]                        # (1, C)

    def layer_norm(v):                          # LN over C, eps=1e-5 (torch default)
        mu = jnp.mean(v, axis=-1, keepdims=True)
        var = jnp.mean(jnp.square(v - mu), axis=-1, keepdims=True)
        return (v - mu) * jax.lax.rsqrt(var + 1e-5) * gamma + beta

    # ---- x = norm(x) -------------------------------------------------------
    u = layer_norm(x)                                                    # (S, C)

    # ---- channel_mix over the patch axis S (shared weights, no block-diag) -
    h = jnp.dot(w1c_ref[...], u.astype(w1c_ref.dtype),
                preferred_element_type=jnp.float32) + b1c_ref[...]       # (M, C)
    h = _gelu_exact(h)
    v = jnp.dot(w2c_ref[...], h.astype(w2c_ref.dtype),
                preferred_element_type=jnp.float32) + b2c_ref[...]       # (S, C)

    # ---- residual + second norm (same gamma/beta: module reuses self.norm) -
    xr = v + x
    w = layer_norm(xr)                                                   # (S, C)

    # ---- token_mix over the feature axis C ---------------------------------
    t = jnp.dot(w.astype(w1t_ref.dtype), w1t_ref[...],
                preferred_element_type=jnp.float32) + b1t_ref[...]       # (S, M)
    t = _gelu_exact(t)
    out = jnp.dot(t.astype(w2t_ref.dtype), w2t_ref[...],
                  preferred_element_type=jnp.float32) + b2t_ref[...]     # (S, C)

    o_ref[...] = out.astype(o_ref.dtype)


# ---------------------------------------------------------------------------
# One-time (NOT jitted) parameter preprocessing — hoisted out of the hot path.
# ---------------------------------------------------------------------------
def prepare_params(params, mxu_dtype=jnp.float32):
    C = params["gamma"].shape[0]
    M, S = params["w1c"].shape
    return dict(
        gamma=params["gamma"].reshape(1, C).astype(jnp.float32),
        beta=params["beta"].reshape(1, C).astype(jnp.float32),
        # channel-mix: torch weight layout is already what the left-multiplied
        # form needs; biases become column vectors (broadcast over lanes = C).
        w1c=params["w1c"].astype(mxu_dtype),                          # (M, S)
        b1c=params["b1c"].reshape(M, 1).astype(jnp.float32),          # (M, 1)
        w2c=params["w2c"].astype(mxu_dtype),                          # (S, M)
        b2c=params["b2c"].reshape(S, 1).astype(jnp.float32),          # (S, 1)
        # token-mix: pre-transposed so in-kernel matmuls need no transposes.
        w1tT=params["w1t"].T.astype(mxu_dtype),                       # (C, M)
        b1t=params["b1t"].reshape(1, M).astype(jnp.float32),
        w2tT=params["w2t"].T.astype(mxu_dtype),                       # (M, C)
        b2t=params["b2t"].reshape(1, C).astype(jnp.float32),
    )


# ---------------------------------------------------------------------------
# host wrapper
# ---------------------------------------------------------------------------
def _vmem_limit_bytes(S, C, M, w_bytes):
    f32 = 4
    act_tile = S * C * f32                               # one (S, C) x/out tile
    weights = (M * S + S * M + C * M + M * C) * w_bytes
    biases = (2 * C + M + S + M + C) * f32
    interm = (3 * S * C + 2 * M * C + 2 * S * M) * f32   # u/v/w, h, t live sets
    # streamed x/out tiles double-buffered + weights (default 2 buffers, they
    # only fill once) + intermediates, then 2x headroom for compiler temps.
    est = 2 * 2 * act_tile + 2 * (weights + biases) + interm
    return int(min(100 * 2 ** 20, max(32 * 2 ** 20, 2 * est)))


@jax.jit
def mixure_layer(x, pp):
    B, S, C = x.shape
    M = pp["w1c"].shape[0]
    w_bytes = pp["w1c"].dtype.itemsize

    grid_spec = pltpu.PrefetchScalarGridSpec(
        num_scalar_prefetch=0,
        grid=(B,),                                    # >= 2 -> pipelining + megacore
        in_specs=[
            pl.BlockSpec((None, S, C), lambda b: (b, 0, 0)),   # x (streams per batch)
            pl.BlockSpec((1, C), lambda b: (0, 0)),            # gamma   (resident)
            pl.BlockSpec((1, C), lambda b: (0, 0)),            # beta
            pl.BlockSpec((M, S), lambda b: (0, 0)),            # W1c
            pl.BlockSpec((M, 1), lambda b: (0, 0)),            # b1c (column)
            pl.BlockSpec((S, M), lambda b: (0, 0)),            # W2c
            pl.BlockSpec((S, 1), lambda b: (0, 0)),            # b2c (column)
            pl.BlockSpec((C, M), lambda b: (0, 0)),            # W1t^T
            pl.BlockSpec((1, M), lambda b: (0, 0)),            # b1t
            pl.BlockSpec((M, C), lambda b: (0, 0)),            # W2t^T
            pl.BlockSpec((1, C), lambda b: (0, 0)),            # b2t
        ],
        out_specs=pl.BlockSpec((None, S, C), lambda b: (b, 0, 0)),
    )

    cost = pl.CostEstimate(
        flops=8 * B * S * M * C,                       # four GEMMs, 2*S*M*C each
        transcendentals=B * (M * C + S * M),           # one exp per GELU element
        bytes_accessed=2 * B * S * C * x.dtype.itemsize
        + (M * S + S * M + C * M + M * C) * w_bytes
        + (2 * C + M + S + M + C) * 4,
    )

    return pl.pallas_call(
        mixure_kernel,
        out_shape=jax.ShapeDtypeStruct((B, S, C), x.dtype),
        grid_spec=grid_spec,
        compiler_params=pltpu.CompilerParams(
            dimension_semantics=("parallel",),
            vmem_limit_bytes=_vmem_limit_bytes(S, C, M, w_bytes)),
        cost_estimate=cost,
    )(x, pp["gamma"], pp["beta"],
      pp["w1c"], pp["b1c"], pp["w2c"], pp["b2c"],
      pp["w1tT"], pp["b1t"], pp["w2tT"], pp["b2t"])


# ---------------------------------------------------------------------------
# deterministic parameter init (PyTorch nn.Linear default: U(-1/sqrt(fan_in), .))
# ---------------------------------------------------------------------------
def init_params(key, dim, mlp_dim, num_patches):
    ks = jax.random.split(key, 4)

    def linear(k, fan_in, fan_out):
        kw, kb = jax.random.split(k)
        bound = 1.0 / float(np.sqrt(fan_in))
        w = jax.random.uniform(kw, (fan_out, fan_in), jnp.float32, -bound, bound)
        b = jax.random.uniform(kb, (fan_out,), jnp.float32, -bound, bound)
        return w, b

    w1c, b1c = linear(ks[0], num_patches, mlp_dim)   # channel_mix: Linear(S, M)
    w2c, b2c = linear(ks[1], mlp_dim, num_patches)   # channel_mix: Linear(M, S)
    w1t, b1t = linear(ks[2], dim, mlp_dim)           # token_mix:   Linear(C, M)
    w2t, b2t = linear(ks[3], mlp_dim, dim)           # token_mix:   Linear(M, C)
    return dict(
        gamma=jnp.ones((dim,), jnp.float32),
        beta=jnp.zeros((dim,), jnp.float32),
        w1c=w1c, b1c=b1c, w2c=w2c, b2c=b2c,
        w1t=w1t, b1t=b1t, w2t=w2t, b2t=b2t,
    )


# ---------------------------------------------------------------------------
# pure-JAX reference mirroring the PyTorch forward literally (for validation)
# ---------------------------------------------------------------------------
def mixure_layer_ref(x, p):
    def ln(v):
        mu = v.mean(-1, keepdims=True)
        var = ((v - mu) ** 2).mean(-1, keepdims=True)
        return (v - mu) / jnp.sqrt(var + 1e-5) * p["gamma"] + p["beta"]

    def gelu(v):
        return 0.5 * v * (1.0 + jax.scipy.special.erf(v / jnp.sqrt(2.0)))

    skip = x
    y = ln(x)
    yt = jnp.swapaxes(y, 1, 2)                                        # b s c -> b c s
    h = gelu(yt @ p["w1c"].T + p["b1c"]) @ p["w2c"].T + p["b2c"]      # channel_mix
    x2 = jnp.swapaxes(h, 1, 2) + skip                                 # b c s -> b s c, residual
    w = ln(x2)
    return gelu(w @ p["w1t"].T + p["b1t"]) @ p["w2t"].T + p["b2t"]    # token_mix


if __name__ == "__main__":
    # batch=2 (>= 2 grid steps), num_patches=64, dim=128, mlp_dim=256:
    # small, but lane-dense (C, M multiples of 128) so stores/GEMM N are dense.
    B, S, C, M = 2, 64, 128, 256
    key = jax.random.PRNGKey(0)
    kx, kp = jax.random.split(key)

    x = jax.random.normal(kx, (B, S, C), jnp.float32)
    params = init_params(kp, dim=C, mlp_dim=M, num_patches=S)
    ref = mixure_layer_ref(x, params)

    # exact path (f32 MXU operands) — strict parity with the PyTorch module
    pp_f32 = prepare_params(params, mxu_dtype=jnp.float32)
    out = jax.block_until_ready(mixure_layer(x, pp_f32))
    assert out.shape == (B, S, C)
    err = float(np.max(np.abs(np.asarray(out) - np.asarray(ref))))
    assert err < 1e-4, f"f32 max abs err {err}"

    # bf16 MXU-operand path (native MXU dtype on v5e/v6e/v7x) — loose tolerance
    pp_bf16 = prepare_params(params, mxu_dtype=jnp.bfloat16)
    out_bf16 = jax.block_until_ready(mixure_layer(x, pp_bf16))
    scale = float(np.max(np.abs(np.asarray(ref)))) + 1e-6
    rel = float(np.max(np.abs(np.asarray(out_bf16) - np.asarray(ref)))) / scale
    assert rel < 5e-2, f"bf16 max rel err {rel}"

    print("KERNEL_OK")
</pallas_src>

<mosaic_0001>
module attributes {stable_mosaic.version = 11 : i64} {
  func.func @mixure_kernel(%arg0: i32, %arg1: memref<1x64x128xf32, #tpu.memory_space<vmem>>, %arg2: memref<1x128xf32, #tpu.memory_space<vmem>>, %arg3: memref<1x128xf32, #tpu.memory_space<vmem>>, %arg4: memref<256x64xf32, #tpu.memory_space<vmem>>, %arg5: memref<256x1xf32, #tpu.memory_space<vmem>>, %arg6: memref<64x256xf32, #tpu.memory_space<vmem>>, %arg7: memref<64x1xf32, #tpu.memory_space<vmem>>, %arg8: memref<128x256xf32, #tpu.memory_space<vmem>>, %arg9: memref<1x256xf32, #tpu.memory_space<vmem>>, %arg10: memref<256x128xf32, #tpu.memory_space<vmem>>, %arg11: memref<1x128xf32, #tpu.memory_space<vmem>>, %arg12: memref<1x64x128xf32, #tpu.memory_space<vmem>>) attributes {dimension_semantics = [#tpu.dimension_semantics<parallel>], iteration_bounds = array<i64: 2>, scalar_prefetch = 0 : i64, scratch_operands = 0 : i64, tpu.core_type = #tpu.core_type<tc>, window_params = [{transform_indices = @transform_0, window_bounds = array<i64: 1, 64, 128>}, {pipeline_mode = #tpu.pipeline_mode<synchronous>, transform_indices = @transform_1, window_bounds = array<i64: 1, 128>}, {pipeline_mode = #tpu.pipeline_mode<synchronous>, transform_indices = @transform_2, window_bounds = array<i64: 1, 128>}, {pipeline_mode = #tpu.pipeline_mode<synchronous>, transform_indices = @transform_3, window_bounds = array<i64: 256, 64>}, {pipeline_mode = #tpu.pipeline_mode<synchronous>, transform_indices = @transform_4, window_bounds = array<i64: 256, 1>}, {pipeline_mode = #tpu.pipeline_mode<synchronous>, transform_indices = @transform_5, window_bounds = array<i64: 64, 256>}, {pipeline_mode = #tpu.pipeline_mode<synchronous>, transform_indices = @transform_6, window_bounds = array<i64: 64, 1>}, {pipeline_mode = #tpu.pipeline_mode<synchronous>, transform_indices = @transform_7, window_bounds = array<i64: 128, 256>}, {pipeline_mode = #tpu.pipeline_mode<synchronous>, transform_indices = @transform_8, window_bounds = array<i64: 1, 256>}, {pipeline_mode = #tpu.pipeline_mode<synchronous>, transform_indices = @transform_9, window_bounds = array<i64: 256, 128>}, {pipeline_mode = #tpu.pipeline_mode<synchronous>, transform_indices = @transform_10, window_bounds = array<i64: 1, 128>}, {transform_indices = @transform_11, window_bounds = array<i64: 1, 64, 128>}]} {
    %c0 = arith.constant 0 : index
    %c0_0 = arith.constant 0 : index
    %c0_1 = arith.constant 0 : index
    %0 = vector.load %arg1[%c0, %c0_0, %c0_1] : memref<1x64x128xf32, #tpu.memory_space<vmem>>, vector<1x64x128xf32>
    %1 = vector.shape_cast %0 : vector<1x64x128xf32> to vector<64x128xf32>
    %c0_2 = arith.constant 0 : index
    %c0_3 = arith.constant 0 : index
    %2 = vector.load %arg2[%c0_2, %c0_3] : memref<1x128xf32, #tpu.memory_space<vmem>>, vector<1x128xf32>
    %c0_4 = arith.constant 0 : index
    %c0_5 = arith.constant 0 : index
    %3 = vector.load %arg3[%c0_4, %c0_5] : memref<1x128xf32, #tpu.memory_space<vmem>>, vector<1x128xf32>
    %cst = arith.constant dense<0.000000e+00> : vector<64xf32>
    %4 = vector.multi_reduction <add>, %1, %cst [1] : vector<64x128xf32> to vector<64xf32>
    %5 = vector.shape_cast %4 : vector<64xf32> to vector<64x1xf32>
    %cst_6 = arith.constant 1.280000e+02 : f32
    %6 = vector.broadcast %cst_6 : f32 to vector<64x1xf32>
    %7 = arith.divf %5, %6 : vector<64x1xf32>
    %8 = vector.broadcast %7 : vector<64x1xf32> to vector<64x128xf32>
    %9 = arith.subf %1, %8 : vector<64x128xf32>
    %10 = arith.mulf %9, %9 : vector<64x128xf32>
    %cst_7 = arith.constant dense<0.000000e+00> : vector<64xf32>
    %11 = vector.multi_reduction <add>, %10, %cst_7 [1] : vector<64x128xf32> to vector<64xf32>
    %12 = vector.shape_cast %11 : vector<64xf32> to vector<64x1xf32>
    %cst_8 = arith.constant 1.280000e+02 : f32
    %13 = vector.broadcast %cst_8 : f32 to vector<64x1xf32>
    %14 = arith.divf %12, %13 : vector<64x1xf32>
    %15 = vector.broadcast %7 : vector<64x1xf32> to vector<64x128xf32>
    %16 = arith.subf %1, %15 : vector<64x128xf32>
    %cst_9 = arith.constant 9.99999974E-6 : f32
    %17 = vector.broadcast %cst_9 : f32 to vector<64x1xf32>
    %18 = arith.addf %14, %17 : vector<64x1xf32>
    %19 = math.rsqrt %18 : vector<64x1xf32>
    %20 = vector.broadcast %19 : vector<64x1xf32> to vector<64x128xf32>
    %21 = arith.mulf %16, %20 : vector<64x128xf32>
    %22 = vector.broadcast %2 : vector<1x128xf32> to vector<64x128xf32>
    %23 = arith.mulf %21, %22 : vector<64x128xf32>
    %24 = vector.broadcast %3 : vector<1x128xf32> to vector<64x128xf32>
    %25 = arith.addf %23, %24 : vector<64x128xf32>
    %c0_10 = arith.constant 0 : index
    %c0_11 = arith.constant 0 : index
    %26 = vector.load %arg4[%c0_10, %c0_11] : memref<256x64xf32, #tpu.memory_space<vmem>>, vector<256x64xf32>
    %cst_12 = arith.constant dense<0.000000e+00> : vector<256x128xf32>
    %27 = tpu.matmul %26, %25, %cst_12 {dimension_numbers = #tpu.dot_dimension_numbers<[1], [0], [0], [1], [0, 0, 1, 1], [], []>} : vector<256x64xf32>, vector<64x128xf32>, vector<256x128xf32> -> vector<256x128xf32>
    %c0_13 = arith.constant 0 : index
    %c0_14 = arith.constant 0 : index
    %28 = vector.load %arg5[%c0_13, %c0_14] : memref<256x1xf32, #tpu.memory_space<vmem>>, vector<256x1xf32>
    %29 = vector.broadcast %28 : vector<256x1xf32> to vector<256x128xf32>
    %30 = arith.addf %27, %29 : vector<256x128xf32>
    %cst_15 = arith.constant 5.000000e-01 : f32
    %31 = vector.broadcast %cst_15 : f32 to vector<256x128xf32>
    %32 = arith.mulf %31, %30 : vector<256x128xf32>
    %cst_16 = arith.constant 0.707106769 : f32
    %33 = vector.broadcast %cst_16 : f32 to vector<256x128xf32>
    %34 = arith.mulf %30, %33 : vector<256x128xf32>
    %35 = math.absf %34 : vector<256x128xf32>
    %cst_17 = arith.constant 5.000000e-01 : f32
    %36 = vector.broadcast %cst_17 : f32 to vector<256x128xf32>
    %37 = arith.mulf %36, %35 : vector<256x128xf32>
    %cst_18 = arith.constant 1.000000e+00 : f32
    %38 = vector.broadcast %cst_18 : f32 to vector<256x128xf32>
    %39 = arith.addf %38, %37 : vector<256x128xf32>
    %cst_19 = arith.constant 1.000000e+00 : f32
    %40 = vector.broadcast %cst_19 : f32 to vector<256x128xf32>
    %41 = arith.divf %40, %39 : vector<256x128xf32>
    %cst_20 = arith.constant 0.170872763 : f32
    %42 = vector.broadcast %cst_20 : f32 to vector<256x128xf32>
    %43 = arith.mulf %41, %42 : vector<256x128xf32>
    %cst_21 = arith.constant -0.822152256 : f32
    %44 = vector.broadcast %cst_21 : f32 to vector<256x128xf32>
    %45 = arith.addf %44, %43 : vector<256x128xf32>
    %46 = arith.mulf %41, %45 : vector<256x128xf32>
    %cst_22 = arith.constant 1.48851585 : f32
    %47 = vector.broadcast %cst_22 : f32 to vector<256x128xf32>
    %48 = arith.addf %47, %46 : vector<256x128xf32>
    %49 = arith.mulf %41, %48 : vector<256x128xf32>
    %cst_23 = arith.constant -1.13520396 : f32
    %50 = vector.broadcast %cst_23 : f32 to vector<256x128xf32>
    %51 = arith.addf %50, %49 : vector<256x128xf32>
    %52 = arith.mulf %41, %51 : vector<256x128xf32>
    %cst_24 = arith.constant 0.278868079 : f32
    %53 = vector.broadcast %cst_24 : f32 to vector<256x128xf32>
    %54 = arith.addf %53, %52 : vector<256x128xf32>
    %55 = arith.mulf %41, %54 : vector<256x128xf32>
    %cst_25 = arith.constant -0.186288059 : f32
    %56 = vector.broadcast %cst_25 : f32 to vector<256x128xf32>
    %57 = arith.addf %56, %55 : vector<256x128xf32>
    %58 = arith.mulf %41, %57 : vector<256x128xf32>
    %cst_26 = arith.constant 0.0967841818 : f32
    %59 = vector.broadcast %cst_26 : f32 to vector<256x128xf32>
    %60 = arith.addf %59, %58 : vector<256x128xf32>
    %61 = arith.mulf %41, %60 : vector<256x128xf32>
    %cst_27 = arith.constant 0.374091953 : f32
    %62 = vector.broadcast %cst_27 : f32 to vector<256x128xf32>
    %63 = arith.addf %62, %61 : vector<256x128xf32>
    %64 = arith.mulf %41, %63 : vector<256x128xf32>
    %cst_28 = arith.constant 1.00002372 : f32
    %65 = vector.broadcast %cst_28 : f32 to vector<256x128xf32>
    %66 = arith.addf %65, %64 : vector<256x128xf32>
    %67 = arith.mulf %41, %66 : vector<256x128xf32>
    %cst_29 = arith.constant -1.26551223 : f32
    %68 = vector.broadcast %cst_29 : f32 to vector<256x128xf32>
    %69 = arith.addf %68, %67 : vector<256x128xf32>
    %cst_30 = arith.constant 0.000000e+00 : f32
    %70 = vector.broadcast %cst_30 : f32 to vector<256x128xf32>
    %71 = arith.subf %70, %35 : vector<256x128xf32>
    %72 = arith.mulf %71, %35 : vector<256x128xf32>
    %73 = arith.addf %72, %69 : vector<256x128xf32>
    %74 = math.exp %73 : vector<256x128xf32>
    %75 = arith.mulf %41, %74 : vector<256x128xf32>
    %cst_31 = arith.constant 0.000000e+00 : f32
    %76 = vector.broadcast %cst_31 : f32 to vector<256x128xf32>
    %77 = arith.cmpf oge, %34, %76 : vector<256x128xf32>
    %cst_32 = arith.constant 1.000000e+00 : f32
    %78 = vector.broadcast %cst_32 : f32 to vector<256x128xf32>
    %79 = arith.subf %78, %75 : vector<256x128xf32>
    %cst_33 = arith.constant 1.000000e+00 : f32
    %80 = vector.broadcast %cst_33 : f32 to vector<256x128xf32>
    %81 = arith.subf %75, %80 : vector<256x128xf32>
    %82 = arith.select %77, %79, %81 : vector<256x128xi1>, vector<256x128xf32>
    %cst_34 = arith.constant 1.000000e+00 : f32
    %83 = vector.broadcast %cst_34 : f32 to vector<256x128xf32>
    %84 = arith.addf %83, %82 : vector<256x128xf32>
    %85 = arith.mulf %32, %84 : vector<256x128xf32>
    %c0_35 = arith.constant 0 : index
    %c0_36 = arith.constant 0 : index
    %86 = vector.load %arg6[%c0_35, %c0_36] : memref<64x256xf32, #tpu.memory_space<vmem>>, vector<64x256xf32>
    %cst_37 = arith.constant dense<0.000000e+00> : vector<64x128xf32>
    %87 = tpu.matmul %86, %85, %cst_37 {dimension_numbers = #tpu.dot_dimension_numbers<[1], [0], [0], [1], [0, 0, 1, 1], [], []>} : vector<64x256xf32>, vector<256x128xf32>, vector<64x128xf32> -> vector<64x128xf32>
    %c0_38 = arith.constant 0 : index
    %c0_39 = arith.constant 0 : index
    %88 = vector.load %arg7[%c0_38, %c0_39] : memref<64x1xf32, #tpu.memory_space<vmem>>, vector<64x1xf32>
    %89 = vector.broadcast %88 : vector<64x1xf32> to vector<64x128xf32>
    %90 = arith.addf %87, %89 : vector<64x128xf32>
    %91 = arith.addf %90, %1 : vector<64x128xf32>
    %cst_40 = arith.constant dense<0.000000e+00> : vector<64xf32>
    %92 = vector.multi_reduction <add>, %91, %cst_40 [1] : vector<64x128xf32> to vector<64xf32>
    %93 = vector.shape_cast %92 : vector<64xf32> to vector<64x1xf32>
    %cst_41 = arith.constant 1.280000e+02 : f32
    %94 = vector.broadcast %cst_41 : f32 to vector<64x1xf32>
    %95 = arith.divf %93, %94 : vector<64x1xf32>
    %96 = vector.broadcast %95 : vector<64x1xf32> to vector<64x128xf32>
    %97 = arith.subf %91, %96 : vector<64x128xf32>
    %98 = arith.mulf %97, %97 : vector<64x128xf32>
    %cst_42 = arith.constant dense<0.000000e+00> : vector<64xf32>
    %99 = vector.multi_reduction <add>, %98, %cst_42 [1] : vector<64x128xf32> to vector<64xf32>
    %100 = vector.shape_cast %99 : vector<64xf32> to vector<64x1xf32>
    %cst_43 = arith.constant 1.280000e+02 : f32
    %101 = vector.broadcast %cst_43 : f32 to vector<64x1xf32>
    %102 = arith.divf %100, %101 : vector<64x1xf32>
    %103 = vector.broadcast %95 : vector<64x1xf32> to vector<64x128xf32>
    %104 = arith.subf %91, %103 : vector<64x128xf32>
    %cst_44 = arith.constant 9.99999974E-6 : f32
    %105 = vector.broadcast %cst_44 : f32 to vector<64x1xf32>
    %106 = arith.addf %102, %105 : vector<64x1xf32>
    %107 = math.rsqrt %106 : vector<64x1xf32>
    %108 = vector.broadcast %107 : vector<64x1xf32> to vector<64x128xf32>
    %109 = arith.mulf %104, %108 : vector<64x128xf32>
    %110 = vector.broadcast %2 : vector<1x128xf32> to vector<64x128xf32>
    %111 = arith.mulf %109, %110 : vector<64x128xf32>
    %112 = vector.broadcast %3 : vector<1x128xf32> to vector<64x128xf32>
    %113 = arith.addf %111, %112 : vector<64x128xf32>
    %c0_45 = arith.constant 0 : index
    %c0_46 = arith.constant 0 : index
    %114 = vector.load %arg8[%c0_45, %c0_46] : memref<128x256xf32, #tpu.memory_space<vmem>>, vector<128x256xf32>
    %cst_47 = arith.constant dense<0.000000e+00> : vector<64x256xf32>
    %115 = tpu.matmul %113, %114, %cst_47 {dimension_numbers = #tpu.dot_dimension_numbers<[1], [0], [0], [1], [0, 0, 1, 1], [], []>} : vector<64x128xf32>, vector<128x256xf32>, vector<64x256xf32> -> vector<64x256xf32>
    %c0_48 = arith.constant 0 : index
    %c0_49 = arith.constant 0 : index
    %116 = vector.load %arg9[%c0_48, %c0_49] : memref<1x256xf32, #tpu.memory_space<vmem>>, vector<1x256xf32>
    %117 = vector.broadcast %116 : vector<1x256xf32> to vector<64x256xf32>
    %118 = arith.addf %115, %117 : vector<64x256xf32>
    %cst_50 = arith.constant 5.000000e-01 : f32
    %119 = vector.broadcast %cst_50 : f32 to vector<64x256xf32>
    %120 = arith.mulf %119, %118 : vector<64x256xf32>
    %cst_51 = arith.constant 0.707106769 : f32
    %121 = vector.broadcast %cst_51 : f32 to vector<64x256xf32>
    %122 = arith.mulf %118, %121 : vector<64x256xf32>
    %123 = math.absf %122 : vector<64x256xf32>
    %cst_52 = arith.constant 5.000000e-01 : f32
    %124 = vector.broadcast %cst_52 : f32 to vector<64x256xf32>
    %125 = arith.mulf %124, %123 : vector<64x256xf32>
    %cst_53 = arith.constant 1.000000e+00 : f32
    %126 = vector.broadcast %cst_53 : f32 to vector<64x256xf32>
    %127 = arith.addf %126, %125 : vector<64x256xf32>
    %cst_54 = arith.constant 1.000000e+00 : f32
    %128 = vector.broadcast %cst_54 : f32 to vector<64x256xf32>
    %129 = arith.divf %128, %127 : vector<64x256xf32>
    %cst_55 = arith.constant 0.170872763 : f32
    %130 = vector.broadcast %cst_55 : f32 to vector<64x256xf32>
    %131 = arith.mulf %129, %130 : vector<64x256xf32>
    %cst_56 = arith.constant -0.822152256 : f32
    %132 = vector.broadcast %cst_56 : f32 to vector<64x256xf32>
    %133 = arith.addf %132, %131 : vector<64x256xf32>
    %134 = arith.mulf %129, %133 : vector<64x256xf32>
    %cst_57 = arith.constant 1.48851585 : f32
    %135 = vector.broadcast %cst_57 : f32 to vector<64x256xf32>
    %136 = arith.addf %135, %134 : vector<64x256xf32>
    %137 = arith.mulf %129, %136 : vector<64x256xf32>
    %cst_58 = arith.constant -1.13520396 : f32
    %138 = vector.broadcast %cst_58 : f32 to vector<64x256xf32>
    %139 = arith.addf %138, %137 : vector<64x256xf32>
    %140 = arith.mulf %129, %139 : vector<64x256xf32>
    %cst_59 = arith.constant 0.278868079 : f32
    %141 = vector.broadcast %cst_59 : f32 to vector<64x256xf32>
    %142 = arith.addf %141, %140 : vector<64x256xf32>
    %143 = arith.mulf %129, %142 : vector<64x256xf32>
    %cst_60 = arith.constant -0.186288059 : f32
    %144 = vector.broadcast %cst_60 : f32 to vector<64x256xf32>
    %145 = arith.addf %144, %143 : vector<64x256xf32>
    %146 = arith.mulf %129, %145 : vector<64x256xf32>
    %cst_61 = arith.constant 0.0967841818 : f32
    %147 = vector.broadcast %cst_61 : f32 to vector<64x256xf32>
    %148 = arith.addf %147, %146 : vector<64x256xf32>
    %149 = arith.mulf %129, %148 : vector<64x256xf32>
    %cst_62 = arith.constant 0.374091953 : f32
    %150 = vector.broadcast %cst_62 : f32 to vector<64x256xf32>
    %151 = arith.addf %150, %149 : vector<64x256xf32>
    %152 = arith.mulf %129, %151 : vector<64x256xf32>
    %cst_63 = arith.constant 1.00002372 : f32
    %153 = vector.broadcast %cst_63 : f32 to vector<64x256xf32>
    %154 = arith.addf %153, %152 : vector<64x256xf32>
    %155 = arith.mulf %129, %154 : vector<64x256xf32>
    %cst_64 = arith.constant -1.26551223 : f32
    %156 = vector.broadcast %cst_64 : f32 to vector<64x256xf32>
    %157 = arith.addf %156, %155 : vector<64x256xf32>
    %cst_65 = arith.constant 0.000000e+00 : f32
    %158 = vector.broadcast %cst_65 : f32 to vector<64x256xf32>
    %159 = arith.subf %158, %123 : vector<64x256xf32>
    %160 = arith.mulf %159, %123 : vector<64x256xf32>
    %161 = arith.addf %160, %157 : vector<64x256xf32>
    %162 = math.exp %161 : vector<64x256xf32>
    %163 = arith.mulf %129, %162 : vector<64x256xf32>
    %cst_66 = arith.constant 0.000000e+00 : f32
    %164 = vector.broadcast %cst_66 : f32 to vector<64x256xf32>
    %165 = arith.cmpf oge, %122, %164 : vector<64x256xf32>
    %cst_67 = arith.constant 1.000000e+00 : f32
    %166 = vector.broadcast %cst_67 : f32 to vector<64x256xf32>
    %167 = arith.subf %166, %163 : vector<64x256xf32>
    %cst_68 = arith.constant 1.000000e+00 : f32
    %168 = vector.broadcast %cst_68 : f32 to vector<64x256xf32>
    %169 = arith.subf %163, %168 : vector<64x256xf32>
    %170 = arith.select %165, %167, %169 : vector<64x256xi1>, vector<64x256xf32>
    %cst_69 = arith.constant 1.000000e+00 : f32
    %171 = vector.broadcast %cst_69 : f32 to vector<64x256xf32>
    %172 = arith.addf %171, %170 : vector<64x256xf32>
    %173 = arith.mulf %120, %172 : vector<64x256xf32>
    %c0_70 = arith.constant 0 : index
    %c0_71 = arith.constant 0 : index
    %174 = vector.load %arg10[%c0_70, %c0_71] : memref<256x128xf32, #tpu.memory_space<vmem>>, vector<256x128xf32>
    %cst_72 = arith.constant dense<0.000000e+00> : vector<64x128xf32>
    %175 = tpu.matmul %173, %174, %cst_72 {dimension_numbers = #tpu.dot_dimension_numbers<[1], [0], [0], [1], [0, 0, 1, 1], [], []>} : vector<64x256xf32>, vector<256x128xf32>, vector<64x128xf32> -> vector<64x128xf32>
    %c0_73 = arith.constant 0 : index
    %c0_74 = arith.constant 0 : index
    %176 = vector.load %arg11[%c0_73, %c0_74] : memref<1x128xf32, #tpu.memory_space<vmem>>, vector<1x128xf32>
    %177 = vector.broadcast %176 : vector<1x128xf32> to vector<64x128xf32>
    %178 = arith.addf %175, %177 : vector<64x128xf32>
    %c0_75 = arith.constant 0 : index
    %c0_76 = arith.constant 0 : index
    %c0_77 = arith.constant 0 : index
    %179 = vector.load %arg12[%c0_75, %c0_76, %c0_77] : memref<1x64x128xf32, #tpu.memory_space<vmem>>, vector<1x64x128xf32>
    %180 = vector.shape_cast %179 : vector<1x64x128xf32> to vector<64x128xf32>
    %181 = vector.shape_cast %178 : vector<64x128xf32> to vector<1x64x128xf32>
    tpu.vector_store %arg12[%c0_75, %c0_76, %c0_77], %181 {strides = array<i32>} : memref<1x64x128xf32, #tpu.memory_space<vmem>>, vector<1x64x128xf32>,
    return
  }
  func.func @transform_0(%arg0: i32) -> (i32, i32, i32) {
    %c0_i32 = arith.constant 0 : i32
    %c0_i32_0 = arith.constant 0 : i32
    %c0_i32_1 = arith.constant 0 : i32
    return %arg0, %c0_i32, %c0_i32_0 : i32, i32, i32
  }
  func.func @transform_1(%arg0: i32) -> (i32, i32) {
    %c0_i32 = arith.constant 0 : i32
    %c0_i32_0 = arith.constant 0 : i32
    %c0_i32_1 = arith.constant 0 : i32
    return %c0_i32, %c0_i32_0 : i32, i32
  }
  func.func @transform_2(%arg0: i32) -> (i32, i32) {
    %c0_i32 = arith.constant 0 : i32
    %c0_i32_0 = arith.constant 0 : i32
    %c0_i32_1 = arith.constant 0 : i32
    return %c0_i32, %c0_i32_0 : i32, i32
  }
  func.func @transform_3(%arg0: i32) -> (i32, i32) {
    %c0_i32 = arith.constant 0 : i32
    %c0_i32_0 = arith.constant 0 : i32
    %c0_i32_1 = arith.constant 0 : i32
    return %c0_i32, %c0_i32_0 : i32, i32
  }
  func.func @transform_4(%arg0: i32) -> (i32, i32) {
    %c0_i32 = arith.constant 0 : i32
    %c0_i32_0 = arith.constant 0 : i32
    %c0_i32_1 = arith.constant 0 : i32
    return %c0_i32, %c0_i32_0 : i32, i32
  }
  func.func @transform_5(%arg0: i32) -> (i32, i32) {
    %c0_i32 = arith.constant 0 : i32
    %c0_i32_0 = arith.constant 0 : i32
    %c0_i32_1 = arith.constant 0 : i32
    return %c0_i32, %c0_i32_0 : i32, i32
  }
  func.func @transform_6(%arg0: i32) -> (i32, i32) {
    %c0_i32 = arith.constant 0 : i32
    %c0_i32_0 = arith.constant 0 : i32
    %c0_i32_1 = arith.constant 0 : i32
    return %c0_i32, %c0_i32_0 : i32, i32
  }
  func.func @transform_7(%arg0: i32) -> (i32, i32) {
    %c0_i32 = arith.constant 0 : i32
    %c0_i32_0 = arith.constant 0 : i32
    %c0_i32_1 = arith.constant 0 : i32
    return %c0_i32, %c0_i32_0 : i32, i32
  }
  func.func @transform_8(%arg0: i32) -> (i32, i32) {
    %c0_i32 = arith.constant 0 : i32
    %c0_i32_0 = arith.constant 0 : i32
    %c0_i32_1 = arith.constant 0 : i32
    return %c0_i32, %c0_i32_0 : i32, i32
  }
  func.func @transform_9(%arg0: i32) -> (i32, i32) {
    %c0_i32 = arith.constant 0 : i32
    %c0_i32_0 = arith.constant 0 : i32
    %c0_i32_1 = arith.constant 0 : i32
    return %c0_i32, %c0_i32_0 : i32, i32
  }
  func.func @transform_10(%arg0: i32) -> (i32, i32) {
    %c0_i32 = arith.constant 0 : i32
    %c0_i32_0 = arith.constant 0 : i32
    %c0_i32_1 = arith.constant 0 : i32
    return %c0_i32, %c0_i32_0 : i32, i32
  }
  func.func @transform_11(%arg0: i32) -> (i32, i32, i32) {
    %c0_i32 = arith.constant 0 : i32
    %c0_i32_0 = arith.constant 0 : i32
    %c0_i32_1 = arith.constant 0 : i32
    return %arg0, %c0_i32, %c0_i32_0 : i32, i32, i32
  }
}

</mosaic_0001>

<bundles_post_ra>
// kernel: mixure_layer.1
= control target key start
LH: loop header
LB: loop body
LE: loop exit
PB: predicated region body
PF: predicated region fallthrough
CT: control target
= control target key end

     0   :  { %16 = vsyncpa [#allocation3], 0  ;;  %s6743_s0 = inlined_call_operand.vmem [shape: f32[2,64,128], index: 0, kind: input, shape index: {}]   ;;  %s6744_s1 = inlined_call_operand.vmem [shape: f32[1,128], index: 1, kind: input, shape index: {}]   ;;  %s6745_s2 = inlined_call_operand.vmem [shape: f32[1,128], index: 2, kind: input, shape index: {}]   ;;  %s6746_s3 = inlined_call_operand.vmem [shape: f32[256,64], index: 3, kind: input, shape index: {}]   ;;  %s6747_s4 = inlined_call_operand.vmem [shape: f32[256,1], index: 4, kind: input, shape index: {}]   ;;  %s6748_s5 = inlined_call_operand.hbm [shape: f32[64,256], index: 5, kind: input, shape index: {}]   ;;  %s6749_s6 = inlined_call_operand.vmem [shape: f32[64,1], index: 6, kind: input, shape index: {}]   ;;  %s6750_s7 = inlined_call_operand.vmem [shape: f32[128,256], index: 7, kind: input, shape index: {}]   ;;  %s6751_s8 = inlined_call_operand.vmem [shape: f32[1,256], index: 8, kind: input, shape index: {}]   ;;  %s6752_s9 = inlined_call_operand.vmem [shape: f32[256,128], index: 9, kind: input, shape index: {}]   ;;  %s6753_s10 = inlined_call_operand.vmem [shape: f32[1,128], index: 10, kind: input, shape index: {}]   ;;  %s6754_s11 = inlined_call_operand.hbm [shape: f32[2,64,128], index: 11, kind: output, shape index: {}]  }
   0x1   :  { %17 = vsyncpa [#allocation4], 0 }
   0x2   :  { %19 = vsyncpa [#allocation4 + $0x1], 0  ;;  %s4326_s17 = smov 0   ;;  %s4328_s18 = smov 0  }
   0x3   :  { %s4330_s19 = smov 0   ;;  %s4332_s20 = smov 0  }
   0x4 LB: > { %s4347_s21 = sadd.s32 4294967295, %s4256_s20   ;;  %s3527_s22 = sadd.s32 4294967294, %s4256_s20   ;;  %s4256_s20 = sphi %s4332_s20, %s7007_s20   ;;  %s4252_s19 = sphi %s4330_s19, %s7006_s19   ;;  %s4248_s18 = sphi %s4328_s18, %s7005_s18   ;;  %s4244_s17 = sphi %s4326_s17, %s7004_s17  }
   0x5   : > { %s4351_s23 = sadd.s32 1, %s4256_s20   ;;  %s268_s24 = sadd.s32 1, %s4252_s19 }
   0x6   : > { %s265_s25 = ssub.s32 %s4256_s20, %s4351_s23  ;;  %p278_p0 = scmp.ne.s32.totalorder %s4252_s19, %s4248_s18 }
   0x7   : > { %p266_p1 = scmp.eq.s32.totalorder %s265_s25, 0  ;;  %p279_p2 = scmp.eq.s32.totalorder %s4347_s21, 1 }
   0x8   : > { %p284_p3 = scmp.ne.s32.totalorder %s4248_s18, %s4244_s17  ;;  %p285_p4 = scmp.eq.s32.totalorder %s3527_s22, 1 }
   0x9   : > { %s4362_s26 = scalar_select %p266_p1, %s4252_s19, %s268_s24  }
   0xa   : > { %p4364_p5 = por %p279_p2, %p278_p0  ;;  %p4368_p6 = por %p285_p4, %p284_p3 }
   0xb   : > { %6823 = sst [smem:[#allocation8_spill]] %s4362_s26  ;;  %p3528_p7 = scmp.ge.s32.totalorder %s4256_s20, 1 }
   0xc   : > { %s6825_s28 = scalar_select %p4368_p6, 1, 0 }
   0xd   : > { %p292_p8 = scmp.lt.s32.totalorder %s4256_s20, 3  ;;  %p3888_p9 = scmp.eq.s32.totalorder %s4347_s21, 0 }
   0xe   : > { %s4258_s30 = smov [#allocation2]  }
   0xf   : > { %p4375_p10 = pnand %p3528_p7, %p292_p8  ;;  %s316_s12 = sshll.u32 %s4258_s30, 4  ;;  %s317_s12 = int_to_ptr.vmem [resolvable:$true] %s316_s12 }
  0x10   : > { %s4177_s13 = scalar_lea.vmem %s317_s12, 2048  ;;  %p4185_p3 = scmp.lt.s32.totalorder %s317_s12, %s317_s12 }
  0x11   : > { %p3880_p11 = pneg %p4375_p10  ;;  %p4178_p0 = scmp.ne.s32.totalorder %s317_s12, %s4177_s13 }
  0x12   : > { %p4186_p4 = scmp.lt.s32.totalorder %s4177_s13, %s4177_s13 }
  0x13   : > { %p3881_p12 = pnand %p3888_p9, %p3880_p11 }
  0x14   : > { %p4187_p6 = por %p4186_p4, %p4185_p3 }
  0x15   : > { %p4168_p13 = pneg %p3881_p12 }
  0x17   : > { %p4180_p1 = pnand %p4178_p0, %p4168_p13 }
  0x19   : > { %p4181_p2 = pneg %p4180_p1 }
  0x1b   : > { %p4188_p7 = pnand %p4187_p6, %p4181_p2 }
  0x1d   : > { %4191 = shalt.err (!%p4188_p7)
}
  0x1e   : > { %s4259_s14 = smov 256   ;;  %s4260_s15 = smov 16  }
  0x1f   : > { %3883 = dma.hbm_to_vmem [thread:$0]  (!%p3881_p12), %s6748_s5, 2048, %s317_s12, [#allocation3], %s4259_s14, %s4259_s14, %s4260_s15  }
  0x20   : > { %355 = sbr.rel (%p4375_p10) target bundleno = 2007 (0x7d7), region = 64 }
  0x25   : > { %4235 = dma.done.wait (%p3888_p9), [#allocation3], 2048  }
  0x26   : > { %4237 = vsyncadd (%p3888_p9), [#allocation3], 4294965248  ;;  %p395_p8 = scmp.lt.s32.totalorder %s4347_s21, 1  ;;  %v4261_v40 = vmov 0   ;;  %v527_v41 = vld [vmem:[%s6746_s3] sm:$0xff]  ;;  %vm751_vm0 = vcmask 523264  }
  0x27   : > { %3931 = vset.pattern.permute.xlu1 %v4261_v40  ;;  %v574_v42 = vld [vmem:[%s6747_s4 + $0x78] sm:$0xff]  ;;  %3930 = vset.pattern.permute.xlu0 %v4261_v40  ;;  %v589_v43 = vld [vmem:[%s6747_s4 + $0xf0] sm:$0xff]  ;;  %v588_v45 = vld [vmem:[%s6747_s4 + $0xe8] sm:$0xff]  ;;  %s392_s29 = sand.u32 1, %s4248_s18  }
  0x28   : > { %s396_s24 = scalar_select %p395_p8, %s4347_s21, 1  ;;  %3794 = vmatprep.mubr.msk.f32.mxu0 %vm751_vm0, %v527_v41  ;;  %v573_v44 = vld [vmem:[%s6747_s4 + $0x70] sm:$0xff]  ;;  %v572_v46 = vld [vmem:[%s6747_s4 + $0x68] sm:$0xff]  ;;  %v587_v47 = vld [vmem:[%s6747_s4 + $0xe0] sm:$0xff] }
  0x29   : > { %v590_v48 = vld [vmem:[%s6747_s4 + $0xf8] sm:$0xff]  ;;  %v571_v49 = vld [vmem:[%s6747_s4 + $0x60] sm:$0xff]  ;;  %v569_v52 = vld [vmem:[%s6747_s4 + $0x50] sm:$0xff]  ;;  %s3533_s12 = sshll.u32 %s392_s29, 6  ;;  %s6703_s13 = scalar_lea.sflag [#allocation4], %s392_s29 }
  0x2a   : > { %s3624_s25 = sshll.u32 %s396_s24, 6  ;;  %v570_v50 = vld [vmem:[%s6747_s4 + $0x58] sm:$0xff]  ;;  %v585_v53 = vld [vmem:[%s6747_s4 + $0xd0] sm:$0xff]  ;;  %v568_v54 = vld [vmem:[%s6747_s4 + $0x48] sm:$0xff]  ;;  %s6682_s16 = scalar_lea.vmem [#allocation5], %s3533_s12 }
  0x2b   : > { %s4397_s26 = scalar_lea.vmem %s6743_s0, %s3624_s25  ;;  %v586_v51 = vld [vmem:[%s6747_s4 + $0xd8] sm:$0xff]  ;;  %v584_v55 = vld [vmem:[%s6747_s4 + $0xc8] sm:$0xff]  ;;  %v567_v56 = vld [vmem:[%s6747_s4 + $0x40] sm:$0xff]  ;;  %s3453_s22 = sshll.u32 %s6682_s16, 4  ;;  %s6693_s22 = int_to_ptr.vmem [resolvable:$true] %s3453_s22 }
  0x2c   : > { %v407_v0 = vld [vmem:[%s4397_s26 + $0x38] sm:$0xff]  ;;  %v405_v1 = vld [vmem:[%s4397_s26 + $0x28] sm:$0xff]  ;;  %v406_v2 = vld [vmem:[%s4397_s26 + $0x30] sm:$0xff]  ;;  %s4192_s12 = scalar_lea.vmem %s6693_s22, 1024 }
  0x2d   : > { %424 = vadd.xlane.f32.xlu0 %v407_v0  ;;  %420 = vadd.xlane.f32.xlu1 %v405_v1  ;;  %v404_v3 = vld [vmem:[%s4397_s26 + $0x20] sm:$0xff]  ;;  %v403_v4 = vld [vmem:[%s4397_s26 + $0x18] sm:$0xff]  ;;  %v402_v5 = vld [vmem:[%s4397_s26 + $0x10] sm:$0xff]  ;;  %p4193_p6 = scmp.ne.s32.totalorder %s6693_s22, %s4192_s12 }
  0x2e   : > { %v401_v6 = vld [vmem:[%s4397_s26 + $0x8] sm:$0xff]  ;;  %v400_v7 = vld [vmem:[%s4397_s26] sm:$0xff]  ;;  %v566_v58 = vld [vmem:[%s6747_s4 + $0x38] sm:$0xff] }
  0x2f   : > { %v583_v57 = vld [vmem:[%s6747_s4 + $0xc0] sm:$0xff]  ;;  %v582_v59 = vld [vmem:[%s6747_s4 + $0xb8] sm:$0xff]  ;;  %v565_v60 = vld [vmem:[%s6747_s4 + $0x30] sm:$0xff]  ;;  %p4194_p9 = pnand %p4193_p6, %p4364_p5 }
  0x30   : > { %v581_v61 = vld [vmem:[%s6747_s4 + $0xb0] sm:$0xff]  ;;  %v564_v62 = vld [vmem:[%s6747_s4 + $0x28] sm:$0xff] }
  0x31   : > { %422 = vadd.xlane.f32.xlu0 %v406_v2  ;;  %418 = vadd.xlane.f32.xlu1 %v404_v3  ;;  %v580_v63 = vld [vmem:[%s6747_s4 + $0xa8] sm:$0xff]  ;;  %p4195_p10 = pneg %p4194_p9 }
  0x35   : > { %416 = vadd.xlane.f32.xlu0 %v403_v4  ;;  %414 = vadd.xlane.f32.xlu1 %v402_v5 }
  0x39   : > { %412 = vadd.xlane.f32.xlu0 %v401_v6  ;;  %410 = vadd.xlane.f32.xlu1 %v400_v7 }
  0xb6   : > { %v425_v8 = vpop.xlane.xlu0 %424  ;;  %v421_v9 = vpop.xlane.xlu1 %420 }
  0xb7   : > { %v434_v10 = vmul.f32 0.0078125, %v425_v8  ;;  %v432_v11 = vmul.f32 0.0078125, %v421_v9  ;;  %v559_v8 = vld [vmem:[%s6747_s4] sm:$0xff] }
  0xb8   : > { %v575_v9 = vld [vmem:[%s6747_s4 + $0x80] sm:$0xff] }
  0xb9   : > { %v4407_v12 = vsub.f32 %v407_v0, %v434_v10  ;;  %v4409_v13 = vsub.f32 %v405_v1, %v432_v11  ;;  %v563_v0 = vld [vmem:[%s6747_s4 + $0x20] sm:$0xff]  ;;  %v2274_v10 = vld [vmem:[%s6749_s6 + $0x8] sm:$0xff] }
  0xba   : > { %v423_v14 = vpop.xlane.xlu0 %422  ;;  %v419_v15 = vpop.xlane.xlu1 %418  ;;  %v579_v1 = vld [vmem:[%s6747_s4 + $0xa0] sm:$0xff] }
  0xbb   : > { %v433_v16 = vmul.f32 0.0078125, %v423_v14  ;;  %v450_v17 = vmul.f32 %v4407_v12, %v4407_v12  ;;  %v431_v18 = vmul.f32 0.0078125, %v419_v15  ;;  %v448_v21 = vmul.f32 %v4409_v13, %v4409_v13  ;;  %v2273_v11 = vld [vmem:[%s6749_s6] sm:$0xff]  ;;  %v2276_v14 = vld [vmem:[%s6749_s6 + $0x18] sm:$0xff]  ;;  %v2275_v15 = vld [vmem:[%s6749_s6 + $0x10] sm:$0xff] }
  0xbd   : > { %v4413_v19 = vsub.f32 %v406_v2, %v433_v16  ;;  %465 = vadd.xlane.f32.xlu0 %v450_v17  ;;  %v4415_v20 = vsub.f32 %v404_v3, %v431_v18  ;;  %v562_v2 = vld [vmem:[%s6747_s4 + $0x18] sm:$0xff]  ;;  %v2278_v16 = vld [vmem:[%s6749_s6 + $0x28] sm:$0xff]  ;;  %v2277_v17 = vld [vmem:[%s6749_s6 + $0x20] sm:$0xff] }
  0xbe   : > { %v417_v22 = vpop.xlane.xlu0 %416  ;;  %v415_v23 = vpop.xlane.xlu1 %414  ;;  %v578_v3 = vld [vmem:[%s6747_s4 + $0x98] sm:$0xff] }
  0xbf   : > { %v430_v24 = vmul.f32 0.0078125, %v417_v22  ;;  %v449_v25 = vmul.f32 %v4413_v19, %v4413_v19  ;;  %v429_v26 = vmul.f32 0.0078125, %v415_v23  ;;  %v447_v29 = vmul.f32 %v4415_v20, %v4415_v20  ;;  %v2280_v18 = vld [vmem:[%s6749_s6 + $0x38] sm:$0xff]  ;;  %v2279_v22 = vld [vmem:[%s6749_s6 + $0x30] sm:$0xff] }
  0xc1   : > { %v4421_v27 = vsub.f32 %v403_v4, %v430_v24  ;;  %461 = vadd.xlane.f32.xlu0 %v448_v21  ;;  %463 = vadd.xlane.f32.xlu1 %v449_v25  ;;  %v4423_v28 = vsub.f32 %v402_v5, %v429_v26  ;;  %v561_v4 = vld [vmem:[%s6747_s4 + $0x10] sm:$0xff] }
  0xc2   : > { %v413_v30 = vpop.xlane.xlu0 %412  ;;  %v411_v31 = vpop.xlane.xlu1 %410  ;;  %v577_v5 = vld [vmem:[%s6747_s4 + $0x90] sm:$0xff] }
  0xc3   : > { %v428_v32 = vmul.f32 0.0078125, %v413_v30  ;;  %v446_v33 = vmul.f32 %v4421_v27, %v4421_v27  ;;  %v427_v34 = vmul.f32 0.0078125, %v411_v31  ;;  %v445_v37 = vmul.f32 %v4423_v28, %v4423_v28 }
  0xc5   : > { %v4429_v35 = vsub.f32 %v401_v6, %v428_v32  ;;  %457 = vadd.xlane.f32.xlu0 %v446_v33  ;;  %459 = vadd.xlane.f32.xlu1 %v447_v29  ;;  %v4431_v36 = vsub.f32 %v400_v7, %v427_v34  ;;  %v560_v6 = vld [vmem:[%s6747_s4 + $0x8] sm:$0xff] }
  0xc6   : > { %v576_v7 = vld [vmem:[%s6747_s4 + $0x88] sm:$0xff] }
  0xc7   : > { %v444_v38 = vmul.f32 %v4429_v35, %v4429_v35  ;;  %v443_v39 = vmul.f32 %v4431_v36, %v4431_v36 }
  0xc9   : > { %453 = vadd.xlane.f32.xlu0 %v444_v38  ;;  %455 = vadd.xlane.f32.xlu1 %v445_v37 }
  0xcd   : > { %451 = vadd.xlane.f32.xlu1 %v443_v39 }
  0xde   : > { %668 = vperm.xlu1 %3931, %v574_v42  }
  0xdf   : > { %748 = vperm.xlu0 %3930, %v590_v48  }
  0xe2   : > { %743 = vperm.xlu1 %3931, %v589_v43  }
  0xe3   : > { %648 = vperm.xlu0 %3930, %v570_v50   ;;  %v3536_v50 = vld [vmem:[%s6744_s1] ss:$0 sm:$0xff] }
  0xe6   : > { %663 = vperm.xlu1 %3931, %v573_v44  }
  0xe7   : > { %643 = vperm.xlu0 %3930, %v569_v52  }
  0xea   : > { %738 = vperm.xlu1 %3931, %v588_v45  }
  0xeb   : > { %638 = vperm.xlu0 %3930, %v568_v54  }
  0xee   : > { %658 = vperm.xlu1 %3931, %v572_v46  }
  0xef   : > { %633 = vperm.xlu0 %3930, %v567_v56  }
  0xf2   : > { %733 = vperm.xlu1 %3931, %v587_v47  }
  0xf3   : > { %628 = vperm.xlu0 %3930, %v566_v58  }
  0xf6   : > { %653 = vperm.xlu1 %3931, %v571_v49  }
  0xf7   : > { %623 = vperm.xlu0 %3930, %v565_v60  }
  0xfa   : > { %728 = vperm.xlu1 %3931, %v586_v51  }
  0xfb   : > { %618 = vperm.xlu0 %3930, %v564_v62  }
  0xfe   : > { %723 = vperm.xlu1 %3931, %v585_v53   ;;  %v3537_v53 = vld [vmem:[%s6745_s2] ss:$0 sm:$0xff] }
  0xff   : > { %613 = vperm.xlu0 %3930, %v563_v0  }
 0x102   : > { %718 = vperm.xlu1 %3931, %v584_v55  }
 0x103   : > { %608 = vperm.xlu0 %3930, %v562_v2  }
 0x106   : > { %713 = vperm.xlu1 %3931, %v583_v57  }
 0x107   : > { %603 = vperm.xlu0 %3930, %v561_v4  }
 0x10a   : > { %708 = vperm.xlu1 %3931, %v582_v59  }
 0x10b   : > { %598 = vperm.xlu0 %3930, %v560_v6  }
 0x10e   : > { %703 = vperm.xlu1 %3931, %v581_v61  }
 0x10f   : > { %593 = vperm.xlu0 %3930, %v559_v8  }
 0x112   : > { %698 = vperm.xlu1 %3931, %v580_v63  }
 0x113   : > { %2288 = vperm.xlu0 %3930, %v2274_v10  }
 0x116   : > { %693 = vperm.xlu1 %3931, %v579_v1  }
 0x117   : > { %2298 = vperm.xlu0 %3930, %v2276_v14  }
 0x11a   : > { %688 = vperm.xlu1 %3931, %v578_v3  }
 0x11b   : > { %2308 = vperm.xlu0 %3930, %v2278_v16   ;;  %v529_v16 = vld [vmem:[%s6746_s3 + $0x10] sm:$0xff] }
 0x11e   : > { %683 = vperm.xlu1 %3931, %v577_v5  }
 0x11f   : > { %2318 = vperm.xlu0 %3930, %v2280_v18   ;;  %v532_v18 = vld [vmem:[%s6746_s3 + $0x28] sm:$0xff] }
 0x122   : > { %678 = vperm.xlu1 %3931, %v576_v7  }
 0x126   : > { %673 = vperm.xlu1 %3931, %v575_v9  }
 0x12a   : > { %2283 = vperm.xlu1 %3931, %v2273_v11  }
 0x12e   : > { %2293 = vperm.xlu1 %3931, %v2275_v15  }
 0x132   : > { %2303 = vperm.xlu1 %3931, %v2277_v17   ;;  %v531_v17 = vld [vmem:[%s6746_s3 + $0x20] sm:$0xff] }
 0x136   : > { %2313 = vperm.xlu1 %3931, %v2279_v22   ;;  %v534_v22 = vld [vmem:[%s6746_s3 + $0x38] sm:$0xff] }
 0x146   : > { %v466_v21 = vpop.xlane.xlu0 %465 }
 0x147   : > { %v474_v23 = vmul.f32 0.0078125, %v466_v21  ;;  %v533_v21 = vld [vmem:[%s6746_s3 + $0x30] sm:$0xff] }
 0x149   : > { %v482_v24 = vadd.f32 1e-05, %v474_v23  ;;  %v535_v23 = vld [vmem:[%s6746_s3 + $0x40] sm:$0xff] }
 0x14a   : > { %v462_v25 = vpop.xlane.xlu0 %461  ;;  %v464_v26 = vpop.xlane.xlu1 %463 }
 0x14b   : > { %3932 = vrsqrt.f32 %v482_v24  ;;  %v472_v29 = vmul.f32 0.0078125, %v462_v25  ;;  %v473_v30 = vmul.f32 0.0078125, %v464_v26  ;;  %v536_v24 = vld [vmem:[%s6746_s3 + $0x48] sm:$0xff]  ;;  %v537_v25 = vld [vmem:[%s6746_s3 + $0x50] sm:$0xff]  ;;  %v538_v26 = vld [vmem:[%s6746_s3 + $0x58] sm:$0xff] }
 0x14d   : > { %v480_v31 = vadd.f32 1e-05, %v472_v29  ;;  %v481_v32 = vadd.f32 1e-05, %v473_v30  ;;  %v539_v29 = vld [vmem:[%s6746_s3 + $0x60] sm:$0xff]  ;;  %v540_v30 = vld [vmem:[%s6746_s3 + $0x68] sm:$0xff] }
 0x14e   : > { %v458_v33 = vpop.xlane.xlu0 %457  ;;  %v460_v34 = vpop.xlane.xlu1 %459 }
 0x14f   : > { %3934 = vrsqrt.f32 %v480_v31  ;;  %v470_v37 = vmul.f32 0.0078125, %v458_v33  ;;  %v471_v38 = vmul.f32 0.0078125, %v460_v34  ;;  %v541_v31 = vld [vmem:[%s6746_s3 + $0x70] sm:$0xff]  ;;  %v543_v33 = vld [vmem:[%s6746_s3 + $0x80] sm:$0xff]  ;;  %v544_v34 = vld [vmem:[%s6746_s3 + $0x88] sm:$0xff] }
 0x150   : > { %3936 = vrsqrt.f32 %v481_v32  ;;  %v542_v32 = vld [vmem:[%s6746_s3 + $0x78] sm:$0xff] }
 0x151   : > { %v478_v39 = vadd.f32 1e-05, %v470_v37  ;;  %v479_v40 = vadd.f32 1e-05, %v471_v38  ;;  %v545_v37 = vld [vmem:[%s6746_s3 + $0x90] sm:$0xff]  ;;  %v546_v38 = vld [vmem:[%s6746_s3 + $0x98] sm:$0xff] }
 0x152   : > { %v454_v41 = vpop.xlane.xlu0 %453  ;;  %v456_v42 = vpop.xlane.xlu1 %455 }
 0x153   : > { %3938 = vrsqrt.f32 %v478_v39  ;;  %v468_v43 = vmul.f32 0.0078125, %v454_v41  ;;  %v469_v44 = vmul.f32 0.0078125, %v456_v42  ;;  %v547_v39 = vld [vmem:[%s6746_s3 + $0xa0] sm:$0xff]  ;;  %v549_v41 = vld [vmem:[%s6746_s3 + $0xb0] sm:$0xff]  ;;  %v550_v42 = vld [vmem:[%s6746_s3 + $0xb8] sm:$0xff] }
 0x154   : > { %3940 = vrsqrt.f32 %v479_v40  ;;  %v548_v40 = vld [vmem:[%s6746_s3 + $0xa8] sm:$0xff] }
 0x155   : > { %v476_v45 = vadd.f32 1e-05, %v468_v43  ;;  %v477_v46 = vadd.f32 1e-05, %v469_v44  ;;  %v551_v43 = vld [vmem:[%s6746_s3 + $0xc0] sm:$0xff]  ;;  %v552_v44 = vld [vmem:[%s6746_s3 + $0xc8] sm:$0xff] }
 0x156   : > { %v452_v47 = vpop.xlane.xlu1 %451 }
 0x157   : > { %3942 = vrsqrt.f32 %v476_v45  ;;  %v467_v48 = vmul.f32 0.0078125, %v452_v47  ;;  %v553_v45 = vld [vmem:[%s6746_s3 + $0xd0] sm:$0xff]  ;;  %v555_v47 = vld [vmem:[%s6746_s3 + $0xe0] sm:$0xff] }
 0x158   : > { %v3933_v49 = vpop.eup %3932  ;;  %3944 = vrsqrt.f32 %v477_v46  ;;  %v554_v46 = vld [vmem:[%s6746_s3 + $0xd8] sm:$0xff] }
 0x159   : > { %v475_v51 = vadd.f32 1e-05, %v467_v48  ;;  %v498_v52 = vmul.f32 %v3933_v49, %v4407_v12  ;;  %v556_v48 = vld [vmem:[%s6746_s3 + $0xe8] sm:$0xff]  ;;  %v557_v49 = vld [vmem:[%s6746_s3 + $0xf0] sm:$0xff] }
 0x15b   : > { %3946 = vrsqrt.f32 %v475_v51  ;;  %v512_v54 = vmul.f32 %v3536_v50, %v498_v52  ;;  %v4701_v51 = vpop.permute.xlu0 %748 }
 0x15c   : > { %v3935_v55 = vpop.eup %3934 }
 0x15d   : > { %v3937_v56 = vpop.eup %3936  ;;  %v526_v57 = vadd.f32 %v3537_v53, %v512_v54  ;;  %v496_v58 = vmul.f32 %v3935_v55, %v4409_v13 }
 0x15e   : > { %v497_v59 = vmul.f32 %v3937_v56, %v4413_v19 }
 0x15f   : > { %3778 = vmatprep.subr.mxu0 %v526_v57  ;;  %v510_v62 = vmul.f32 %v3536_v50, %v496_v58  ;;  %v4703_v52 = vpop.permute.xlu0 %648 }
 0x160   : > { %v3939_v60 = vpop.eup %3938  ;;  %3779 = vmatpush3.msra.mxu0 %v526_v57  ;;  %v511_v61 = vmul.f32 %v3536_v50, %v497_v59 }
 0x161   : > { %v3941_v63 = vpop.eup %3940  ;;  %v494_v12 = vmul.f32 %v3939_v60, %v4421_v27  ;;  %v524_v3 = vadd.f32 %v3537_v53, %v510_v62  ;;  %v4711_v62 = vpop.permute.xlu1 %668 }
 0x162   : > { %v525_v0 = vadd.f32 %v3537_v53, %v511_v61  ;;  %v495_v1 = vmul.f32 %v3941_v63, %v4415_v20 }
 0x163   : > { %v508_v5 = vmul.f32 %v3536_v50, %v494_v12 }
 0x164   : > { %v3943_v2 = vpop.eup %3942  ;;  %3780 = vmatprep.subr.mxu0 %v525_v0  ;;  %v509_v4 = vmul.f32 %v3536_v50, %v495_v1 }
 0x165   : > { %v3945_v6 = vpop.eup %3944  ;;  %3781 = vmatpush3.msra.mxu0 %v525_v0  ;;  %v492_v13 = vmul.f32 %v3943_v2, %v4429_v35  ;;  %v522_v27 = vadd.f32 %v3537_v53, %v508_v5  ;;  %v4713_v12 = vpop.permute.xlu1 %743 }
 0x166   : > { %3782 = vmatprep.subr.mxu0 %v524_v3  ;;  %v523_v19 = vadd.f32 %v3537_v53, %v509_v4  ;;  %v493_v7 = vmul.f32 %v3945_v6, %v4423_v28  ;;  %v528_v28 = vld [vmem:[%s6746_s3 + $0x8] sm:$0xff] }
 0x167   : > { %3783 = vmatpush3.msra.mxu0 %v524_v3  ;;  %v506_v10 = vmul.f32 %v3536_v50, %v492_v13 }
 0x168   : > { %v3947_v8 = vpop.eup %3946  ;;  %3784 = vmatprep.subr.mxu0 %v523_v19  ;;  %v507_v9 = vmul.f32 %v3536_v50, %v493_v7 }
 0x169   : > { %3785 = vmatpush3.msra.mxu0 %v523_v19  ;;  %v491_v20 = vmul.f32 %v3947_v8, %v4431_v36  ;;  %v520_v15 = vadd.f32 %v3537_v53, %v506_v10  ;;  %v530_v36 = vld [vmem:[%s6746_s3 + $0x18] sm:$0xff]  ;;  %v4717_v4 = vpop.permute.xlu1 %663 }
 0x16a   : > { %3786 = vmatprep.subr.mxu0 %v522_v27  ;;  %v521_v11 = vadd.f32 %v3537_v53, %v507_v9 }
 0x16b   : > { %3787 = vmatpush3.msra.mxu0 %v522_v27  ;;  %v505_v14 = vmul.f32 %v3536_v50, %v491_v20  ;;  %v558_v50 = vld [vmem:[%s6746_s3 + $0xf8] sm:$0xff] }
 0x16c   : > { %3788 = vmatprep.subr.mxu0 %v521_v11 }
 0x16d   : > { %3789 = vmatpush3.msra.mxu0 %v521_v11  ;;  %v519_v35 = vadd.f32 %v3537_v53, %v505_v14  ;;  %v4705_v53 = vpop.permute.xlu0 %643 }
 0x16e   : > { %3790 = vmatprep.subr.mxu0 %v520_v15 }
 0x16f   : > { %3791 = vmatpush3.msra.mxu0 %v520_v15  ;;  %v4741_v15 = vpop.permute.xlu1 %738 }
 0x170   : > { %3792 = vmatprep.subr.mxu0 %v519_v35 }
 0x171   : > { %3793 = vmatpush3.msra.mxu0 %v519_v35  ;;  %v4707_v54 = vpop.permute.xlu0 %638 }
 0x172   : > { %3795 = vmatmul.mubr.msk.f32.vlgmr.msra.gmra.mxu0 %vm751_vm0, %v528_v28 }
 0x173   : > { %3797 = vmatprep.mubr.msk.f32.mxu0 %vm751_vm0, %v529_v16 }
 0x175   : > { %v4709_v55 = vpop.permute.xlu0 %633 }
 0x176   : > { %3798 = vmatmul.mubr.msk.f32.gmra.mxu0 %vm751_vm0, %v530_v36 }
 0x177   : > { %3800 = vmatprep.mubr.msk.f32.mxu0 %vm751_vm0, %v531_v17 }
 0x179   : > { %v629_v56 = vpop.permute.xlu0 %628 }
 0x17a   : > { %3801 = vmatmul.mubr.msk.f32.gmra.mxu0 %vm751_vm0, %v532_v18 }
 0x17b   : > { %3803 = vmatprep.mubr.msk.f32.mxu0 %vm751_vm0, %v533_v21 }
 0x17d   : > { %v624_v57 = vpop.permute.xlu0 %623 }
 0x17e   : > { %3804 = vmatmul.mubr.msk.f32.gmra.mxu0 %vm751_vm0, %v534_v22 }
 0x17f   : > { %3806 = vmatprep.mubr.msk.f32.mxu0 %vm751_vm0, %v535_v23 }
 0x181   : > { %v619_v58 = vpop.permute.xlu0 %618 }
 0x182   : > { %3807 = vmatmul.mubr.msk.f32.gmra.mxu0 %vm751_vm0, %v536_v24 }
 0x183   : > { %3809 = vmatprep.mubr.msk.f32.mxu0 %vm751_vm0, %v537_v25 }
 0x185   : > { %v614_v59 = vpop.permute.xlu0 %613 }
 0x186   : > { %3810 = vmatmul.mubr.msk.f32.gmra.mxu0 %vm751_vm0, %v538_v26 }
 0x187   : > { %3812 = vmatprep.mubr.msk.f32.mxu0 %vm751_vm0, %v539_v29 }
 0x189   : > { %v609_v60 = vpop.permute.xlu0 %608 }
 0x18a   : > { %3813 = vmatmul.mubr.msk.f32.gmra.mxu0 %vm751_vm0, %v540_v30 }
 0x18b   : > { %3815 = vmatprep.mubr.msk.f32.mxu0 %vm751_vm0, %v541_v31 }
 0x18d   : > { %v604_v61 = vpop.permute.xlu0 %603 }
 0x18e   : > { %3816 = vmatmul.mubr.msk.f32.gmra.mxu0 %vm751_vm0, %v542_v32  ;;  %v4762_v32 = vpop.permute.xlu1 %658 }
 0x18f   : > { %3818 = vmatprep.mubr.msk.f32.mxu0 %vm751_vm0, %v543_v33 }
 0x191   : > { %v599_v63 = vpop.permute.xlu0 %598 }
 0x192   : > { %3819 = vmatmul.mubr.msk.f32.gmra.mxu0 %vm751_vm0, %v544_v34 }
 0x193   : > { %3821 = vmatprep.mubr.msk.f32.mxu0 %vm751_vm0, %v545_v37 }
 0x195   : > { %v594_v1 = vpop.permute.xlu0 %593 }
 0x196   : > { %3822 = vmatmul.mubr.msk.f32.gmra.mxu0 %vm751_vm0, %v546_v38 }
 0x197   : > { %3824 = vmatprep.mubr.msk.f32.mxu0 %vm751_vm0, %v547_v39 }
 0x19a   : > { %3825 = vmatmul.mubr.msk.f32.gmra.mxu0 %vm751_vm0, %v548_v40 }
 0x19b   : > { %3827 = vmatprep.mubr.msk.f32.mxu0 %vm751_vm0, %v549_v41 }
 0x19e   : > { %3828 = vmatmul.mubr.msk.f32.gmra.mxu0 %vm751_vm0, %v550_v42 }
 0x19f   : > { %3830 = vmatprep.mubr.msk.f32.mxu0 %vm751_vm0, %v551_v43 }
 0x1a2   : > { %3831 = vmatmul.mubr.msk.f32.gmra.mxu0 %vm751_vm0, %v552_v44 }
 0x1a3   : > { %3833 = vmatprep.mubr.msk.f32.mxu0 %vm751_vm0, %v553_v45 }
 0x1a6   : > { %3834 = vmatmul.mubr.msk.f32.gmra.mxu0 %vm751_vm0, %v554_v46 }
 0x1a7   : > { %3836 = vmatprep.mubr.msk.f32.mxu0 %vm751_vm0, %v555_v47 }
 0x1aa   : > { %3837 = vmatmul.mubr.msk.f32.gmra.mxu0 %vm751_vm0, %v556_v48 }
 0x1ab   : > { %3839 = vmatprep.mubr.msk.f32.mxu0 %vm751_vm0, %v557_v49  ;;  %v4788_v49 = vpop.permute.xlu1 %733 }
 0x1ae   : > { %3840 = vmatmul.mubr.msk.f32.gmra.mxu0 %vm751_vm0, %v558_v50 }
 0x232   : > { %v3796_v0 = vpop.f32.mrf.mxu0 }
 0x233   : > { %v4715_v2 = vadd.f32 %v3796_v0, %v599_v63 }
 0x234   : > { %v914_v3 = vpop.f32.mrf.mxu0 }
 0x235   : > { %v4720_v5 = vmul.f32 0.70710677, %v4715_v2  ;;  %v4722_v6 = vadd.f32 %v914_v3, %v594_v1 }
 0x236   : > { %v3799_v13 = vpop.f32.mrf.mxu0 }
 0x237   : > { %6827 = vst [vmem:[#allocation9_spill] sm:$0xff] %v4720_v5  ;;  %6828 = vst [vmem:[#allocation10_spill] sm:$0xff] %v4722_v6  ;;  %v4725_v19 = vand.u32 2147483647, %v4720_v5  ;;  %v4728_v7 = vmul.f32 0.70710677, %v4722_v6  ;;  %v4730_v8 = vadd.f32 %v3799_v13, %v609_v60 }
 0x238   : > { %v924_v27 = vpop.f32.mrf.mxu0 }
 0x239   : > { %6829 = vst [vmem:[#allocation11_spill] sm:$0xff] %v4728_v7  ;;  %v1170_v9 = vmul.f32 0.5, %v4725_v19  ;;  %v4734_v10 = vand.u32 2147483647, %v4728_v7  ;;  %v4737_v20 = vmul.f32 0.70710677, %v4730_v8  ;;  %v4739_v11 = vadd.f32 %v924_v27, %v604_v61 }
 0x23a   : > { %v3802_v14 = vpop.f32.mrf.mxu0  ;;  %v1874_v27 = vsub.f32 0.0, %v4725_v19 }
 0x23b   : > { %6830 = vst [vmem:[#allocation12_spill] sm:$0xff] %v4737_v20  ;;  %v1202_v35 = vadd.f32 1.0, %v1170_v9  ;;  %v1169_v28 = vmul.f32 0.5, %v4734_v10  ;;  %v4745_v16 = vand.u32 2147483647, %v4737_v20  ;;  %v4750_v21 = vadd.f32 %v3802_v14, %v619_v58  ;;  %v4816_v14 = vpop.permute.xlu1 %653 }
 0x23c   : > { %v4748_v36 = vmul.f32 0.70710677, %v4739_v11  ;;  %v934_v17 = vpop.f32.mrf.mxu0 }
 0x23d   : > { %3948 = vrcp.f32 %v1202_v35  ;;  %v1201_v18 = vadd.f32 1.0, %v1169_v28  ;;  %v1172_v22 = vmul.f32 0.5, %v4745_v16  ;;  %v4757_v25 = vmul.f32 0.70710677, %v4750_v21 }
 0x23e   : > { %6831 = vst [vmem:[#allocation13_spill] sm:$0xff] %v4748_v36  ;;  %v4754_v23 = vand.u32 2147483647, %v4748_v36  ;;  %v3805_v24 = vpop.f32.mrf.mxu0  ;;  %v4759_v26 = vadd.f32 %v934_v17, %v614_v59  ;;  %v1873_v17 = vsub.f32 0.0, %v4734_v10 }
 0x23f   : > { %3950 = vrcp.f32 %v1201_v18  ;;  %6832 = vst [vmem:[#allocation14_spill] sm:$0xff] %v4757_v25  ;;  %v1204_v29 = vadd.f32 1.0, %v1172_v22  ;;  %v4765_v33 = vand.u32 2147483647, %v4757_v25  ;;  %v4770_v38 = vadd.f32 %v3805_v24, %v629_v56 }
 0x240   : > { %v1171_v30 = vmul.f32 0.5, %v4754_v23  ;;  %v944_v31 = vpop.f32.mrf.mxu0  ;;  %v4768_v34 = vmul.f32 0.70710677, %v4759_v26 }
 0x241   : > { %3952 = vrcp.f32 %v1204_v29  ;;  %v1174_v40 = vmul.f32 0.5, %v4765_v33  ;;  %v4777_v42 = vmul.f32 0.70710677, %v4770_v38  ;;  %v4779_v43 = vadd.f32 %v944_v31, %v624_v57 }
 0x242   : > { %6833 = vst [vmem:[#allocation15_spill] sm:$0xff] %v4768_v34  ;;  %v1203_v37 = vadd.f32 1.0, %v1171_v30  ;;  %v3808_v39 = vpop.f32.mrf.mxu0  ;;  %v4774_v41 = vand.u32 2147483647, %v4768_v34  ;;  %v4830_v30 = vmul.f32 0.5, %v4715_v2  ;;  %v4845_v2 = vmul.f32 0.5, %v4739_v11 }
 0x243   : > { %6834 = vst [vmem:[#allocation16_spill] sm:$0xff] %v4777_v42  ;;  %v1206_v44 = vadd.f32 1.0, %v1174_v40  ;;  %v4783_v46 = vand.u32 2147483647, %v4777_v42  ;;  %v4786_v47 = vmul.f32 0.70710677, %v4779_v43  ;;  %v4791_v56 = vadd.f32 %v3808_v39, %v4707_v54 }
 0x244   : > { %3954 = vrcp.f32 %v1203_v37  ;;  %v1173_v45 = vmul.f32 0.5, %v4774_v41  ;;  %v954_v48 = vpop.f32.mrf.mxu0  ;;  %6841 = vst [vmem:[#allocation23_spill] sm:$0xff] %v4830_v30  ;;  %v4834_v39 = vmul.f32 %v1874_v27, %v4725_v19  ;;  %v4837_v40 = vmul.f32 0.5, %v4730_v8  ;;  %6844 = vst [vmem:[#allocation26_spill] sm:$0xff] %v4845_v2 }
 0x245   : > { %6835 = vst [vmem:[#allocation17_spill] sm:$0xff] %v4786_v47  ;;  %3956 = vrcp.f32 %v1206_v44  ;;  %v1176_v57 = vmul.f32 0.5, %v4783_v46  ;;  %v4795_v58 = vand.u32 2147483647, %v4786_v47  ;;  %v4798_v59 = vmul.f32 0.70710677, %v4791_v56 }
 0x246   : > { %v1205_v50 = vadd.f32 1.0, %v1173_v45  ;;  %v4801_v60 = vadd.f32 %v954_v48, %v4709_v55  ;;  %v3811_v3 = vpop.f32.mrf.mxu0  ;;  %6842 = vst [vmem:[#allocation24_spill] sm:$0xff] %v4837_v40  ;;  %v4851_v19 = vmul.f32 %v1873_v17, %v4734_v10  ;;  %v4865_v17 = vmul.f32 0.5, %v4750_v21 }
 0x247   : > { %6836 = vst [vmem:[#allocation18_spill] sm:$0xff] %v4798_v59  ;;  %v1208_v63 = vadd.f32 1.0, %v1176_v57  ;;  %v1175_v0 = vmul.f32 0.5, %v4795_v58  ;;  %v4808_v1 = vand.u32 2147483647, %v4798_v59  ;;  %v4825_v24 = vadd.f32 %v3811_v3, %v4703_v52 }
 0x248   : > { %3958 = vrcp.f32 %v1205_v50  ;;  %v4814_v55 = vmul.f32 0.70710677, %v4801_v60  ;;  %6846 = vst [vmem:[#allocation28_spill] sm:$0xff] %v4865_v17 }
 0x249   : > { %3960 = vrcp.f32 %v1208_v63  ;;  %v1207_v9 = vadd.f32 1.0, %v1175_v0  ;;  %v1178_v18 = vmul.f32 0.5, %v4808_v1  ;;  %v4848_v57 = vmul.f32 0.70710677, %v4825_v24 }
 0x24a   : > { %v4803_v61 = vpop.eup %3948  ;;  %6839 = vst [vmem:[#allocation21_spill] sm:$0xff] %v4814_v55  ;;  %v4822_v22 = vand.u32 2147483647, %v4814_v55 }
 0x24b   : > { %6837 = vst [vmem:[#allocation19_spill] sm:$0xff] %v4803_v61  ;;  %v1298_v54 = vmul.f32 0.17087276, %v4803_v61  ;;  %3962 = vrcp.f32 %v1207_v9  ;;  %v1210_v0 = vadd.f32 1.0, %v1178_v18  ;;  %v4859_v11 = vand.u32 2147483647, %v4848_v57 }
 0x24c   : > { %v4810_v13 = vpop.eup %3950  ;;  %v1177_v45 = vmul.f32 0.5, %v4822_v22  ;;  %vm2076_vm5 = vcmp.ge.f32.partialorder %v4848_v57, 0.0 }
 0x24d   : > { %6838 = vst [vmem:[#allocation20_spill] sm:$0xff] %v4810_v13  ;;  %v1330_v35 = vadd.f32 -0.82215226, %v1298_v54  ;;  %v1297_v28 = vmul.f32 0.17087276, %v4810_v13  ;;  %v4854_v54 = vpop.permute.xlu1 %728  ;;  %3964 = vrcp.f32 %v1210_v0 }
 0x24e   : > { %v4827_v29 = vpop.eup %3952 }
 0x24f   : > { %6840 = vst [vmem:[#allocation22_spill] sm:$0xff] %v4827_v29  ;;  %v1362_v31 = vmul.f32 %v4803_v61, %v1330_v35  ;;  %v1329_v37 = vadd.f32 -0.82215226, %v1297_v28  ;;  %v1300_v44 = vmul.f32 0.17087276, %v4827_v29 }
 0x251   : > { %v4841_v52 = vpop.eup %3954  ;;  %v1394_v48 = vadd.f32 1.4885159, %v1362_v31  ;;  %v1361_v50 = vmul.f32 %v4810_v13, %v1329_v37  ;;  %v1332_v8 = vadd.f32 -0.82215226, %v1300_v44  ;;  %v1209_v31 = vadd.f32 1.0, %v1177_v45  ;;  %v4879_v40 = vpop.permute.xlu1 %723 }
 0x252   : > { %6843 = vst [vmem:[#allocation25_spill] sm:$0xff] %v4841_v52  ;;  %v1299_v63 = vmul.f32 0.17087276, %v4841_v52  ;;  %v4861_v35 = vpop.eup %3956 }
 0x253   : > { %v1426_v3 = vmul.f32 %v4803_v61, %v1394_v48  ;;  %v1393_v27 = vadd.f32 1.4885159, %v1361_v50  ;;  %6845 = vst [vmem:[#allocation27_spill] sm:$0xff] %v4861_v35  ;;  %v1364_v28 = vmul.f32 %v4827_v29, %v1332_v8  ;;  %v1302_v44 = vmul.f32 0.17087276, %v4861_v35 }
 0x254   : > { %v1331_v10 = vadd.f32 -0.82215226, %v1299_v63  ;;  %v1180_v48 = vmul.f32 0.5, %v4859_v11  ;;  %3966 = vrcp.f32 %v1209_v31 }
 0x255   : > { %v1458_v18 = vadd.f32 -1.135204, %v1426_v3  ;;  %v1425_v37 = vmul.f32 %v4810_v13, %v1393_v27  ;;  %v4870_v50 = vpop.eup %3958  ;;  %v1396_v9 = vadd.f32 1.4885159, %v1364_v28  ;;  %v1334_v63 = vadd.f32 -0.82215226, %v1302_v44 }
 0x256   : > { %6847 = vst [vmem:[#allocation29_spill] sm:$0xff] %v4870_v50  ;;  %v1363_v6 = vmul.f32 %v4841_v52, %v1331_v10  ;;  %v1301_v45 = vmul.f32 0.17087276, %v4870_v50  ;;  %v1212_v7 = vadd.f32 1.0, %v1180_v48  ;;  %v4877_v2 = vpop.eup %3960 }
 0x257   : > { %v1490_v8 = vmul.f32 %v4803_v61, %v1458_v18  ;;  %v1457_v21 = vadd.f32 -1.135204, %v1425_v37  ;;  %v1428_v3 = vmul.f32 %v4827_v29, %v1396_v9  ;;  %6848 = vst [vmem:[#allocation30_spill] sm:$0xff] %v4877_v2  ;;  %v1366_v0 = vmul.f32 %v4861_v35, %v1334_v63 }
 0x258   : > { %v1395_v27 = vadd.f32 1.4885159, %v1363_v6  ;;  %v1333_v30 = vadd.f32 -0.82215226, %v1301_v45  ;;  %v1304_v44 = vmul.f32 0.17087276, %v4877_v2  ;;  %3968 = vrcp.f32 %v1212_v7  ;;  %v4885_v9 = vpop.eup %3962 }
 0x259   : > { %v1522_v28 = vadd.f32 0.27886808, %v1490_v8  ;;  %v1489_v10 = vmul.f32 %v4810_v13, %v1457_v21  ;;  %v1460_v18 = vadd.f32 -1.135204, %v1428_v3  ;;  %6849 = vst [vmem:[#allocation31_spill] sm:$0xff] %v4885_v9 }
 0x25a   : > { %v1427_v37 = vmul.f32 %v4841_v52, %v1395_v27  ;;  %v1398_v48 = vadd.f32 1.4885159, %v1366_v0  ;;  %v1365_v5 = vmul.f32 %v4870_v50, %v1333_v30  ;;  %v1336_v17 = vadd.f32 -0.82215226, %v1304_v44  ;;  %v4895_v0 = vpop.permute.xlu1 %718 }
 0x25b   : > { %v1554_v6 = vmul.f32 %v4803_v61, %v1522_v28  ;;  %v1521_v31 = vadd.f32 0.27886808, %v1489_v10  ;;  %v1492_v8 = vmul.f32 %v4827_v29, %v1460_v18  ;;  %v1303_v63 = vmul.f32 0.17087276, %v4885_v9 }
 0x25c   : > { %v1459_v21 = vadd.f32 -1.135204, %v1427_v37  ;;  %v1430_v27 = vmul.f32 %v4861_v35, %v1398_v48  ;;  %v1397_v7 = vadd.f32 1.4885159, %v1365_v5  ;;  %v1368_v28 = vmul.f32 %v4877_v2, %v1336_v17 }
 0x25d   : > { %v1586_v45 = vadd.f32 -0.18628806, %v1554_v6  ;;  %v1553_v3 = vmul.f32 %v4810_v13, %v1521_v31  ;;  %v1524_v36 = vadd.f32 0.27886808, %v1492_v8  ;;  %v1335_v10 = vadd.f32 -0.82215226, %v1303_v63 }
 0x25e   : > { %v1491_v20 = vmul.f32 %v4841_v52, %v1459_v21  ;;  %v1462_v37 = vadd.f32 -1.135204, %v1430_v27  ;;  %v1429_v44 = vmul.f32 %v4870_v50, %v1397_v7  ;;  %v1400_v34 = vadd.f32 1.4885159, %v1368_v28  ;;  %v4905_v27 = vpop.eup %3964 }
 0x25f   : > { %v1618_v30 = vmul.f32 %v4803_v61, %v1586_v45  ;;  %v1585_v18 = vadd.f32 -0.18628806, %v1553_v3  ;;  %v1556_v6 = vmul.f32 %v4827_v29, %v1524_v36  ;;  %v1367_v5 = vmul.f32 %v4885_v9, %v1335_v10  ;;  %6850 = vst [vmem:[#allocation32_spill] sm:$0xff] %v4905_v27 }
 0x260   : > { %v1523_v31 = vadd.f32 0.27886808, %v1491_v20  ;;  %v1494_v17 = vmul.f32 %v4861_v35, %v1462_v37  ;;  %v1461_v21 = vadd.f32 -1.135204, %v1429_v44  ;;  %v1432_v45 = vmul.f32 %v4877_v2, %v1400_v34 }
 0x261   : > { %v1650_v48 = vadd.f32 0.09678418, %v1618_v30  ;;  %v1617_v8 = vmul.f32 %v4810_v13, %v1585_v18  ;;  %v1588_v63 = vadd.f32 -0.18628806, %v1556_v6  ;;  %v1399_v3 = vadd.f32 1.4885159, %v1367_v5  ;;  %v4911_v44 = vpop.eup %3966  ;;  %v4913_v6 = vpop.permute.xlu1 %713 }
 0x262   : > { %v1555_v25 = vmul.f32 %v4841_v52, %v1523_v31  ;;  %v1526_v7 = vadd.f32 0.27886808, %v1494_v17  ;;  %v1493_v28 = vmul.f32 %v4870_v50, %v1461_v21  ;;  %v1464_v18 = vadd.f32 -1.135204, %v1432_v45  ;;  %6851 = vst [vmem:[#allocation33_spill] sm:$0xff] %v4911_v44 }
 0x263   : > { %v1682_v36 = vmul.f32 %v4803_v61, %v1650_v48  ;;  %v1649_v20 = vadd.f32 0.09678418, %v1617_v8  ;;  %v1620_v10 = vmul.f32 %v4827_v29, %v1588_v63  ;;  %v1431_v37 = vmul.f32 %v4885_v9, %v1399_v3 }
 0x264   : > { %v1587_v30 = vadd.f32 -0.18628806, %v1555_v25  ;;  %v1558_v5 = vmul.f32 %v4861_v35, %v1526_v7  ;;  %v1525_v48 = vadd.f32 0.27886808, %v1493_v28  ;;  %v1496_v21 = vmul.f32 %v4877_v2, %v1464_v18 }
 0x265   : > { %v1714_v34 = vadd.f32 0.37409195, %v1682_v36  ;;  %v1681_v31 = vmul.f32 %v4810_v13, %v1649_v20  ;;  %v1652_v8 = vadd.f32 0.09678418, %v1620_v10  ;;  %v1463_v63 = vadd.f32 -1.135204, %v1431_v37  ;;  %v4919_v25 = vpop.eup %3968 }
 0x266   : > { %v1619_v17 = vmul.f32 %v4841_v52, %v1587_v30  ;;  %v1590_v47 = vadd.f32 -0.18628806, %v1558_v5  ;;  %v1557_v42 = vmul.f32 %v4870_v50, %v1525_v48  ;;  %v1528_v55 = vadd.f32 0.27886808, %v1496_v21  ;;  %v4929_v5 = vpop.permute.xlu1 %708 }
 0x267   : > { %v1746_v45 = vmul.f32 %v4803_v61, %v1714_v34  ;;  %v1713_v3 = vadd.f32 0.37409195, %v1681_v31  ;;  %v1684_v36 = vmul.f32 %v4827_v29, %v1652_v8  ;;  %v1495_v7 = vmul.f32 %v4885_v9, %v1463_v63 }
 0x268   : > { %v1651_v20 = vadd.f32 0.09678418, %v1619_v17  ;;  %v1622_v30 = vmul.f32 %v4861_v35, %v1590_v47  ;;  %v1589_v18 = vadd.f32 -0.18628806, %v1557_v42  ;;  %v1560_v34 = vmul.f32 %v4877_v2, %v1528_v55 }
 0x269   : > { %v1778_v28 = vadd.f32 1.0000237, %v1746_v45  ;;  %v1745_v10 = vmul.f32 %v4810_v13, %v1713_v3  ;;  %v1716_v37 = vadd.f32 0.37409195, %v1684_v36  ;;  %v1527_v31 = vadd.f32 0.27886808, %v1495_v7 }
 0x26a   : > { %v1683_v59 = vmul.f32 %v4841_v52, %v1651_v20  ;;  %v6852_v8 = vsub.f32 0.0, %v4745_v16  ;;  %v1654_v21 = vadd.f32 0.09678418, %v1622_v30  ;;  %v1621_v63 = vmul.f32 %v4870_v50, %v1589_v18 }
 0x26b   : > { %v1777_v48 = vadd.f32 1.0000237, %v1745_v10  ;;  %v6853_v42 = vsub.f32 0.0, %v4754_v23  ;;  %v4943_v45 = vmul.f32 0.5, %v4759_v26  ;;  %v1592_v55 = vadd.f32 -0.18628806, %v1560_v34 }
 0x26c   : > { %v4934_v17 = vmul.f32 %v6852_v8, %v4745_v16  ;;  %v1559_v3 = vmul.f32 %v4885_v9, %v1527_v31  ;;  %v1810_v36 = vmul.f32 %v4803_v61, %v1778_v28  ;;  %v1748_v20 = vmul.f32 %v4827_v29, %v1716_v37 }
 0x26d   : > { %v4940_v47 = vmul.f32 %v6853_v42, %v4754_v23  ;;  %6854 = vst [vmem:[#allocation34_spill] sm:$0xff] %v4943_v45  ;;  %v1878_v16 = vsub.f32 0.0, %v4765_v33  ;;  %v1653_v7 = vadd.f32 0.09678418, %v1621_v63  ;;  %v1809_v10 = vmul.f32 %v4810_v13, %v1777_v48 }
 0x26e   : > { %v1715_v30 = vadd.f32 0.37409195, %v1683_v59  ;;  %v1624_v18 = vmul.f32 %v4877_v2, %v1592_v55  ;;  %v1591_v23 = vadd.f32 -0.18628806, %v1559_v3  ;;  %v1686_v8 = vmul.f32 %v4861_v35, %v1654_v21  ;;  %v4960_v59 = vpop.permute.xlu1 %703 }
 0x26f   : > { %v1685_v26 = vmul.f32 %v4870_v50, %v1653_v7  ;;  %v1877_v34 = vsub.f32 0.0, %v4774_v41  ;;  %v4955_v31 = vmul.f32 0.5, %v4770_v38  ;;  %v1880_v37 = vsub.f32 0.0, %v4783_v46 }
 0x270   : > { %v1656_v28 = vadd.f32 0.09678418, %v1624_v18  ;;  %v1623_v63 = vmul.f32 %v4885_v9, %v1591_v23  ;;  %v1879_v48 = vsub.f32 0.0, %v4795_v58  ;;  %v1842_v42 = vadd.f32 -1.2655122, %v1810_v36 }
 0x271   : > { %6855 = vst [vmem:[#allocation35_spill] sm:$0xff] %v4955_v31  ;;  %v1780_v55 = vadd.f32 1.0000237, %v1748_v20  ;;  %v4963_v21 = vmul.f32 %v1878_v16, %v4765_v33  ;;  %v1882_v3 = vsub.f32 0.0, %v4808_v1  ;;  %v1841_v7 = vadd.f32 -1.2655122, %v1809_v10 }
 0x272   : > { %v1747_v38 = vmul.f32 %v4841_v52, %v1715_v30  ;;  %v1688_v18 = vmul.f32 %v4877_v2, %v1656_v28  ;;  %v4969_v13 = vmul.f32 0.5, %v4779_v43  ;;  %v1718_v23 = vadd.f32 0.37409195, %v1686_v8  ;;  %v4994_v28 = vpop.permute.xlu1 %698 }
 0x273   : > { %v1717_v61 = vadd.f32 0.37409195, %v1685_v26  ;;  %v4972_v45 = vmul.f32 %v1877_v34, %v4774_v41  ;;  %v4975_v36 = vmul.f32 0.5, %v4791_v56  ;;  %v4978_v33 = vmul.f32 %v1880_v37, %v4783_v46  ;;  %v964_v56 = vpop.f32.mrf.mxu0 }
 0x274   : > { %6856 = vst [vmem:[#allocation36_spill] sm:$0xff] %v4969_v13  ;;  %v1655_v20 = vadd.f32 0.09678418, %v1623_v63  ;;  %v4981_v16 = vmul.f32 %v1879_v48, %v4795_v58  ;;  %v4984_v10 = vmul.f32 0.5, %v4801_v60  ;;  %v1938_v43 = vadd.f32 %v4834_v39, %v1842_v42 }
 0x275   : > { %6857 = vst [vmem:[#allocation37_spill] sm:$0xff] %v4975_v36  ;;  %v1812_v30 = vmul.f32 %v4827_v29, %v1780_v55  ;;  %v1306_v41 = vmul.f32 0.17087276, %v4905_v27  ;;  %v4990_v8 = vmul.f32 %v1882_v3, %v4808_v1  ;;  %v1937_v46 = vadd.f32 %v4851_v19, %v1841_v7 }
 0x276   : > { %6858 = vst [vmem:[#allocation38_spill] sm:$0xff] %v4984_v10  ;;  %v1779_v26 = vadd.f32 1.0000237, %v1747_v38  ;;  %v1720_v34 = vadd.f32 0.37409195, %v1688_v18  ;;  %v1881_v58 = vsub.f32 0.0, %v4822_v22  ;;  %v1750_v60 = vmul.f32 %v4861_v35, %v1718_v23 }
 0x277   : > { %v1749_v39 = vmul.f32 %v4870_v50, %v1717_v61  ;;  %v1338_v37 = vadd.f32 -0.82215226, %v1306_v41  ;;  %v1305_v63 = vmul.f32 0.17087276, %v4911_v44  ;;  %v1687_v48 = vmul.f32 %v4885_v9, %v1655_v20  ;;  %v3814_v41 = vpop.f32.mrf.mxu0 }
 0x278   : > { %v5001_v1 = vmul.f32 0.5, %v4825_v24  ;;  %v5005_v42 = vadd.f32 %v964_v56, %v4705_v53  ;;  %v1971_v55 = vmul.f32 1.442695, %v1938_v43  ;;  %v1844_v3 = vadd.f32 -1.2655122, %v1812_v30 }
 0x279   : > { %v1370_v7 = vmul.f32 %v4905_v27, %v1338_v37  ;;  %v1337_v38 = vadd.f32 -0.82215226, %v1305_v63  ;;  %v1969_v18 = vmul.f32 1.442695, %v1937_v46  ;;  %v1811_v61 = vmul.f32 %v4841_v52, %v1779_v26  ;;  %v5018_v46 = vpop.permute.xlu1 %693 }
 0x27a   : > { %6859 = vst [vmem:[#allocation39_spill] sm:$0xff] %v5001_v1  ;;  %v1752_v23 = vmul.f32 %v4877_v2, %v1720_v34  ;;  %v1308_v20 = vmul.f32 0.17087276, %v4919_v25  ;;  %v1782_v24 = vadd.f32 1.0000237, %v1750_v60  ;;  %v5013_v43 = vmul.f32 %v1881_v58, %v4822_v22  ;;  %v974_v22 = vpop.f32.mrf.mxu0 }
 0x27b   : > { %v1781_v29 = vadd.f32 1.0000237, %v1749_v39  ;;  %v1402_v13 = vadd.f32 1.4885159, %v1370_v7  ;;  %v1369_v19 = vmul.f32 %v4911_v44, %v1337_v38  ;;  %v1719_v53 = vadd.f32 0.37409195, %v1687_v48 }
 0x27c   : > { %v1340_v30 = vadd.f32 -0.82215226, %v1308_v20  ;;  %v5016_v56 = vmul.f32 0.70710677, %v5005_v42  ;;  %3970 = vpow2.f32 %v1971_v55  ;;  %v1940_v26 = vadd.f32 %v4934_v17, %v1844_v3 }
 0x27d   : > { %v1434_v34 = vmul.f32 %v4905_v27, %v1402_v13  ;;  %v1401_v60 = vadd.f32 1.4885159, %v1369_v19  ;;  %v1843_v39 = vadd.f32 -1.2655122, %v1811_v61  ;;  %v1784_v37 = vadd.f32 1.0000237, %v1752_v23 }
 0x27e   : > { %v1372_v63 = vmul.f32 %v4919_v25, %v1340_v30  ;;  %v5024_v48 = vand.u32 2147483647, %v5016_v56  ;;  %v1814_v58 = vmul.f32 %v4861_v35, %v1782_v24  ;;  %v1813_v7 = vmul.f32 %v4870_v50, %v1781_v29 }
 0x27f   : > { %v1466_v38 = vadd.f32 -1.135204, %v1434_v34  ;;  %v1433_v55 = vmul.f32 %v4911_v44, %v1401_v60  ;;  %3972 = vpow2.f32 %v1969_v18  ;;  %v1751_v17 = vmul.f32 %v4885_v9, %v1719_v53  ;;  %v3817_v18 = vpop.f32.mrf.mxu0  ;;  %v5038_v60 = vpop.permute.xlu1 %688 }
 0x280   : > { %v1404_v13 = vadd.f32 1.4885159, %v1372_v63  ;;  %v1179_v19 = vmul.f32 0.5, %v5024_v48  ;;  %v1975_v3 = vmul.f32 1.442695, %v1940_v26  ;;  %v5033_v20 = vadd.f32 %v3814_v41, %v4762_v32 }
 0x281   : > { %v1498_v61 = vmul.f32 %v4905_v27, %v1466_v38  ;;  %v1465_v23 = vadd.f32 -1.135204, %v1433_v55  ;;  %v1939_v24 = vadd.f32 %v4940_v47, %v1843_v39  ;;  %v1816_v29 = vmul.f32 %v4877_v2, %v1784_v37 }
 0x282   : > { %v1436_v30 = vmul.f32 %v4919_v25, %v1404_v13  ;;  %v1211_v34 = vadd.f32 1.0, %v1179_v19  ;;  %v1846_v53 = vadd.f32 -1.2655122, %v1814_v58  ;;  %v1845_v63 = vadd.f32 -1.2655122, %v1813_v7 }
 0x283   : > { %v1530_v52 = vadd.f32 0.27886808, %v1498_v61  ;;  %v1497_v26 = vmul.f32 %v4911_v44, %v1465_v23  ;;  %v1783_v38 = vadd.f32 1.0000237, %v1751_v17  ;;  %v5042_v32 = vmul.f32 0.70710677, %v5033_v20  ;;  %v5065_v23 = vpop.permute.xlu1 %683 }
 0x284   : > { %v1468_v55 = vadd.f32 -1.135204, %v1436_v30  ;;  %v5045_v47 = vadd.f32 %v974_v22, %v4816_v14  ;;  %3974 = vrcp.f32 %v1211_v34  ;;  %v5049_v37 = vadd.f32 %v3817_v18, %v4711_v62  ;;  %v984_v18 = vpop.f32.mrf.mxu0 }
 0x285   : > { %v1562_v41 = vmul.f32 %v4905_v27, %v1530_v52  ;;  %v1529_v39 = vadd.f32 0.27886808, %v1497_v26  ;;  %3976 = vpow2.f32 %v1975_v3  ;;  %v1848_v58 = vadd.f32 -1.2655122, %v1816_v29 }
 0x286   : > { %v1500_v7 = vmul.f32 %v4919_v25, %v1468_v55  ;;  %v5053_v17 = vand.u32 2147483647, %v5042_v32  ;;  %v1942_v13 = vadd.f32 %v4963_v21, %v1846_v53  ;;  %v5058_v22 = vmul.f32 0.70710677, %v5045_v47  ;;  %v3820_v35 = vpop.f32.mrf.mxu0 }
 0x287   : > { %v1594_v19 = vadd.f32 -0.18628806, %v1562_v41  ;;  %v1561_v14 = vmul.f32 %v4911_v44, %v1529_v39  ;;  %v1815_v52 = vmul.f32 %v4885_v9, %v1783_v38  ;;  %v5063_v3 = vmul.f32 0.70710677, %v5049_v37  ;;  %v679_v9 = vpop.permute.xlu1 %678 }
 0x288   : > { %v1532_v61 = vadd.f32 0.27886808, %v1500_v7  ;;  %v1182_v62 = vmul.f32 0.5, %v5053_v17  ;;  %v1941_v29 = vadd.f32 %v4972_v45, %v1845_v63  ;;  %v5070_v34 = vand.u32 2147483647, %v5058_v22 }
 0x289   : > { %v1626_v21 = vmul.f32 %v4905_v27, %v1594_v19  ;;  %v1593_v30 = vadd.f32 -0.18628806, %v1561_v14  ;;  %v5072_v53 = vpop.eup %3970  ;;  %v1944_v26 = vadd.f32 %v4978_v33, %v1848_v58  ;;  %v5077_v41 = vand.u32 2147483647, %v5063_v3 }
 0x28a   : > { %6860 = vst [vmem:[#allocation40_spill] sm:$0xff] %v5072_v53  ;;  %v1564_v38 = vmul.f32 %v4919_v25, %v1532_v61  ;;  %v1214_v55 = vadd.f32 1.0, %v1182_v62  ;;  %v1973_v39 = vmul.f32 1.442695, %v1939_v24  ;;  %v1181_v63 = vmul.f32 0.5, %v5070_v34 }
 0x28b   : > { %v1658_v7 = vadd.f32 0.09678418, %v1626_v21  ;;  %v1625_v45 = vmul.f32 %v4911_v44, %v1593_v30  ;;  %v1847_v19 = vadd.f32 -1.2655122, %v1815_v52  ;;  %v1184_v50 = vmul.f32 0.5, %v5077_v41 }
 0x28c   : > { %v1596_v14 = vadd.f32 -0.18628806, %v1564_v38  ;;  %3978 = vrcp.f32 %v1214_v55  ;;  %v5082_v53 = vpop.eup %3972  ;;  %v1979_v33 = vmul.f32 1.442695, %v1942_v13  ;;  %v1213_v62 = vadd.f32 1.0, %v1181_v63 }
 0x28d   : > { %6861 = vst [vmem:[#allocation41_spill] sm:$0xff] %v5082_v53  ;;  %v1690_v58 = vmul.f32 %v4905_v27, %v1658_v7  ;;  %v1657_v61 = vadd.f32 0.09678418, %v1625_v45  ;;  %v1977_v31 = vmul.f32 1.442695, %v1941_v29  ;;  %v1216_v30 = vadd.f32 1.0, %v1184_v50 }
 0x28e   : > { %v1983_v24 = vmul.f32 1.442695, %v1944_v26  ;;  %v1628_v21 = vmul.f32 %v4919_v25, %v1596_v14  ;;  %3980 = vrcp.f32 %v1213_v62  ;;  %v985_v38 = vadd.f32 %v984_v18, %v4717_v4 }
 0x28f   : > { %v1722_v10 = vadd.f32 0.37409195, %v1690_v58  ;;  %v1689_v52 = vmul.f32 %v4911_v44, %v1657_v61  ;;  %v1943_v55 = vadd.f32 %v4981_v16, %v1847_v19  ;;  %v1883_v13 = vsub.f32 0.0, %v5024_v48  ;;  %v994_v19 = vpop.f32.mrf.mxu0 }
 0x290   : > { %3982 = vrcp.f32 %v1216_v30  ;;  %v1000_v7 = vadd.f32 %v3820_v35, %v679_v9  ;;  %v1660_v45 = vadd.f32 0.09678418, %v1628_v21  ;;  %v5091_v29 = vmul.f32 0.5, %v5005_v42 }
 0x291   : > { %3984 = vpow2.f32 %v1973_v39  ;;  %v5093_v26 = vmul.f32 0.70710677, %v985_v38  ;;  %v5095_v50 = vpop.eup %3974  ;;  %v1754_v63 = vmul.f32 %v4905_v27, %v1722_v10  ;;  %v6864_v4 = vsub.f32 0.0, %v4859_v11 }
 0x292   : > { %6862 = vst [vmem:[#allocation42_spill] sm:$0xff] %v5091_v29  ;;  %6863 = vst [vmem:[#allocation43_spill] sm:$0xff] %v5095_v50  ;;  %3986 = vpow2.f32 %v1979_v33  ;;  %v5103_v18 = vmul.f32 0.70710677, %v1000_v7  ;;  %v5105_v35 = vpop.eup %3976  ;;  %v1721_v9 = vadd.f32 0.37409195, %v1689_v52  ;;  %v5112_v10 = vmul.f32 %v1883_v13, %v5024_v48  ;;  %v674_v33 = vpop.permute.xlu1 %673 }
 0x293   : > { %v5101_v16 = vmul.f32 %v6864_v4, %v4859_v11  ;;  %6866 = vst [vmem:[#allocation45_spill] sm:$0xff] %v5105_v35  ;;  %3988 = vpow2.f32 %v1977_v31  ;;  %v1307_v42 = vmul.f32 0.17087276, %v5095_v50  ;;  %v5109_v39 = vand.u32 2147483647, %v5093_v26 }
 0x294   : > { %6865 = vst [vmem:[#allocation44_spill] sm:$0xff] %v5103_v18  ;;  %3990 = vpow2.f32 %v1983_v24  ;;  %v1981_v14 = vmul.f32 1.442695, %v1943_v55  ;;  %v5115_v11 = vand.u32 2147483647, %v5103_v18  ;;  %v1692_v58 = vmul.f32 %v4919_v25, %v1660_v45 }
 0x295   : > { %v1339_v61 = vadd.f32 -0.82215226, %v1307_v42  ;;  %v5119_v31 = vmul.f32 0.5, %v5033_v20  ;;  %v1183_v62 = vmul.f32 0.5, %v5109_v39  ;;  %v1786_v21 = vadd.f32 1.0000237, %v1754_v63 }
 0x296   : > { %v1886_v30 = vsub.f32 0.0, %v5053_v17  ;;  %v1186_v24 = vmul.f32 0.5, %v5115_v11  ;;  %v5124_v52 = vadd.f32 %v994_v19, %v674_v33  ;;  %v1753_v48 = vmul.f32 %v4911_v44, %v1721_v9 }
 0x297   : > { %v1371_v55 = vmul.f32 %v5095_v50, %v1339_v61  ;;  %v1885_v13 = vsub.f32 0.0, %v5070_v34  ;;  %v1215_v45 = vadd.f32 1.0, %v1183_v62  ;;  %3992 = vpow2.f32 %v1981_v14 }
 0x298   : > { %6867 = vst [vmem:[#allocation46_spill] sm:$0xff] %v5124_v52  ;;  %v5130_v20 = vmul.f32 0.5, %v5045_v47  ;;  %v1888_v4 = vsub.f32 0.0, %v5077_v41  ;;  %v1218_v63 = vadd.f32 1.0, %v1186_v24  ;;  %v1724_v53 = vadd.f32 0.37409195, %v1692_v58 }
 0x299   : > { %v5133_v42 = vpop.eup %3978  ;;  %v1403_v18 = vadd.f32 1.4885159, %v1371_v55  ;;  %v5136_v19 = vmul.f32 0.5, %v5049_v37  ;;  %3994 = vrcp.f32 %v1215_v45  ;;  %v1818_v9 = vmul.f32 %v4905_v27, %v1786_v21  ;;  %v3823_v37 = vpop.f32.mrf.mxu0 }
 0x29a   : > { %6868 = vst [vmem:[#allocation47_spill] sm:$0xff] %v5130_v20  ;;  %v1310_v33 = vmul.f32 0.17087276, %v5133_v42  ;;  %3996 = vrcp.f32 %v1218_v63  ;;  %v5141_v14 = vmul.f32 0.70710677, %v5124_v52  ;;  %v5145_v62 = vmul.f32 %v1886_v30, %v5053_v17 }
 0x29b   : > { %v1785_v47 = vadd.f32 1.0000237, %v1753_v48  ;;  %v1435_v61 = vmul.f32 %v5095_v50, %v1403_v18  ;;  %v5148_v58 = vmul.f32 %v1885_v13, %v5070_v34  ;;  %v5150_v24 = vpop.eup %3980  ;;  %v5153_v21 = vmul.f32 %v1888_v4, %v5077_v41 }
 0x29c   : > { %6869 = vst [vmem:[#allocation48_spill] sm:$0xff] %v5141_v14  ;;  %v1342_v55 = vadd.f32 -0.82215226, %v1310_v33  ;;  %v5155_v45 = vmul.f32 0.5, %v985_v38  ;;  %v5158_v63 = vand.u32 2147483647, %v5141_v14  ;;  %v1756_v17 = vmul.f32 %v4919_v25, %v1724_v53 }
 0x29d   : > { %v5160_v48 = vpop.eup %3982  ;;  %v1467_v18 = vadd.f32 -1.135204, %v1435_v61  ;;  %v1309_v34 = vmul.f32 0.17087276, %v5150_v24  ;;  %v5164_v30 = vmul.f32 0.5, %v1000_v7  ;;  %v1817_v14 = vmul.f32 %v4911_v44, %v1785_v47  ;;  %v1004_v7 = vpop.f32.mrf.mxu0 }
 0x29e   : > { %v5166_v13 = vpop.eup %3984  ;;  %v1850_v33 = vadd.f32 -1.2655122, %v1818_v9  ;;  %v1374_v41 = vmul.f32 %v5133_v42, %v1342_v55  ;;  %v1312_v38 = vmul.f32 0.17087276, %v5160_v48  ;;  %v1185_v4 = vmul.f32 0.5, %v5158_v63 }
 0x29f   : > { %6870 = vst [vmem:[#allocation49_spill] sm:$0xff] %v5164_v30  ;;  %6871 = vst [vmem:[#allocation50_spill] sm:$0xff] %v5166_v13  ;;  %v5171_v52 = vpop.eup %3986  ;;  %v1499_v53 = vmul.f32 %v5095_v50, %v1467_v18  ;;  %v1341_v61 = vadd.f32 -0.82215226, %v1309_v34  ;;  %v1887_v35 = vsub.f32 0.0, %v5109_v39  ;;  %v1890_v55 = vsub.f32 0.0, %v5115_v11 }
 0x2a0   : > { %6872 = vst [vmem:[#allocation51_spill] sm:$0xff] %v5171_v52  ;;  %v5176_v30 = vpop.eup %3988  ;;  %v1406_v13 = vadd.f32 1.4885159, %v1374_v41  ;;  %v1344_v9 = vadd.f32 -0.82215226, %v1312_v38  ;;  %v5180_v2 = vadd.f32 %v3823_v37, %v5038_v60  ;;  %v1217_v18 = vadd.f32 1.0, %v1185_v4 }
 0x2a1   : > { %6873 = vst [vmem:[#allocation52_spill] sm:$0xff] %v5176_v30  ;;  %v5182_v36 = vpop.eup %3990  ;;  %v1788_v52 = vadd.f32 1.0000237, %v1756_v17  ;;  %v1531_v29 = vadd.f32 0.27886808, %v1499_v53  ;;  %v1373_v47 = vmul.f32 %v5150_v24, %v1341_v61  ;;  %v1946_v34 = vadd.f32 %v4990_v8, %v1850_v33 }
 0x2a2   : > { %6874 = vst [vmem:[#allocation53_spill] sm:$0xff] %v5182_v36  ;;  %v1438_v44 = vmul.f32 %v5133_v42, %v1406_v13  ;;  %v1376_v30 = vmul.f32 %v5160_v48, %v1344_v9  ;;  %v5189_v41 = vadd.f32 %v1004_v7, %v5065_v23  ;;  %v1849_v38 = vadd.f32 -1.2655122, %v1817_v14 }
 0x2a3   : > { %v1563_v60 = vmul.f32 %v5095_v50, %v1531_v29  ;;  %v1405_v37 = vadd.f32 1.4885159, %v1373_v47  ;;  %3998 = vrcp.f32 %v1217_v18  ;;  %v5193_v53 = vmul.f32 %v1887_v35, %v5109_v39 }
 0x2a4   : > { %v1470_v36 = vadd.f32 -1.135204, %v1438_v44  ;;  %v1408_v17 = vadd.f32 1.4885159, %v1376_v30  ;;  %v5196_v4 = vmul.f32 0.70710677, %v5180_v2  ;;  %v5198_v8 = vpop.eup %3992  ;;  %v1820_v13 = vmul.f32 %v4919_v25, %v1788_v52 }
 0x2a5   : > { %6876 = vst [vmem:[#allocation55_spill] sm:$0xff] %v5198_v8  ;;  %v1595_v33 = vadd.f32 -0.18628806, %v1563_v60  ;;  %v1437_v23 = vmul.f32 %v5150_v24, %v1405_v37  ;;  %v5203_v14 = vmul.f32 %v1890_v55, %v5115_v11  ;;  %v5213_v30 = vmul.f32 0.70710677, %v5189_v41 }
 0x2a6   : > { %6875 = vst [vmem:[#allocation54_spill] sm:$0xff] %v5196_v4  ;;  %v5205_v29 = vpop.eup %3994  ;;  %v1502_v44 = vmul.f32 %v5133_v42, %v1470_v36  ;;  %v1440_v35 = vmul.f32 %v5160_v48, %v1408_v17  ;;  %v5210_v39 = vand.u32 2147483647, %v5196_v4  ;;  %v1987_v52 = vmul.f32 1.442695, %v1946_v34 }
 0x2a7   : > { %6877 = vst [vmem:[#allocation56_spill] sm:$0xff] %v5213_v30  ;;  %v5215_v61 = vpop.eup %3996  ;;  %v1627_v7 = vmul.f32 %v5095_v50, %v1595_v33  ;;  %v1469_v9 = vadd.f32 -1.135204, %v1437_v23  ;;  %v1311_v11 = vmul.f32 0.17087276, %v5205_v29  ;;  %v1945_v55 = vadd.f32 %v5013_v43, %v1849_v38 }
 0x2a8   : > { %6878 = vst [vmem:[#allocation57_spill] sm:$0xff] %v5215_v61  ;;  %v1534_v47 = vadd.f32 0.27886808, %v1502_v44  ;;  %v1472_v36 = vadd.f32 -1.135204, %v1440_v35  ;;  %v1188_v4 = vmul.f32 0.5, %v5210_v39 }
 0x2a9   : > { %v1314_v18 = vmul.f32 0.17087276, %v5215_v61  ;;  %v1659_v60 = vadd.f32 0.09678418, %v1627_v7  ;;  %v1501_v37 = vmul.f32 %v5150_v24, %v1469_v9  ;;  %v1343_v17 = vadd.f32 -0.82215226, %v1311_v11 }
 0x2aa   : > { %v1566_v8 = vmul.f32 %v5133_v42, %v1534_v47  ;;  %v1504_v34 = vmul.f32 %v5160_v48, %v1472_v36  ;;  %v5226_v23 = vand.u32 2147483647, %v5213_v30  ;;  %v1220_v35 = vadd.f32 1.0, %v1188_v4 }
 0x2ab   : > { %v1346_v33 = vadd.f32 -0.82215226, %v1314_v18  ;;  %v1691_v43 = vmul.f32 %v5095_v50, %v1659_v60  ;;  %v1533_v38 = vadd.f32 0.27886808, %v1501_v37  ;;  %v1375_v44 = vmul.f32 %v5205_v29, %v1343_v17 }
 0x2ac   : > { %v1852_v7 = vadd.f32 -1.2655122, %v1820_v13  ;;  %v1598_v27 = vadd.f32 -0.18628806, %v1566_v8  ;;  %v1536_v9 = vadd.f32 0.27886808, %v1504_v34  ;;  %4000 = vrcp.f32 %v1220_v35 }
 0x2ad   : > { %v1378_v11 = vmul.f32 %v5215_v61, %v1346_v33  ;;  %v1723_v1 = vadd.f32 0.37409195, %v1691_v43  ;;  %v1565_v47 = vmul.f32 %v5150_v24, %v1533_v38  ;;  %v1407_v20 = vadd.f32 1.4885159, %v1375_v44 }
 0x2ae   : > { %v1630_v36 = vmul.f32 %v5133_v42, %v1598_v27  ;;  %v1568_v18 = vmul.f32 %v5160_v48, %v1536_v9  ;;  %v1187_v60 = vmul.f32 0.5, %v5226_v23  ;;  %4002 = vpow2.f32 %v1987_v52 }
 0x2af   : > { %v1410_v30 = vadd.f32 1.4885159, %v1378_v11  ;;  %v1985_v37 = vmul.f32 1.442695, %v1945_v55  ;;  %v1597_v4 = vadd.f32 -0.18628806, %v1565_v47  ;;  %v1439_v8 = vmul.f32 %v5205_v29, %v1407_v20  ;;  %v3826_v20 = vpop.f32.mrf.mxu0 }
 0x2b0   : > { %v5236_v13 = vpop.eup %3998  ;;  %v1662_v17 = vadd.f32 0.09678418, %v1630_v36  ;;  %v1600_v34 = vadd.f32 -0.18628806, %v1568_v18  ;;  %v1219_v43 = vadd.f32 1.0, %v1187_v60  ;;  %v1755_v38 = vmul.f32 %v5095_v50, %v1723_v1 }
 0x2b1   : > { %6879 = vst [vmem:[#allocation58_spill] sm:$0xff] %v5236_v13  ;;  %v1442_v33 = vmul.f32 %v5215_v61, %v1410_v30  ;;  %v1629_v27 = vmul.f32 %v5150_v24, %v1597_v4  ;;  %v1471_v44 = vadd.f32 -1.135204, %v1439_v8  ;;  %v1313_v35 = vmul.f32 0.17087276, %v5236_v13 }
 0x2b2   : > { %v1694_v52 = vmul.f32 %v5133_v42, %v1662_v17  ;;  %v1632_v55 = vmul.f32 %v5160_v48, %v1600_v34  ;;  %4004 = vrcp.f32 %v1219_v43  ;;  %v1948_v11 = vadd.f32 %v5101_v16, %v1852_v7 }
 0x2b3   : > { %v1474_v9 = vadd.f32 -1.135204, %v1442_v33  ;;  %v1661_v47 = vadd.f32 0.09678418, %v1629_v27  ;;  %v1503_v30 = vmul.f32 %v5205_v29, %v1471_v44  ;;  %v1345_v36 = vadd.f32 -0.82215226, %v1313_v35 }
 0x2b4   : > { %v1726_v18 = vadd.f32 0.37409195, %v1694_v52  ;;  %v1664_v1 = vadd.f32 0.09678418, %v1632_v55  ;;  %v1889_v4 = vsub.f32 0.0, %v5158_v63  ;;  %v5251_v33 = vadd.f32 %v3826_v20, %v4994_v28 }
 0x2b5   : > { %v1506_v60 = vmul.f32 %v5215_v61, %v1474_v9  ;;  %v1693_v8 = vmul.f32 %v5150_v24, %v1661_v47  ;;  %v1535_v17 = vadd.f32 0.27886808, %v1503_v30  ;;  %v1377_v34 = vmul.f32 %v5236_v13, %v1345_v36 }
 0x2b6   : > { %v1787_v43 = vadd.f32 1.0000237, %v1755_v38  ;;  %v1758_v16 = vmul.f32 %v5133_v42, %v1726_v18  ;;  %v1696_v7 = vmul.f32 %v5160_v48, %v1664_v1  ;;  %v1991_v44 = vmul.f32 1.442695, %v1948_v11 }
 0x2b7   : > { %v1538_v27 = vadd.f32 0.27886808, %v1506_v60  ;;  %v1725_v35 = vadd.f32 0.37409195, %v1693_v8  ;;  %v1567_v52 = vmul.f32 %v5205_v29, %v1535_v17  ;;  %v1409_v55 = vadd.f32 1.4885159, %v1377_v34 }
 0x2b8   : > { %4006 = vpow2.f32 %v1985_v37  ;;  %v1790_v9 = vadd.f32 1.0000237, %v1758_v16  ;;  %v1728_v47 = vadd.f32 0.37409195, %v1696_v7  ;;  %v5260_v20 = vmul.f32 %v1889_v4, %v5158_v63 }
 0x2b9   : > { %v1570_v30 = vmul.f32 %v5215_v61, %v1538_v27  ;;  %v1757_v36 = vmul.f32 %v5150_v24, %v1725_v35  ;;  %v1599_v28 = vadd.f32 -0.18628806, %v1567_v52  ;;  %v1441_v38 = vmul.f32 %v5236_v13, %v1409_v55  ;;  %v5262_v18 = vpop.eup %4000  ;;  %v1014_v27 = vpop.f32.mrf.mxu0 }
 0x2ba   : > { %6880 = vst [vmem:[#allocation59_spill] sm:$0xff] %v5262_v18  ;;  %v1819_v11 = vmul.f32 %v5095_v50, %v1787_v43  ;;  %v1760_v1 = vmul.f32 %v5160_v48, %v1728_v47  ;;  %v5267_v37 = vmul.f32 0.70710677, %v5251_v33  ;;  %4008 = vpow2.f32 %v1991_v44 }
 0x2bb   : > { %v1602_v60 = vadd.f32 -0.18628806, %v1570_v30  ;;  %v1789_v8 = vadd.f32 1.0000237, %v1757_v36  ;;  %v1631_v17 = vmul.f32 %v5205_v29, %v1599_v28  ;;  %v1473_v34 = vadd.f32 -1.135204, %v1441_v38  ;;  %v5270_v16 = vpop.eup %4002 }
 0x2bc   : > { %6881 = vst [vmem:[#allocation60_spill] sm:$0xff] %v5267_v37  ;;  %6882 = vst [vmem:[#allocation61_spill] sm:$0xff] %v5270_v16  ;;  %v1822_v63 = vmul.f32 %v5133_v42, %v1790_v9  ;;  %v1792_v4 = vadd.f32 1.0000237, %v1760_v1  ;;  %v1316_v43 = vmul.f32 0.17087276, %v5262_v18 }
 0x2bd   : > { %v1634_v7 = vmul.f32 %v5215_v61, %v1602_v60  ;;  %v1663_v35 = vadd.f32 0.09678418, %v1631_v17  ;;  %v1505_v52 = vmul.f32 %v5236_v13, %v1473_v34  ;;  %v5277_v55 = vmul.f32 0.5, %v5180_v2 }
 0x2be   : > { %v5280_v44 = vand.u32 2147483647, %v5267_v37  ;;  %v1851_v47 = vadd.f32 -1.2655122, %v1819_v11  ;;  %v1821_v30 = vmul.f32 %v5150_v24, %v1789_v8  ;;  %v1348_v9 = vadd.f32 -0.82215226, %v1316_v43 }
 0x2bf   : > { %6883 = vst [vmem:[#allocation62_spill] sm:$0xff] %v5277_v55  ;;  %v1666_v36 = vadd.f32 0.09678418, %v1634_v7  ;;  %v5283_v28 = vpop.eup %4004  ;;  %v1824_v38 = vmul.f32 %v5160_v48, %v1792_v4  ;;  %v1695_v1 = vmul.f32 %v5205_v29, %v1663_v35  ;;  %v1537_v60 = vadd.f32 0.27886808, %v1505_v52 }
 0x2c0   : > { %6884 = vst [vmem:[#allocation63_spill] sm:$0xff] %v5283_v28  ;;  %v5288_v17 = vadd.f32 %v1014_v27, %v5018_v46  ;;  %v1854_v2 = vadd.f32 -1.2655122, %v1822_v63  ;;  %v1380_v55 = vmul.f32 %v5262_v18, %v1348_v9  ;;  %v1190_v11 = vmul.f32 0.5, %v5280_v44 }
 0x2c1   : > { %v1698_v34 = vmul.f32 %v5215_v61, %v1666_v36  ;;  %v1727_v8 = vadd.f32 0.37409195, %v1695_v1  ;;  %v1569_v7 = vmul.f32 %v5236_v13, %v1537_v60  ;;  %v5295_v43 = vmul.f32 0.5, %v5189_v41 }
 0x2c2   : > { %v1315_v4 = vmul.f32 0.17087276, %v5283_v28  ;;  %v1947_v35 = vadd.f32 %v5112_v10, %v1851_v47  ;;  %v1853_v52 = vadd.f32 -1.2655122, %v1821_v30  ;;  %v1412_v27 = vadd.f32 1.4885159, %v1380_v55  ;;  %v3829_v30 = vpop.f32.mrf.mxu0 }
 0x2c3   : > { %6885 = vst [vmem:[#allocation64_spill] sm:$0xff] %v5295_v43  ;;  %v1730_v46 = vadd.f32 0.37409195, %v1698_v34  ;;  %v1856_v63 = vadd.f32 -1.2655122, %v1824_v38  ;;  %v1759_v36 = vmul.f32 %v5205_v29, %v1727_v8  ;;  %v1950_v16 = vadd.f32 %v5145_v62, %v1854_v2 }
 0x2c4   : > { %v1601_v37 = vadd.f32 -0.18628806, %v1569_v7  ;;  %v1347_v9 = vadd.f32 -0.82215226, %v1315_v4  ;;  %v1444_v60 = vmul.f32 %v5262_v18, %v1412_v27  ;;  %v1222_v41 = vadd.f32 1.0, %v1190_v11 }
 0x2c5   : > { %v1762_v1 = vmul.f32 %v5215_v61, %v1730_v46  ;;  %v5303_v43 = vpop.eup %4006  ;;  %v1791_v50 = vadd.f32 1.0000237, %v1759_v36  ;;  %v1892_v47 = vsub.f32 0.0, %v5210_v39  ;;  %v1989_v38 = vmul.f32 1.442695, %v1947_v35 }
 0x2c6   : > { %6886 = vst [vmem:[#allocation65_spill] sm:$0xff] %v5303_v43  ;;  %v1633_v10 = vmul.f32 %v5236_v13, %v1601_v37  ;;  %v1379_v55 = vmul.f32 %v5283_v28, %v1347_v9  ;;  %v1949_v34 = vadd.f32 %v5148_v58, %v1853_v52  ;;  %v1476_v62 = vadd.f32 -1.135204, %v1444_v60 }
 0x2c7   : > { %v1794_v8 = vadd.f32 1.0000237, %v1762_v1  ;;  %v1952_v2 = vadd.f32 %v5153_v21, %v1856_v63  ;;  %4010 = vrcp.f32 %v1222_v41  ;;  %v5310_v11 = vpop.eup %4008  ;;  %v1995_v46 = vmul.f32 1.442695, %v1950_v16  ;;  %v1024_v41 = vpop.f32.mrf.mxu0 }
 0x2c8   : > { %v1665_v7 = vadd.f32 0.09678418, %v1633_v10  ;;  %v1411_v4 = vadd.f32 1.4885159, %v1379_v55  ;;  %v1823_v37 = vmul.f32 %v5205_v29, %v1791_v50  ;;  %v1508_v27 = vmul.f32 %v5262_v18, %v1476_v62 }
 0x2c9   : > { %v1030_v36 = vadd.f32 %v3829_v30, %v4929_v5  ;;  %v1826_v35 = vmul.f32 %v5215_v61, %v1794_v8  ;;  %v1891_v21 = vsub.f32 0.0, %v5226_v23  ;;  %v1993_v63 = vmul.f32 1.442695, %v1949_v34 }
 0x2ca   : > { %v1697_v58 = vmul.f32 %v5236_v13, %v1665_v7  ;;  %v1443_v52 = vmul.f32 %v5283_v28, %v1411_v4  ;;  %v1540_v9 = vadd.f32 0.27886808, %v1508_v27  ;;  %v5320_v1 = vmul.f32 %v1892_v47, %v5210_v39 }
 0x2cb   : > { %v5323_v16 = vmul.f32 0.70710677, %v5288_v17  ;;  %4012 = vpow2.f32 %v1989_v38  ;;  %v1999_v50 = vmul.f32 1.442695, %v1952_v2  ;;  %v1855_v10 = vadd.f32 -1.2655122, %v1823_v37  ;;  %v3832_v37 = vpop.f32.mrf.mxu0 }
 0x2cc   : > { %v1729_v60 = vadd.f32 0.37409195, %v1697_v58  ;;  %v1475_v5 = vadd.f32 -1.135204, %v1443_v52  ;;  %4014 = vpow2.f32 %v1995_v46  ;;  %v1572_v55 = vmul.f32 %v5262_v18, %v1540_v9 }
 0x2cd   : > { %6887 = vst [vmem:[#allocation66_spill] sm:$0xff] %v5323_v16  ;;  %v5327_v30 = vand.u32 2147483647, %v5323_v16  ;;  %v1858_v34 = vadd.f32 -1.2655122, %v1826_v35  ;;  %4016 = vpow2.f32 %v1993_v63  ;;  %v1894_v62 = vsub.f32 0.0, %v5280_v44 }
 0x2ce   : > { %v1761_v8 = vmul.f32 %v5236_v13, %v1729_v60  ;;  %v1507_v39 = vmul.f32 %v5283_v28, %v1475_v5  ;;  %v5331_v47 = vmul.f32 0.70710677, %v1030_v36  ;;  %v1604_v38 = vadd.f32 -0.18628806, %v1572_v55 }
 0x2cf   : > { %v1189_v2 = vmul.f32 0.5, %v5327_v30  ;;  %4018 = vpow2.f32 %v1999_v50  ;;  %v1951_v27 = vadd.f32 %v5193_v53, %v1855_v10  ;;  %v1025_v52 = vadd.f32 %v1024_v41, %v4960_v59  ;;  %v1034_v41 = vpop.f32.mrf.mxu0 }
 0x2d0   : > { %6888 = vst [vmem:[#allocation67_spill] sm:$0xff] %v5331_v47  ;;  %v1793_v7 = vadd.f32 1.0000237, %v1761_v8  ;;  %v1539_v4 = vadd.f32 0.27886808, %v1507_v39  ;;  %v1636_v35 = vmul.f32 %v5262_v18, %v1604_v38  ;;  %v1954_v63 = vadd.f32 %v5203_v14, %v1858_v34 }
 0x2d1   : > { %v5336_v46 = vand.u32 2147483647, %v5331_v47  ;;  %v1221_v58 = vadd.f32 1.0, %v1189_v2  ;;  %v5346_v55 = vmul.f32 %v1891_v21, %v5226_v23  ;;  %v5349_v8 = vmul.f32 0.5, %v5251_v33 }
 0x2d2   : > { %v1825_v9 = vmul.f32 %v5236_v13, %v1793_v7  ;;  %v1571_v60 = vmul.f32 %v5283_v28, %v1539_v4  ;;  %v1668_v5 = vadd.f32 0.09678418, %v1636_v35  ;;  %v5352_v59 = vmul.f32 %v1894_v62, %v5280_v44 }
 0x2d3   : > { %v1192_v50 = vmul.f32 0.5, %v5336_v46  ;;  %6889 = vst [vmem:[#allocation68_spill] sm:$0xff] %v5349_v8  ;;  %4020 = vrcp.f32 %v1221_v58  ;;  %v1997_v39 = vmul.f32 1.442695, %v1951_v27  ;;  %v5357_v2 = vmul.f32 0.70710677, %v1025_v52 }
 0x2d4   : > { %v1857_v53 = vadd.f32 -1.2655122, %v1825_v9  ;;  %v1603_v10 = vadd.f32 -0.18628806, %v1571_v60  ;;  %v5354_v34 = vpop.eup %4010  ;;  %v1700_v38 = vmul.f32 %v5262_v18, %v1668_v5  ;;  %v1040_v23 = vadd.f32 %v3832_v37, %v4895_v0  ;;  %v3835_v37 = vpop.f32.mrf.mxu0 }
 0x2d5   : > { %v1224_v14 = vadd.f32 1.0, %v1192_v50  ;;  %6890 = vst [vmem:[#allocation69_spill] sm:$0xff] %v5354_v34  ;;  %6891 = vst [vmem:[#allocation70_spill] sm:$0xff] %v5357_v2  ;;  %v2003_v21 = vmul.f32 1.442695, %v1954_v63  ;;  %v5363_v44 = vmul.f32 0.5, %v5288_v17 }
 0x2d6   : > { %v1635_v33 = vmul.f32 %v5283_v28, %v1603_v10  ;;  %v1318_v7 = vmul.f32 0.17087276, %v5354_v34  ;;  %v1732_v4 = vadd.f32 0.37409195, %v1700_v38  ;;  %v5365_v62 = vmul.f32 0.5, %v1030_v36 }
 0x2d7   : > { %4022 = vrcp.f32 %v1224_v14  ;;  %6892 = vst [vmem:[#allocation71_spill] sm:$0xff] %v5363_v44  ;;  %v1159_v27 = vand.u32 2147483647, %v5357_v2  ;;  %v1953_v35 = vadd.f32 %v5260_v20, %v1857_v53  ;;  %v1893_v0 = vsub.f32 0.0, %v5327_v30 }
 0x2d8   : > { %6893 = vst [vmem:[#allocation72_spill] sm:$0xff] %v5365_v62  ;;  %v1667_v58 = vadd.f32 0.09678418, %v1635_v33  ;;  %v1350_v9 = vadd.f32 -0.82215226, %v1318_v7  ;;  %v5370_v63 = vpop.eup %4012  ;;  %4024 = vpow2.f32 %v1997_v39  ;;  %v1764_v60 = vmul.f32 %v5262_v18, %v1732_v4 }
 0x2d9   : > { %v1191_v50 = vmul.f32 0.5, %v1159_v27  ;;  %v5373_v5 = vmul.f32 0.70710677, %v1040_v23  ;;  %v5375_v17 = vpop.eup %4014  ;;  %4026 = vpow2.f32 %v2003_v21  ;;  %v1035_v53 = vadd.f32 %v1034_v41, %v4913_v6 }
 0x2da   : > { %v1699_v36 = vmul.f32 %v5283_v28, %v1667_v58  ;;  %v1382_v20 = vmul.f32 %v5354_v34, %v1350_v9  ;;  %v1796_v10 = vadd.f32 1.0000237, %v1764_v60  ;;  %v1050_v39 = vadd.f32 %v3835_v37, %v4854_v54  ;;  %v5382_v33 = vpop.eup %4016 }
 0x2db   : > { %v1223_v14 = vadd.f32 1.0, %v1191_v50  ;;  %v1162_v38 = vand.u32 2147483647, %v5373_v5  ;;  %v2001_v7 = vmul.f32 1.442695, %v1953_v35  ;;  %v5385_v61 = vmul.f32 %v1893_v0, %v5327_v30 }
 0x2dc   : > { %v1731_v4 = vadd.f32 0.37409195, %v1699_v36  ;;  %v1414_v13 = vadd.f32 1.4885159, %v1382_v20  ;;  %v5387_v21 = vpop.eup %4018  ;;  %v1828_v58 = vmul.f32 %v5262_v18, %v1796_v10  ;;  %v1896_v6 = vsub.f32 0.0, %v5336_v46  ;;  %v1044_v36 = vpop.f32.mrf.mxu0 }
 0x2dd   : > { %4028 = vrcp.f32 %v1223_v14  ;;  %v1194_v41 = vmul.f32 0.5, %v1162_v38  ;;  %v5393_v37 = vmul.f32 0.5, %v1025_v52  ;;  %v5395_v35 = vmul.f32 0.70710677, %v1035_v53 }
 0x2de   : > { %v1763_v9 = vmul.f32 %v5283_v28, %v1731_v4  ;;  %v1446_v54 = vmul.f32 %v5354_v34, %v1414_v13  ;;  %v1860_v60 = vadd.f32 -1.2655122, %v1828_v58  ;;  %v1895_v50 = vsub.f32 0.0, %v1159_v27 }
 0x2df   : > { %6894 = vst [vmem:[#allocation73_spill] sm:$0xff] %v5393_v37  ;;  %6895 = vst [vmem:[#allocation74_spill] sm:$0xff] %v5395_v35  ;;  %v1226_v30 = vadd.f32 1.0, %v1194_v41  ;;  %v5397_v0 = vmul.f32 0.70710677, %v1050_v39  ;;  %4030 = vpow2.f32 %v2001_v7  ;;  %v5404_v13 = vmul.f32 %v1896_v6, %v5336_v46  ;;  %v3838_v46 = vpop.f32.mrf.mxu0 }
 0x2e0   : > { %v5399_v20 = vpop.eup %4020  ;;  %v1795_v10 = vadd.f32 1.0000237, %v1763_v9  ;;  %v1478_v14 = vadd.f32 -1.135204, %v1446_v54  ;;  %v1161_v44 = vand.u32 2147483647, %v5395_v35  ;;  %v5412_v9 = vmul.f32 %v1895_v50, %v1159_v27 }
 0x2e1   : > { %v1317_v4 = vmul.f32 0.17087276, %v5399_v20  ;;  %v5406_v52 = vmul.f32 0.5, %v1040_v23  ;;  %4032 = vrcp.f32 %v1226_v30  ;;  %v1898_v18 = vsub.f32 0.0, %v1162_v38 }
 0x2e2   : > { %v1827_v58 = vmul.f32 %v5283_v28, %v1795_v10  ;;  %v1510_v41 = vmul.f32 %v5354_v34, %v1478_v14  ;;  %v1193_v8 = vmul.f32 0.5, %v1161_v44  ;;  %v5414_v54 = vmul.f32 0.5, %v1035_v53 }
 0x2e3   : > { %6896 = vst [vmem:[#allocation75_spill] sm:$0xff] %v5406_v52  ;;  %v1349_v7 = vadd.f32 -0.82215226, %v1317_v4  ;;  %v1164_v16 = vand.u32 2147483647, %v5397_v0  ;;  %v1956_v23 = vadd.f32 %v5320_v1, %v1860_v60  ;;  %v1045_v10 = vadd.f32 %v1044_v36, %v4879_v40  ;;  %v1054_v36 = vpop.f32.mrf.mxu0 }
 0x2e4   : > { %v5410_v37 = vpop.eup %4022  ;;  %6897 = vst [vmem:[#allocation76_spill] sm:$0xff] %v5414_v54  ;;  %v1542_v6 = vadd.f32 0.27886808, %v1510_v41  ;;  %v1859_v14 = vadd.f32 -1.2655122, %v1827_v58  ;;  %v1225_v62 = vadd.f32 1.0, %v1193_v8  ;;  %v5424_v50 = vmul.f32 %v1898_v18, %v1162_v38 }
 0x2e5   : > { %v1320_v30 = vmul.f32 0.17087276, %v5410_v37  ;;  %v1381_v28 = vmul.f32 %v5399_v20, %v1349_v7  ;;  %v1196_v2 = vmul.f32 0.5, %v1164_v16  ;;  %v5421_v4 = vpop.eup %4024  ;;  %v5426_v54 = vmul.f32 0.5, %v1050_v39 }
 0x2e6   : > { %v1574_v27 = vmul.f32 %v5354_v34, %v1542_v6  ;;  %v5428_v1 = vpop.eup %4026  ;;  %4034 = vrcp.f32 %v1225_v62  ;;  %v1897_v41 = vsub.f32 0.0, %v1161_v44  ;;  %v2007_v58 = vmul.f32 1.442695, %v1956_v23 }
 0x2e7   : > { %v1352_v53 = vadd.f32 -0.82215226, %v1320_v30  ;;  %6898 = vst [vmem:[#allocation77_spill] sm:$0xff] %v5426_v54  ;;  %6899 = vst [vmem:[#allocation78_spill] sm:$0xff] %v5428_v1  ;;  %v1413_v60 = vadd.f32 1.4885159, %v1381_v28  ;;  %v1060_v43 = vadd.f32 %v3838_v46, %v4741_v15  ;;  %v1955_v6 = vadd.f32 %v5346_v55, %v1859_v14 }
 0x2e8   : > { %v1228_v40 = vadd.f32 1.0, %v1196_v2  ;;  %v1606_v7 = vadd.f32 -0.18628806, %v1574_v27  ;;  %v5434_v38 = vmul.f32 0.70710677, %v1045_v10  ;;  %v1900_v2 = vsub.f32 0.0, %v1164_v16 }
 0x2e9   : > { %v1384_v8 = vmul.f32 %v5410_v37, %v1352_v53  ;;  %v1445_v18 = vmul.f32 %v5399_v20, %v1413_v60  ;;  %v5440_v23 = vadd.f32 %v1054_v36, %v4788_v49  ;;  %v5443_v15 = vmul.f32 %v1897_v41, %v1161_v44 }
 0x2ea   : > { %4036 = vrcp.f32 %v1228_v40  ;;  %6900 = vst [vmem:[#allocation79_spill] sm:$0xff] %v5434_v38  ;;  %v5436_v39 = vpop.eup %4028  ;;  %v1638_v28 = vmul.f32 %v5354_v34, %v1606_v7  ;;  %v5446_v55 = vand.u32 2147483647, %v5434_v38  ;;  %v5449_v53 = vmul.f32 0.70710677, %v1060_v43 }
 0x2eb   : > { %v1416_v62 = vadd.f32 1.4885159, %v1384_v8  ;;  %v1477_v30 = vadd.f32 -1.135204, %v1445_v18  ;;  %v1319_v27 = vmul.f32 0.17087276, %v5436_v39  ;;  %4038 = vpow2.f32 %v2007_v58 }
 0x2ec   : > { %v1670_v46 = vadd.f32 0.09678418, %v1638_v28  ;;  %6901 = vst [vmem:[#allocation80_spill] sm:$0xff] %v5449_v53  ;;  %v5451_v60 = vpop.eup %4030  ;;  %v2005_v40 = vmul.f32 1.442695, %v1955_v6  ;;  %v1195_v7 = vmul.f32 0.5, %v5446_v55  ;;  %v5458_v18 = vmul.f32 %v1900_v2, %v1164_v16 }
 0x2ed   : > { %v1448_v14 = vmul.f32 %v5410_v37, %v1416_v62  ;;  %6902 = vst [vmem:[#allocation81_spill] sm:$0xff] %v5451_v60  ;;  %v1509_v49 = vmul.f32 %v5399_v20, %v1477_v30  ;;  %v1351_v36 = vadd.f32 -0.82215226, %v1319_v27  ;;  %v5461_v58 = vand.u32 2147483647, %v5449_v53 }
 0x2ee   : > { %v5455_v8 = vpop.eup %4032  ;;  %v1702_v44 = vmul.f32 %v5354_v34, %v1670_v46  ;;  %v1227_v60 = vadd.f32 1.0, %v1195_v7  ;;  %v5466_v1 = vmul.f32 0.5, %v1045_v10  ;;  %v5473_v10 = vmul.f32 0.5, %v1060_v43 }
 0x2ef   : > { %v1480_v41 = vadd.f32 -1.135204, %v1448_v14  ;;  %v1541_v28 = vadd.f32 0.27886808, %v1509_v49  ;;  %v1383_v62 = vmul.f32 %v5436_v39, %v1351_v36  ;;  %v1322_v6 = vmul.f32 0.17087276, %v5455_v8  ;;  %v3841_v14 = vpop.f32.mrf.mxu0 }
 0x2f0   : > { %v1734_v30 = vadd.f32 0.37409195, %v1702_v44  ;;  %6903 = vst [vmem:[#allocation82_spill] sm:$0xff] %v5466_v1  ;;  %v1198_v54 = vmul.f32 0.5, %v5461_v58  ;;  %4040 = vrcp.f32 %v1227_v60  ;;  %6904 = vst [vmem:[#allocation83_spill] sm:$0xff] %v5473_v10  ;;  %v5479_v60 = vadd.f32 %v3841_v14, %v4701_v51 }
 0x2f1   : > { %v1512_v27 = vmul.f32 %v5410_v37, %v1480_v41  ;;  %v1573_v46 = vmul.f32 %v5399_v20, %v1541_v28  ;;  %v1415_v16 = vadd.f32 1.4885159, %v1383_v62  ;;  %v1354_v2 = vadd.f32 -0.82215226, %v1322_v6 }
 0x2f2   : > { %4042 = vpow2.f32 %v2005_v40  ;;  %v1766_v49 = vmul.f32 %v5354_v34, %v1734_v30  ;;  %v1230_v53 = vadd.f32 1.0, %v1198_v54  ;;  %6905 = vst [vmem:[#allocation84_spill] sm:$0xff] %v5479_v60  ;;  %vm2080_vm1 = vcmp.ge.f32.partialorder %v5063_v3, 0.0 }
 0x2f3   : > { %v1544_v36 = vadd.f32 0.27886808, %v1512_v27  ;;  %v1605_v47 = vadd.f32 -0.18628806, %v1573_v46  ;;  %v1447_v7 = vmul.f32 %v5436_v39, %v1415_v16  ;;  %v1386_v44 = vmul.f32 %v5455_v8, %v1354_v2  ;;  %v5475_v41 = vpop.eup %4034 }
 0x2f4   : > { %v1798_v1 = vadd.f32 1.0000237, %v1766_v49  ;;  %4044 = vrcp.f32 %v1230_v53  ;;  %v1321_v6 = vmul.f32 0.17087276, %v5475_v41  ;;  %v1899_v46 = vsub.f32 0.0, %v5446_v55 }
 0x2f5   : > { %v1576_v28 = vmul.f32 %v5410_v37, %v1544_v36  ;;  %v1637_v40 = vmul.f32 %v5399_v20, %v1605_v47  ;;  %v1479_v62 = vadd.f32 -1.135204, %v1447_v7  ;;  %v1418_v54 = vadd.f32 1.4885159, %v1386_v44 }
 0x2f6   : > { %v1830_v43 = vmul.f32 %v5354_v34, %v1798_v1  ;;  %v5488_v16 = vmul.f32 0.70710677, %v5440_v23  ;;  %v1353_v47 = vadd.f32 -0.82215226, %v1321_v6  ;;  %vm2079_vm2 = vcmp.ge.f32.partialorder %v5093_v26, 0.0 }
 0x2f7   : > { %v5483_v30 = vpop.eup %4036  ;;  %v1608_v27 = vadd.f32 -0.18628806, %v1576_v28  ;;  %v1669_v53 = vadd.f32 0.09678418, %v1637_v40  ;;  %v1511_v51 = vmul.f32 %v5436_v39, %v1479_v62  ;;  %v1450_v2 = vmul.f32 %v5455_v8, %v1418_v54 }
 0x2f8   : > { %6906 = vst [vmem:[#allocation85_spill] sm:$0xff] %v5488_v16  ;;  %v1862_v14 = vadd.f32 -1.2655122, %v1830_v43  ;;  %v1324_v36 = vmul.f32 0.17087276, %v5483_v30  ;;  %v5497_v1 = vpop.eup %4038  ;;  %v1385_v40 = vmul.f32 %v5475_v41, %v1353_v47  ;;  %v1902_v54 = vsub.f32 0.0, %v5461_v58 }
 0x2f9   : > { %v1640_v49 = vmul.f32 %v5410_v37, %v1608_v27  ;;  %v5495_v7 = vand.u32 2147483647, %v5488_v16  ;;  %6907 = vst [vmem:[#allocation86_spill] sm:$0xff] %v5497_v1  ;;  %v1701_v44 = vmul.f32 %v5399_v20, %v1669_v53  ;;  %v1543_v28 = vadd.f32 0.27886808, %v1511_v51 }
 0x2fa   : > { %v1482_v34 = vadd.f32 -1.135204, %v1450_v2  ;;  %v1356_v10 = vadd.f32 -0.82215226, %v1324_v36  ;;  %v1417_v52 = vadd.f32 1.4885159, %v1385_v40  ;;  %v2045_v26 = vmul.f32 %v5382_v33, %v5150_v24 }
 0x2fb   : > { %v1672_v62 = vadd.f32 0.09678418, %v1640_v49  ;;  %v1197_v6 = vmul.f32 0.5, %v5495_v7  ;;  %v1733_v43 = vadd.f32 0.37409195, %v1701_v44  ;;  %v1575_v27 = vmul.f32 %v5436_v39, %v1543_v28 }
 0x2fc   : > { %v1514_v16 = vmul.f32 %v5455_v8, %v1482_v34  ;;  %v1388_v53 = vmul.f32 %v5483_v30, %v1356_v10  ;;  %v5508_v51 = vmul.f32 0.5, %v5440_v23  ;;  %v1449_v38 = vmul.f32 %v5475_v41, %v1417_v52 }
 0x2fd   : > { %v1704_v1 = vmul.f32 %v5410_v37, %v1672_v62  ;;  %v1229_v2 = vadd.f32 1.0, %v1197_v6  ;;  %v1765_v47 = vmul.f32 %v5399_v20, %v1733_v43  ;;  %v1607_v49 = vadd.f32 -0.18628806, %v1575_v27  ;;  %v5512_v44 = vpop.eup %4040 }
 0x2fe   : > { %6908 = vst [vmem:[#allocation87_spill] sm:$0xff] %v5508_v51  ;;  %v1546_v36 = vadd.f32 0.27886808, %v1514_v16  ;;  %v1958_v28 = vadd.f32 %v5352_v59, %v1862_v14  ;;  %v1420_v40 = vadd.f32 1.4885159, %v1388_v53  ;;  %vm2078_vm3 = vcmp.ge.f32.partialorder %v5042_v32, 0.0 }
 0x2ff   : > { %v1736_v34 = vadd.f32 0.37409195, %v1704_v1  ;;  %v5516_v62 = vmul.f32 0.70710677, %v5479_v60  ;;  %v5518_v10 = vpop.eup %4042  ;;  %v1797_v23 = vadd.f32 1.0000237, %v1765_v47  ;;  %v1639_v6 = vmul.f32 %v5436_v39, %v1607_v49 }
 0x300   : > { %6909 = vst [vmem:[#allocation88_spill] sm:$0xff] %v5518_v10  ;;  %v1578_v43 = vmul.f32 %v5455_v8, %v1546_v36  ;;  %v1481_v27 = vadd.f32 -1.135204, %v1449_v38  ;;  %v1452_v52 = vmul.f32 %v5483_v30, %v1420_v40  ;;  %v1323_v51 = vmul.f32 0.17087276, %v5512_v44 }
 0x301   : > { %v1768_v16 = vmul.f32 %v5410_v37, %v1736_v34  ;;  %4046 = vrcp.f32 %v1229_v2  ;;  %v5525_v59 = vpop.eup %4044  ;;  %v1829_v14 = vmul.f32 %v5399_v20, %v1797_v23  ;;  %v1671_v1 = vadd.f32 0.09678418, %v1639_v6 }
 0x302   : > { %v1610_v53 = vadd.f32 -0.18628806, %v1578_v43  ;;  %v1513_v47 = vmul.f32 %v5475_v41, %v1481_v27  ;;  %v1484_v49 = vadd.f32 -1.135204, %v1452_v52  ;;  %v1355_v10 = vadd.f32 -0.82215226, %v1323_v51 }
 0x303   : > { %v1800_v60 = vadd.f32 1.0000237, %v1768_v16  ;;  %v5530_v38 = vmul.f32 %v1899_v46, %v5446_v55  ;;  %v1861_v36 = vadd.f32 -1.2655122, %v1829_v14  ;;  %v1703_v34 = vmul.f32 %v5436_v39, %v1671_v1 }
 0x304   : > { %v1642_v40 = vmul.f32 %v5455_v8, %v1610_v53  ;;  %v1545_v2 = vadd.f32 0.27886808, %v1513_v47  ;;  %v1516_v23 = vmul.f32 %v5483_v30, %v1484_v49  ;;  %v1387_v6 = vmul.f32 %v5512_v44, %v1355_v10  ;;  %v1064_v49 = vpop.f32.mrf.mxu0 }
 0x305   : > { %v1832_v35 = vmul.f32 %v5410_v37, %v1800_v60  ;;  %v1326_v43 = vmul.f32 0.17087276, %v5525_v59  ;;  %v2011_v27 = vmul.f32 1.442695, %v1958_v28  ;;  %v1735_v16 = vadd.f32 0.37409195, %v1703_v34 }
 0x306   : > { %v1674_v51 = vadd.f32 0.09678418, %v1642_v40  ;;  %v1577_v55 = vmul.f32 %v5475_v41, %v1545_v2  ;;  %v1548_v52 = vadd.f32 0.27886808, %v1516_v23  ;;  %v1419_v14 = vadd.f32 1.4885159, %v1387_v6 }
 0x307   : > { %v1864_v46 = vadd.f32 -1.2655122, %v1832_v35  ;;  %v5540_v1 = vmul.f32 %v1902_v54, %v5461_v58  ;;  %v1957_v53 = vadd.f32 %v5385_v61, %v1861_v36  ;;  %v1767_v60 = vmul.f32 %v5436_v39, %v1735_v16  ;;  %v2258_v54 = vld [vmem:[#allocation2 + $0x8] sm:$0xff] }
 0x308   : > { %v1706_v47 = vmul.f32 %v5455_v8, %v1674_v51  ;;  %v1609_v10 = vadd.f32 -0.18628806, %v1577_v55  ;;  %v1580_v34 = vmul.f32 %v5483_v30, %v1548_v52  ;;  %v1451_v40 = vmul.f32 %v5512_v44, %v1419_v14  ;;  %2385 = vmatprep.mubr.f32.mxu1 %v2258_v54 }
 0x309   : > { %v1960_v28 = vadd.f32 %v5404_v13, %v1864_v46  ;;  %v1358_v35 = vadd.f32 -0.82215226, %v1326_v43  ;;  %4048 = vpow2.f32 %v2011_v27  ;;  %v1799_v2 = vadd.f32 1.0000237, %v1767_v60 }
 0x30a   : > { %v1738_v23 = vadd.f32 0.37409195, %v1706_v47  ;;  %v1641_v58 = vmul.f32 %v5475_v41, %v1609_v10  ;;  %v1612_v61 = vadd.f32 -0.18628806, %v1580_v34  ;;  %v1483_v36 = vadd.f32 -1.135204, %v1451_v40 }
 0x30b   : > { %v1390_v6 = vmul.f32 %v5525_v59, %v1358_v35  ;;  %v5551_v16 = vadd.f32 %v1064_v49, %v4713_v12  ;;  %v2009_v13 = vmul.f32 1.442695, %v1957_v53  ;;  %v1831_v51 = vmul.f32 %v5436_v39, %v1799_v2 }
 0x30c   : > { %v1770_v55 = vmul.f32 %v5455_v8, %v1738_v23  ;;  %v1673_v43 = vadd.f32 0.09678418, %v1641_v58  ;;  %v2015_v27 = vmul.f32 1.442695, %v1960_v28  ;;  %v1644_v46 = vmul.f32 %v5483_v30, %v1612_v61 }
 0x30d   : > { %v1515_v52 = vmul.f32 %v5512_v44, %v1483_v36  ;;  %v1422_v14 = vadd.f32 1.4885159, %v1390_v6  ;;  %v1863_v47 = vadd.f32 -1.2655122, %v1831_v51  ;;  %v1168_v49 = vand.u32 2147483647, %v5516_v62 }
 0x30e   : > { %v5557_v60 = vpop.eup %4046  ;;  %v1802_v10 = vadd.f32 1.0000237, %v1770_v55  ;;  %v1705_v12 = vmul.f32 %v5475_v41, %v1673_v43  ;;  %v1676_v53 = vadd.f32 0.09678418, %v1644_v46  ;;  %4050 = vpow2.f32 %v2009_v13 }
 0x30f   : > { %v1547_v34 = vadd.f32 0.27886808, %v1515_v52  ;;  %v1454_v40 = vmul.f32 %v5525_v59, %v1422_v14  ;;  %v1325_v35 = vmul.f32 0.17087276, %v5557_v60  ;;  %v1959_v28 = vadd.f32 %v5412_v9, %v1863_v47 }
 0x310   : > { %v1834_v2 = vmul.f32 %v5455_v8, %v1802_v10  ;;  %v1737_v23 = vadd.f32 0.37409195, %v1705_v12  ;;  %v1200_v58 = vmul.f32 0.5, %v1168_v49  ;;  %v1708_v54 = vmul.f32 %v5483_v30, %v1676_v53 }
 0x311   : > { %v1579_v61 = vmul.f32 %v5512_v44, %v1547_v34  ;;  %v1486_v36 = vadd.f32 -1.135204, %v1454_v40  ;;  %v1357_v6 = vadd.f32 -0.82215226, %v1325_v35  ;;  %4052 = vpow2.f32 %v2015_v27 }
 0x312   : > { %v1866_v51 = vadd.f32 -1.2655122, %v1834_v2  ;;  %v1769_v55 = vmul.f32 %v5475_v41, %v1737_v23  ;;  %v1232_v43 = vadd.f32 1.0, %v1200_v58  ;;  %v1740_v46 = vadd.f32 0.37409195, %v1708_v54 }
 0x313   : > { %v1611_v52 = vadd.f32 -0.18628806, %v1579_v61  ;;  %v1518_v14 = vmul.f32 %v5525_v59, %v1486_v36  ;;  %v1389_v9 = vmul.f32 %v5557_v60, %v1357_v6  ;;  %v2013_v47 = vmul.f32 1.442695, %v1959_v28 }
 0x314   : > { %v1962_v10 = vadd.f32 %v5424_v50, %v1866_v51  ;;  %v1801_v12 = vadd.f32 1.0000237, %v1769_v55  ;;  %v1772_v53 = vmul.f32 %v5483_v30, %v1740_v46  ;;  %v1901_v23 = vsub.f32 0.0, %v5495_v7 }
 0x315   : > { %v1643_v34 = vmul.f32 %v5512_v44, %v1611_v52  ;;  %v1550_v13 = vadd.f32 0.27886808, %v1518_v14  ;;  %v1421_v40 = vadd.f32 1.4885159, %v1389_v9  ;;  %4054 = vrcp.f32 %v1232_v43 }
 0x316   : > { %v2019_v35 = vmul.f32 1.442695, %v1962_v10  ;;  %v1833_v2 = vmul.f32 %v5475_v41, %v1801_v12  ;;  %v5575_v58 = vpop.eup %4048  ;;  %v1804_v54 = vadd.f32 1.0000237, %v1772_v53  ;;  %4056 = vpow2.f32 %v2013_v47 }
 0x317   : > { %v1675_v27 = vadd.f32 0.09678418, %v1643_v34  ;;  %v1582_v28 = vmul.f32 %v5525_v59, %v1550_v13  ;;  %v1453_v50 = vmul.f32 %v5557_v60, %v1421_v40  ;;  %v1904_v36 = vsub.f32 0.0, %v1168_v49 }
 0x318   : > { %v1865_v61 = vadd.f32 -1.2655122, %v1833_v2  ;;  %v5580_v6 = vmul.f32 0.70710677, %v5551_v16  ;;  %v1836_v51 = vmul.f32 %v5483_v30, %v1804_v54  ;;  %4058 = vpow2.f32 %v2019_v35 }
 0x319   : > { %v1707_v55 = vmul.f32 %v5512_v44, %v1675_v27  ;;  %v1614_v43 = vadd.f32 -0.18628806, %v1582_v28  ;;  %v1485_v46 = vadd.f32 -1.135204, %v1453_v50  ;;  %v5587_v14 = vmul.f32 %v1901_v23, %v5495_v7 }
 0x31a   : > { %v1961_v52 = vadd.f32 %v5443_v15, %v1865_v61  ;;  %v1167_v9 = vand.u32 2147483647, %v5580_v6  ;;  %v1868_v47 = vadd.f32 -1.2655122, %v1836_v51  ;;  %v5593_v13 = vmul.f32 %v1904_v36, %v1168_v49 }
 0x31b   : > { %v1739_v10 = vadd.f32 0.37409195, %v1707_v55  ;;  %v1646_v12 = vmul.f32 %v5525_v59, %v1614_v43  ;;  %v1517_v53 = vmul.f32 %v5557_v60, %v1485_v46  ;;  %v2048_v28 = vmul.f32 %v5387_v21, %v5160_v48  ;;  %v5602_v50 = vpop.eup %4050 }
 0x31c   : > { %v2017_v34 = vmul.f32 1.442695, %v1961_v52  ;;  %v1199_v40 = vmul.f32 0.5, %v1167_v9  ;;  %v1903_v35 = vsub.f32 0.0, %v1167_v9  ;;  %v1964_v15 = vadd.f32 %v5458_v18, %v1868_v47 }
 0x31d   : > { %v1771_v7 = vmul.f32 %v5512_v44, %v1739_v10  ;;  %v1678_v2 = vadd.f32 0.09678418, %v1646_v12  ;;  %v1549_v23 = vadd.f32 0.27886808, %v1517_v53  ;;  %v2112_v18 = vsub.f32 1.0, %v2048_v28 }
 0x31e   : > { %4060 = vpow2.f32 %v2017_v34  ;;  %v1231_v54 = vadd.f32 1.0, %v1199_v40  ;;  %v5598_v27 = vmul.f32 %v1903_v35, %v1167_v9  ;;  %v2023_v49 = vmul.f32 1.442695, %v1964_v15  ;;  %v5608_v46 = vpop.eup %4052 }
 0x31f   : > { %v1803_v61 = vadd.f32 1.0000237, %v1771_v7  ;;  %v1710_v36 = vmul.f32 %v5525_v59, %v1678_v2  ;;  %v1581_v51 = vmul.f32 %v5557_v60, %v1549_v23  ;;  %v3585_v55 = vadd.f32 -1.0, %v2048_v28 }
 0x320   : > { %4062 = vrcp.f32 %v1231_v54  ;;  %v2047_v43 = vmul.f32 %v5421_v4, %v5205_v29  ;;  %vm2077_vm4 = vcmp.ge.f32.partialorder %v5058_v22, 0.0  ;;  %v2046_v12 = vmul.f32 %v5375_v17, %v5133_v42 }
 0x321   : > { %4064 = vpow2.f32 %v2023_v49  ;;  %v1835_v48 = vmul.f32 %v5512_v44, %v1803_v61  ;;  %v1742_v21 = vadd.f32 0.37409195, %v1710_v36  ;;  %v1613_v52 = vadd.f32 -0.18628806, %v1581_v51 }
 0x322   : > { %v2176_v9 = vsel %vm2080_vm1, %v2112_v18, %v3585_v55  ;;  %v2111_v47 = vsub.f32 1.0, %v2047_v43  ;;  %v3584_v10 = vadd.f32 -1.0, %v2047_v43  ;;  %v5616_v53 = vpop.eup %4054  ;;  %v2110_v3 = vsub.f32 1.0, %v2046_v12 }
 0x323   : > { %v1867_v29 = vadd.f32 -1.2655122, %v1835_v48  ;;  %v1774_v4 = vmul.f32 %v5525_v59, %v1742_v21  ;;  %v1645_v34 = vmul.f32 %v5557_v60, %v1613_v52  ;;  %v2208_v40 = vadd.f32 1.0, %v2176_v9  ;;  %v5623_v2 = vpop.eup %4056 }
 0x324   : > { %v1328_v35 = vmul.f32 0.17087276, %v5616_v53  ;;  %v2175_v15 = vsel %vm2079_vm2, %v2111_v47, %v3584_v10  ;;  %v3583_v7 = vadd.f32 -1.0, %v2046_v12  ;;  %vm2075_vm6 = vcmp.ge.f32.partialorder %v5016_v56, 0.0  ;;  %v6910_v47 = vld [vmem:[#allocation43_spill] sm:$0xff] }
 0x325   : > { %v1963_v42 = vadd.f32 %v5530_v38, %v1867_v29  ;;  %v1806_v17 = vadd.f32 1.0000237, %v1774_v4  ;;  %v1677_v23 = vadd.f32 0.09678418, %v1645_v34  ;;  %v5628_v54 = vmul.f32 %v2208_v40, %v5136_v19  ;;  %v4059_v36 = vpop.eup %4058 }
 0x326   : > { %v1360_v28 = vadd.f32 -0.82215226, %v1328_v35  ;;  %v2207_v49 = vadd.f32 1.0, %v2175_v15  ;;  %v2174_v61 = vsel %vm2078_vm3, %v2110_v3, %v3583_v7  ;;  %v2109_v48 = vsub.f32 1.0, %v2045_v26 }
 0x327   : > { %v2021_v51 = vmul.f32 1.442695, %v1963_v42  ;;  %v1838_v18 = vmul.f32 %v5525_v59, %v1806_v17  ;;  %v1709_v38 = vmul.f32 %v5557_v60, %v1677_v23  ;;  %v2206_v55 = vadd.f32 1.0, %v2174_v61 }
 0x328   : > { %v1392_v19 = vmul.f32 %v5616_v53, %v1360_v28  ;;  %v5639_v43 = vmul.f32 %v2207_v49, %v5155_v45  ;;  %v3582_v32 = vadd.f32 -1.0, %v2045_v26  ;;  %vm2090_vm7 = vcmp.ge.f32.partialorder %v5373_v5, 0.0 }
 0x329   : > { %4066 = vpow2.f32 %v2021_v51  ;;  %v1870_v24 = vadd.f32 -1.2655122, %v1838_v18  ;;  %v1741_v33 = vadd.f32 0.37409195, %v1709_v38  ;;  %v5643_v21 = vmul.f32 %v2206_v55, %v5119_v31 }
 0x32a   : > { %vm2092_vm8 = vcmp.ge.f32.partialorder %v5397_v0, 0.0  ;;  %v1424_v52 = vadd.f32 1.4885159, %v1392_v19  ;;  %v2173_v9 = vsel %vm2077_vm4, %v2109_v48, %v3582_v32  ;;  %v2044_v45 = vmul.f32 %v5310_v11, %v4919_v25  ;;  %v6911_v11 = vld [vmem:[#allocation47_spill] sm:$0xff] }
 0x32b   : > { %v2043_v10 = vmul.f32 %v5370_v63, %v6910_v47  ;;  %v4061_v12 = vpop.eup %4060  ;;  %v1966_v29 = vadd.f32 %v5540_v1, %v1870_v24  ;;  %v1773_v4 = vmul.f32 %v5557_v60, %v1741_v33  ;;  %v2205_v34 = vadd.f32 1.0, %v2173_v9  ;;  %v6912_v1 = vld [vmem:[#allocation18_spill] sm:$0xff]  ;;  %v6913_v24 = vld [vmem:[#allocation39_spill] sm:$0xff] }
 0x32c   : > { %v2058_v31 = vmul.f32 %v4059_v36, %v5455_v8  ;;  %v1456_v40 = vmul.f32 %v5616_v53, %v1424_v52  ;;  %v2108_v35 = vsub.f32 1.0, %v2044_v45  ;;  %v3581_v15 = vadd.f32 -1.0, %v2044_v45  ;;  %v6914_v33 = vld [vmem:[#allocation74_spill] sm:$0xff]  ;;  %v6915_v52 = vld [vmem:[#allocation79_spill] sm:$0xff] }
 0x32d   : > { %v2107_v22 = vsub.f32 1.0, %v2043_v10  ;;  %v5656_v3 = vpop.eup %4062  ;;  %v2027_v7 = vmul.f32 1.442695, %v1966_v29  ;;  %v1805_v25 = vadd.f32 1.0000237, %v1773_v4  ;;  %v5659_v42 = vmul.f32 %v2205_v34, %v6911_v11  ;;  %v6916_v4 = vld [vmem:[#allocation32_spill] sm:$0xff] }
 0x32e   : > { %v3580_v63 = vadd.f32 -1.0, %v2043_v10  ;;  %v4065_v17 = vpop.eup %4064  ;;  %vm2074_vm9 = vcmp.ge.f32.partialorder %v6912_v1, 0.0  ;;  %v1488_v23 = vadd.f32 -1.135204, %v1456_v40  ;;  %v1327_v28 = vmul.f32 0.17087276, %v5656_v3 }
 0x32f   : > { %v2172_v8 = vsel %vm2076_vm5, %v2108_v35, %v3581_v15  ;;  %v2122_v49 = vsub.f32 1.0, %v2058_v31  ;;  %4068 = vpow2.f32 %v2027_v7  ;;  %v1837_v61 = vmul.f32 %v5557_v60, %v1805_v25  ;;  %v6917_v34 = vld [vmem:[#allocation61_spill] sm:$0xff]  ;;  %v6919_v7 = vld [vmem:[#allocation42_spill] sm:$0xff]  ;;  %v6920_v11 = vld [vmem:[#allocation75_spill] sm:$0xff] }
 0x330   : > { %v2060_v26 = vmul.f32 %v4065_v17, %v5483_v30  ;;  %v2204_v36 = vadd.f32 1.0, %v2172_v8  ;;  %v1520_v51 = vmul.f32 %v5616_v53, %v1488_v23  ;;  %v1359_v18 = vadd.f32 -0.82215226, %v1327_v28  ;;  %v6918_v40 = vld [vmem:[#allocation21_spill] sm:$0xff]  ;;  %v6921_v23 = vld [vmem:[#allocation67_spill] sm:$0xff] }
 0x331   : > { %v2171_v38 = vsel %vm2075_vm6, %v2107_v22, %v3580_v63  ;;  %v3595_v55 = vadd.f32 -1.0, %v2058_v31  ;;  %v1869_v19 = vadd.f32 -1.2655122, %v1837_v61  ;;  %vm2089_vm10 = vcmp.ge.f32.partialorder %v6914_v33, 0.0 }
 0x332   : > { %v2124_v48 = vsub.f32 1.0, %v2060_v26  ;;  %v3597_v32 = vadd.f32 -1.0, %v2060_v26  ;;  %v5671_v57 = vmul.f32 %v2204_v36, %v6913_v24  ;;  %vm2091_vm11 = vcmp.ge.f32.partialorder %v6915_v52, 0.0 }
 0x333   : > { %v1552_v9 = vadd.f32 0.27886808, %v1520_v51  ;;  %v1391_v30 = vmul.f32 %v5656_v3, %v1359_v18  ;;  %v2203_v45 = vadd.f32 1.0, %v2171_v38  ;;  %v2186_v47 = vsel %vm2090_vm7, %v2122_v49, %v3595_v55  ;;  %v6922_v49 = vld [vmem:[#allocation77_spill] sm:$0xff] }
 0x334   : > { %v1965_v56 = vadd.f32 %v5587_v14, %v1869_v19  ;;  %v2188_v10 = vsel %vm2092_vm8, %v2124_v48, %v3597_v32  ;;  %v2218_v29 = vadd.f32 1.0, %v2186_v47  ;;  %v2042_v31 = vmul.f32 %v6917_v34, %v6916_v4  ;;  %v6923_v18 = vld [vmem:[#allocation33_spill] sm:$0xff]  ;;  %v6925_v19 = vld [vmem:[#allocation80_spill] sm:$0xff] }
 0x335   : > { %vm2073_vm12 = vcmp.ge.f32.partialorder %v6918_v40, 0.0  ;;  %v1584_v35 = vmul.f32 %v5616_v53, %v1552_v9  ;;  %v1423_v15 = vadd.f32 1.4885159, %v1391_v30  ;;  %v2220_v22 = vadd.f32 1.0, %v2188_v10  ;;  %v6924_v38 = vld [vmem:[#allocation65_spill] sm:$0xff] }
 0x336   : > { %v5686_v25 = vmul.f32 %v2203_v45, %v6919_v7  ;;  %v2025_v5 = vmul.f32 1.442695, %v1965_v56  ;;  %v5689_v63 = vmul.f32 %v2218_v29, %v6920_v11  ;;  %v2106_v14 = vsub.f32 1.0, %v2042_v31  ;;  %v4067_v17 = vpop.eup %4066  ;;  %v6927_v56 = vld [vmem:[#allocation37_spill] sm:$0xff] }
 0x337   : > { %v3579_v0 = vadd.f32 -1.0, %v2042_v31  ;;  %vm2088_vm13 = vcmp.ge.f32.partialorder %v6921_v23, 0.0  ;;  %v1616_v28 = vadd.f32 -0.18628806, %v1584_v35  ;;  %v1455_v8 = vmul.f32 %v5656_v3, %v1423_v15  ;;  %v6928_v35 = vld [vmem:[#allocation30_spill] sm:$0xff]  ;;  %v6929_v15 = vld [vmem:[#allocation53_spill] sm:$0xff] }
 0x338   : > { %v5694_v61 = vmul.f32 %v2220_v22, %v6922_v49  ;;  %v2057_v26 = vmul.f32 %v4061_v12, %v5475_v41  ;;  %4070 = vpow2.f32 %v2025_v5  ;;  %v2059_v36 = vmul.f32 %v4067_v17, %v5512_v44  ;;  %v6926_v12 = vld [vmem:[#allocation16_spill] sm:$0xff]  ;;  %v6930_v5 = vld [vmem:[#allocation70_spill] sm:$0xff]  ;;  %v6931_v49 = vld [vmem:[#allocation17_spill] sm:$0xff] }
 0x339   : > { %v2170_v51 = vsel %vm2074_vm9, %v2106_v14, %v3579_v0  ;;  %v2041_v55 = vmul.f32 %v6924_v38, %v6923_v18  ;;  %vm2094_vm14 = vcmp.ge.f32.partialorder %v6925_v19, 0.0  ;;  %v1648_v48 = vmul.f32 %v5616_v53, %v1616_v28  ;;  %v6934_v40 = vld [vmem:[#allocation85_spill] sm:$0xff] }
 0x33a   : > { %v1487_v32 = vadd.f32 -1.135204, %v1455_v8  ;;  %v2202_v24 = vadd.f32 1.0, %v2170_v51  ;;  %v2121_v9 = vsub.f32 1.0, %v2057_v26  ;;  %v2123_v30 = vsub.f32 1.0, %v2059_v36  ;;  %v6933_v51 = vld [vmem:[#allocation76_spill] sm:$0xff] }
 0x33b   : > { %v3596_v45 = vadd.f32 -1.0, %v2059_v36  ;;  %v3594_v47 = vadd.f32 -1.0, %v2057_v26  ;;  %v2105_v41 = vsub.f32 1.0, %v2041_v55  ;;  %vm2072_vm15 = vcmp.ge.f32.partialorder %v6926_v12, 0.0  ;;  %v6932_v26 = vld [vmem:[#allocation82_spill] sm:$0xff] }
 0x33c   : > { %v1680_v44 = vadd.f32 0.09678418, %v1648_v48  ;;  %v1519_v1 = vmul.f32 %v5656_v3, %v1487_v32  ;;  %v5707_v10 = vmul.f32 %v2202_v24, %v6927_v56  ;;  %v3578_v29 = vadd.f32 -1.0, %v2041_v55  ;;  %v4069_v7 = vpop.eup %4068  ;;  %v6936_v56 = vld [vmem:[#allocation60_spill] sm:$0xff] }
 0x33d   : > { %v2187_v4 = vsel %vm2091_vm11, %v2123_v30, %v3596_v45  ;;  %v2185_v34 = vsel %vm2089_vm10, %v2121_v9, %v3594_v47  ;;  %v2056_v31 = vmul.f32 %v5608_v46, %v5410_v37  ;;  %v2040_v22 = vmul.f32 %v6929_v15, %v6928_v35  ;;  %v6935_v47 = vld [vmem:[#allocation38_spill] sm:$0xff] }
 0x33e   : > { %vm2087_vm0 = vcmp.ge.f32.partialorder %v6930_v5, 0.0  ;;  %v1712_v11 = vmul.f32 %v5616_v53, %v1680_v44  ;;  %v1551_v14 = vadd.f32 0.27886808, %v1519_v1  ;;  %v2219_v0 = vadd.f32 1.0, %v2187_v4 }
 0x33f   : > { %v2217_v17 = vadd.f32 1.0, %v2185_v34  ;;  %v2062_v52 = vmul.f32 %v4069_v7, %v5525_v59  ;;  %v2169_v33 = vsel %vm2073_vm12, %v2105_v41, %v3578_v29  ;;  %v2120_v28 = vsub.f32 1.0, %v2056_v31  ;;  %v6937_v34 = vld [vmem:[#allocation72_spill] sm:$0xff]  ;;  %v6938_v7 = vld [vmem:[#allocation31_spill] sm:$0xff] }
 0x340   : > { %v3593_v8 = vadd.f32 -1.0, %v2056_v31  ;;  %vm2071_vm1 = vcmp.ge.f32.partialorder %v6931_v49, 0.0  ;;  %v1744_v37 = vadd.f32 0.37409195, %v1712_v11  ;;  %v1583_v46 = vmul.f32 %v5656_v3, %v1551_v14  ;;  %v6939_v11 = vld [vmem:[#allocation55_spill] sm:$0xff] }
 0x341   : > { %v5725_v36 = vmul.f32 %v2219_v0, %v6932_v26  ;;  %v5728_v18 = vmul.f32 %v2217_v17, %v6933_v51  ;;  %v2126_v38 = vsub.f32 1.0, %v2062_v52  ;;  %v3599_v55 = vadd.f32 -1.0, %v2062_v52  ;;  %v6940_v0 = vld [vmem:[#allocation14_spill] sm:$0xff]  ;;  %v6941_v17 = vld [vmem:[#allocation83_spill] sm:$0xff] }
 0x342   : > { %v2201_v48 = vadd.f32 1.0, %v2169_v33  ;;  %v2184_v59 = vsel %vm2088_vm13, %v2120_v28, %v3593_v8  ;;  %vm2093_vm2 = vcmp.ge.f32.partialorder %v6934_v40, 0.0  ;;  %v1776_v32 = vmul.f32 %v5616_v53, %v1744_v37  ;;  %v6948_v49 = vld [vmem:[#allocation51_spill] sm:$0xff] }
 0x343   : > { %v1615_v24 = vadd.f32 -0.18628806, %v1583_v46  ;;  %v2216_v9 = vadd.f32 1.0, %v2184_v59  ;;  %v2104_v30 = vsub.f32 1.0, %v2040_v22  ;;  %v2190_v45 = vsel %vm2094_vm14, %v2126_v38, %v3599_v55  ;;  %v6942_v46 = vld [vmem:[#allocation66_spill] sm:$0xff]  ;;  %v6943_v38 = vld [vmem:[#allocation35_spill] sm:$0xff] }
 0x344   : > { %v5737_v41 = vmul.f32 %v2201_v48, %v6935_v47  ;;  %v3577_v44 = vadd.f32 -1.0, %v2040_v22  ;;  %v2055_v1 = vmul.f32 %v5623_v2, %v5436_v39  ;;  %vm2086_vm3 = vcmp.ge.f32.partialorder %v6936_v56, 0.0  ;;  %v6946_v47 = vld [vmem:[#allocation73_spill] sm:$0xff] }
 0x345   : > { %v1808_v23 = vadd.f32 1.0000237, %v1776_v32  ;;  %v1647_v29 = vmul.f32 %v5656_v3, %v1615_v24  ;;  %v2222_v4 = vadd.f32 1.0, %v2190_v45  ;;  %v5744_v31 = vmul.f32 %v2216_v9, %v6937_v34  ;;  %v4071_v14 = vpop.eup %4070  ;;  %v6945_v9 = vld [vmem:[#allocation15_spill] sm:$0xff] }
 0x346   : > { %v2168_v19 = vsel %vm2072_vm15, %v2104_v30, %v3577_v44  ;;  %v2119_v35 = vsub.f32 1.0, %v2055_v1  ;;  %v3592_v15 = vadd.f32 -1.0, %v2055_v1  ;;  %v2039_v22 = vmul.f32 %v6939_v11, %v6938_v7  ;;  %v6947_v34 = vld [vmem:[#allocation27_spill] sm:$0xff]  ;;  %v6951_v11 = vld [vmem:[#allocation36_spill] sm:$0xff] }
 0x347   : > { %vm2070_vm4 = vcmp.ge.f32.partialorder %v6940_v0, 0.0  ;;  %v1840_v39 = vmul.f32 %v5616_v53, %v1808_v23  ;;  %v1679_v2 = vadd.f32 0.09678418, %v1647_v29  ;;  %v5753_v52 = vmul.f32 %v2222_v4, %v6941_v17 }
 0x348   : > { %v2200_v33 = vadd.f32 1.0, %v2168_v19  ;;  %v2061_v28 = vmul.f32 %v4071_v14, %v5557_v60  ;;  %v2183_v12 = vsel %vm2087_vm0, %v2119_v35, %v3592_v15  ;;  %v2103_v8 = vsub.f32 1.0, %v2039_v22  ;;  %v6944_v60 = vld [vmem:[#allocation69_spill] sm:$0xff]  ;;  %v6949_v35 = vld [vmem:[#allocation12_spill] sm:$0xff] }
 0x349   : > { %v3576_v37 = vadd.f32 -1.0, %v2039_v22  ;;  %vm2085_vm5 = vcmp.ge.f32.partialorder %v6942_v46, 0.0  ;;  %v1872_v26 = vadd.f32 -1.2655122, %v1840_v39  ;;  %v1711_v51 = vmul.f32 %v5656_v3, %v1679_v2 }
 0x34a   : > { %v5761_v55 = vmul.f32 %v2200_v33, %v6943_v38  ;;  %v2215_v48 = vadd.f32 1.0, %v2183_v12  ;;  %v2125_v59 = vsub.f32 1.0, %v2061_v28  ;;  %v3598_v32 = vadd.f32 -1.0, %v2061_v28  ;;  %v6952_v33 = vld [vmem:[#allocation87_spill] sm:$0xff]  ;;  %v6954_v38 = vld [vmem:[#allocation52_spill] sm:$0xff] }
 0x34b   : > { %v2167_v24 = vsel %vm2071_vm1, %v2103_v8, %v3576_v37  ;;  %v2054_v5 = vmul.f32 %v5575_v58, %v6944_v60  ;;  %vm2069_vm6 = vcmp.ge.f32.partialorder %v6945_v9, 0.0  ;;  %v1968_v30 = vadd.f32 %v5593_v13, %v1872_v26  ;;  %v6950_v58 = vld [vmem:[#allocation54_spill] sm:$0xff]  ;;  %v6958_v60 = vld [vmem:[#allocation59_spill] sm:$0xff] }
 0x34c   : > { %v1743_v45 = vadd.f32 0.37409195, %v1711_v51  ;;  %v5770_v44 = vmul.f32 %v2215_v48, %v6946_v47  ;;  %v2199_v1 = vadd.f32 1.0, %v2167_v24  ;;  %v2189_v23 = vsel %vm2093_vm2, %v2125_v59, %v3598_v32  ;;  %v6953_v51 = vld [vmem:[#allocation29_spill] sm:$0xff]  ;;  %v6956_v59 = vld [vmem:[#allocation56_spill] sm:$0xff] }
 0x34d   : > { %v2118_v29 = vsub.f32 1.0, %v2054_v5  ;;  %v3591_v4 = vadd.f32 -1.0, %v2054_v5  ;;  %v2038_v19 = vmul.f32 %v6948_v49, %v6947_v34  ;;  %vm2068_vm7 = vcmp.ge.f32.partialorder %v6949_v35, 0.0  ;;  %v6955_v48 = vld [vmem:[#allocation13_spill] sm:$0xff]  ;;  %v6959_v5 = vld [vmem:[#allocation86_spill] sm:$0xff]  ;;  %v6963_v49 = vld [vmem:[#allocation28_spill] sm:$0xff] }
 0x34e   : > { %vm2084_vm8 = vcmp.ge.f32.partialorder %v6950_v58, 0.0  ;;  %v2031_v15 = vmul.f32 1.442695, %v1968_v30  ;;  %v1775_v13 = vmul.f32 %v5656_v3, %v1743_v45  ;;  %v2221_v7 = vadd.f32 1.0, %v2189_v23  ;;  %v6961_v23 = vld [vmem:[#allocation45_spill] sm:$0xff] }
 0x34f   : > { %v5780_v22 = vmul.f32 %v2199_v1, %v6951_v11  ;;  %v2182_v40 = vsel %vm2086_vm3, %v2118_v29, %v3591_v4  ;;  %v2102_v14 = vsub.f32 1.0, %v2038_v19  ;;  %v3575_v39 = vadd.f32 -1.0, %v2038_v19  ;;  %v6960_v1 = vld [vmem:[#allocation22_spill] sm:$0xff]  ;;  %v6962_v4 = vld [vmem:[#allocation44_spill] sm:$0xff] }
 0x350   : > { %v2053_v2 = vmul.f32 %v5602_v50, %v5399_v20  ;;  %4072 = vpow2.f32 %v2031_v15  ;;  %v1807_v17 = vadd.f32 1.0000237, %v1775_v13  ;;  %v5787_v28 = vmul.f32 %v2221_v7, %v6952_v33  ;;  %v6957_v50 = vld [vmem:[#allocation68_spill] sm:$0xff] }
 0x351   : > { %v2214_v12 = vadd.f32 1.0, %v2182_v40  ;;  %v2166_v8 = vsel %vm2070_vm4, %v2102_v14, %v3575_v39  ;;  %v2037_v56 = vmul.f32 %v6954_v38, %v6953_v51  ;;  %vm2067_vm9 = vcmp.ge.f32.partialorder %v6955_v48, 0.0  ;;  %v6964_v14 = vld [vmem:[#allocation9_spill] sm:$0xff]  ;;  %v6969_v38 = vld [vmem:[#allocation50_spill] sm:$0xff] }
 0x352   : > { %v2117_v37 = vsub.f32 1.0, %v2053_v2  ;;  %v3590_v26 = vadd.f32 -1.0, %v2053_v2  ;;  %vm2083_vm10 = vcmp.ge.f32.partialorder %v6956_v59, 0.0  ;;  %v1839_v20 = vmul.f32 %v5656_v3, %v1807_v17  ;;  %v6965_v2 = vld [vmem:[#allocation71_spill] sm:$0xff]  ;;  %v6968_v51 = vld [vmem:[#allocation25_spill] sm:$0xff] }
 0x353   : > { %v5797_v32 = vmul.f32 %v2214_v12, %v6957_v50  ;;  %v2198_v24 = vadd.f32 1.0, %v2166_v8  ;;  %v2052_v30 = vmul.f32 %v6959_v5, %v6958_v60  ;;  %v2101_v45 = vsub.f32 1.0, %v2037_v56  ;;  %v6966_v12 = vld [vmem:[#allocation63_spill] sm:$0xff]  ;;  %v6967_v8 = vld [vmem:[#allocation88_spill] sm:$0xff]  ;;  %v6971_v50 = vld [vmem:[#allocation78_spill] sm:$0xff] }
 0x354   : > { %v2181_v0 = vsel %vm2085_vm5, %v2117_v37, %v3590_v26  ;;  %v3574_v47 = vadd.f32 -1.0, %v2037_v56  ;;  %v2036_v29 = vmul.f32 %v6961_v23, %v6960_v1  ;;  %vm2082_vm11 = vcmp.ge.f32.partialorder %v6962_v4, 0.0  ;;  %v6972_v60 = vld [vmem:[#allocation34_spill] sm:$0xff] }
 0x355   : > { %v1871_v34 = vadd.f32 -1.2655122, %v1839_v20  ;;  %v5807_v19 = vmul.f32 %v2198_v24, %v6963_v49  ;;  %v2213_v15 = vadd.f32 1.0, %v2181_v0  ;;  %v2116_v13 = vsub.f32 1.0, %v2052_v30  ;;  %v6970_v20 = vld [vmem:[#allocation57_spill] sm:$0xff]  ;;  %v6973_v23 = vld [vmem:[#allocation62_spill] sm:$0xff] }
 0x356   : > { %v2165_v7 = vsel %vm2069_vm6, %v2101_v45, %v3574_v47  ;;  %v3589_v11 = vadd.f32 -1.0, %v2052_v30  ;;  %v2100_v40 = vsub.f32 1.0, %v2036_v29  ;;  %v3573_v46 = vadd.f32 -1.0, %v2036_v29  ;;  %v6974_v29 = vld [vmem:[#allocation24_spill] sm:$0xff] }
 0x357   : > { %vm2066_vm12 = vcmp.ge.f32.partialorder %v6964_v14, 0.0  ;;  %v1967_v39 = vadd.f32 %v5598_v27, %v1871_v34  ;;  %v5814_v17 = vmul.f32 %v2213_v15, %v6965_v2  ;;  %v2197_v33 = vadd.f32 1.0, %v2165_v7 }
 0x358   : > { %v2051_v37 = vmul.f32 %v6967_v8, %v6966_v12  ;;  %v2180_v26 = vsel %vm2084_vm8, %v2116_v13, %v3589_v11  ;;  %v2164_v9 = vsel %vm2068_vm7, %v2100_v40, %v3573_v46  ;;  %v2035_v56 = vmul.f32 %v6969_v38, %v6968_v51  ;;  %v6975_v11 = vld [vmem:[#allocation19_spill] sm:$0xff]  ;;  %v6976_v40 = vld [vmem:[#allocation40_spill] sm:$0xff]  ;;  %v6978_v12 = vld [vmem:[#allocation81_spill] sm:$0xff] }
 0x359   : > { %v2050_v24 = vmul.f32 %v6971_v50, %v6970_v20  ;;  %v2029_v27 = vmul.f32 1.442695, %v1967_v39  ;;  %v5827_v5 = vmul.f32 %v2197_v33, %v6972_v60  ;;  %v2212_v30 = vadd.f32 1.0, %v2180_v26  ;;  %v6977_v33 = vld [vmem:[#allocation58_spill] sm:$0xff]  ;;  %v6980_v26 = vld [vmem:[#allocation41_spill] sm:$0xff]  ;;  %v6981_v38 = vld [vmem:[#allocation48_spill] sm:$0xff] }
 0x35a   : > { %v2196_v0 = vadd.f32 1.0, %v2164_v9  ;;  %v2115_v45 = vsub.f32 1.0, %v2051_v37  ;;  %v3588_v47 = vadd.f32 -1.0, %v2051_v37  ;;  %v2099_v1 = vsub.f32 1.0, %v2035_v56  ;;  %v6979_v37 = vld [vmem:[#allocation20_spill] sm:$0xff] }
 0x35b   : > { %v3572_v58 = vadd.f32 -1.0, %v2035_v56  ;;  %4074 = vpow2.f32 %v2029_v27  ;;  %v5830_v35 = vmul.f32 %v2212_v30, %v6973_v23  ;;  %v2114_v49 = vsub.f32 1.0, %v2050_v24  ;;  %v6982_v50 = vld [vmem:[#allocation64_spill] sm:$0xff]  ;;  %v6983_v27 = vld [vmem:[#allocation26_spill] sm:$0xff] }
 0x35c   : > { %v5833_v34 = vmul.f32 %v2196_v0, %v6974_v29  ;;  %v2179_v15 = vsel %vm2083_vm10, %v2115_v45, %v3588_v47  ;;  %v3587_v7 = vadd.f32 -1.0, %v2050_v24  ;;  %v2034_v46 = vmul.f32 %v6976_v40, %v6975_v11  ;;  %v6984_v29 = vld [vmem:[#allocation49_spill] sm:$0xff]  ;;  %v6987_v40 = vld [vmem:[#allocation23_spill] sm:$0xff] }
 0x35d   : > { %v2163_v13 = vsel %vm2067_vm9, %v2099_v1, %v3572_v58  ;;  %v2211_v39 = vadd.f32 1.0, %v2179_v15  ;;  %v2049_v8 = vmul.f32 %v6978_v12, %v6977_v33  ;;  %v2033_v9 = vmul.f32 %v6980_v26, %v6979_v37  ;;  %v4073_v51 = vpop.eup %4072  ;;  %v6985_v15 = vld [vmem:[#allocation11_spill] sm:$0xff]  ;;  %v6989_v37 = vld [vmem:[#allocation10_spill] sm:$0xff] }
 0x35e   : > { %v2195_v2 = vadd.f32 1.0, %v2163_v13  ;;  %vm2081_vm13 = vcmp.ge.f32.partialorder %v6981_v38, 0.0  ;;  %v2178_v59 = vsel %vm2082_vm11, %v2114_v49, %v3587_v7  ;;  %v2098_v48 = vsub.f32 1.0, %v2034_v46  ;;  %v6986_v7 = vld [vmem:[#allocation46_spill] sm:$0xff] }
 0x35f   : > { %v3571_v56 = vadd.f32 -1.0, %v2034_v46  ;;  %v2064_v20 = vmul.f32 %v4073_v51, %v5616_v53  ;;  %v2243_v24 = vmul.f32 %v2211_v39, %v6982_v50  ;;  %v2210_v30 = vadd.f32 1.0, %v2178_v59 }
 0x360   : > { %v2227_v60 = vmul.f32 %v2195_v2, %v6983_v27  ;;  %v2113_v45 = vsub.f32 1.0, %v2049_v8  ;;  %v3586_v47 = vadd.f32 -1.0, %v2049_v8  ;;  %v2097_v1 = vsub.f32 1.0, %v2033_v9  ;;  %v6988_v2 = vld [vmem:[#allocation84_spill] sm:$0xff] }
 0x361   : > { %v2162_v0 = vsel %vm2066_vm12, %v2098_v48, %v3571_v56  ;;  %v2128_v58 = vsub.f32 1.0, %v2064_v20  ;;  %v3601_v23 = vadd.f32 -1.0, %v2064_v20  ;;  %v2242_v4 = vmul.f32 %v2210_v30, %v6984_v29 }
 0x362   : > { %v2194_v49 = vadd.f32 1.0, %v2162_v0  ;;  %vm2065_vm14 = vcmp.ge.f32.partialorder %v6985_v15, 0.0  ;;  %vm2096_vm15 = vcmp.ge.f32.partialorder %v5516_v62, 0.0  ;;  %v2177_v53 = vsel %vm2081_vm13, %v2113_v45, %v3586_v47  ;;  %v4157_v47 = vld [vmem:[%s4397_s26 + $0x8] sm:$0xff]  ;;  %v4158_v15 = vld [vmem:[%s4397_s26 + $0x10] sm:$0xff] }
 0x363   : > { %v3570_v13 = vadd.f32 -1.0, %v2033_v9  ;;  %v1089_v11 = vmul.f32 0.5, %v6986_v7  ;;  %v2192_v14 = vsel %vm2096_vm15, %v2128_v58, %v3601_v23  ;;  %v2209_v39 = vadd.f32 1.0, %v2177_v53 }
 0x364   : > { %v2226_v46 = vmul.f32 %v2194_v49, %v6987_v40  ;;  %v1104_v33 = vmul.f32 0.5, %v6988_v2  ;;  %v2224_v12 = vadd.f32 1.0, %v2192_v14  ;;  %v1073_v26 = vmul.f32 0.5, %v6989_v37 }
 0x365   : > { %v2161_v8 = vsel %vm2065_vm14, %v2097_v1, %v3570_v13  ;;  %v2241_v51 = vmul.f32 %v2209_v39, %v1089_v11  ;;  %vm2095_vm0 = vcmp.ge.f32.partialorder %v5580_v6, 0.0  ;;  %v1103_v27 = vmul.f32 0.5, %v5551_v16  ;;  %v2257_v16 = vld [vmem:[#allocation2] sm:$0xff]  ;;  %v2260_v6 = vld [vmem:[#allocation2 + $0x18] sm:$0xff] }
 0x366   : > { %v2193_v59 = vadd.f32 1.0, %v2161_v8  ;;  %v2256_v48 = vmul.f32 %v2224_v12, %v1104_v33 }
 0x368   : > { %v2225_v62 = vmul.f32 %v2193_v59, %v1073_v26  ;;  %v4075_v56 = vpop.eup %4074  ;;  %3666 = vmatprep.subr.mxu1 %v2256_v48  ;;  %v4160_v26 = vld [vmem:[%s4397_s26 + $0x20] sm:$0xff] }
 0x369   : > { %3667 = vmatpush3.msra.mxu1 %v5628_v54  ;;  %v2063_v9 = vmul.f32 %v4075_v56, %v5656_v3  ;;  %v2259_v54 = vld [vmem:[#allocation2 + $0x10] sm:$0xff]  ;;  %v2264_v3 = vld [vmem:[#allocation2 + $0x38] sm:$0xff] }
 0x36b   : > { %v2127_v38 = vsub.f32 1.0, %v2063_v9  ;;  %v3600_v20 = vadd.f32 -1.0, %v2063_v9 }
 0x36d   : > { %v2191_v50 = vsel %vm2095_vm0, %v2127_v38, %v3600_v20  ;;  %v4161_v38 = vld [vmem:[%s4397_s26 + $0x28] sm:$0xff] }
 0x36e   : > { %v2223_v30 = vadd.f32 1.0, %v2191_v50 }
 0x370   : > { %v2255_v0 = vmul.f32 %v2223_v30, %v1103_v27 }
 0x372   : > { %3668 = vmatprep.subr.mxu1 %v2255_v0 }
 0x373   : > { %3669 = vmatpush3.msra.mxu1 %v5639_v43  ;;  %v2262_v43 = vld [vmem:[#allocation2 + $0x28] sm:$0xff] }
 0x374   : > { %3670 = vmatprep.subr.mxu1 %v5753_v52 }
 0x375   : > { %3671 = vmatpush3.msra.mxu1 %v5643_v21  ;;  %v2261_v21 = vld [vmem:[#allocation2 + $0x20] sm:$0xff] }
 0x376   : > { %3672 = vmatprep.subr.mxu1 %v5787_v28 }
 0x377   : > { %3673 = vmatpush3.msra.mxu1 %v5659_v42  ;;  %v2263_v42 = vld [vmem:[#allocation2 + $0x30] sm:$0xff] }
 0x378   : > { %3674 = vmatprep.subr.mxu1 %v5694_v61  ;;  %v2267_v61 = vld [vmem:[#allocation2 + $0x50] sm:$0xff] }
 0x379   : > { %3675 = vmatpush3.msra.mxu1 %v5671_v57  ;;  %v2266_v57 = vld [vmem:[#allocation2 + $0x48] sm:$0xff] }
 0x37a   : > { %3676 = vmatprep.subr.mxu1 %v5725_v36  ;;  %v2269_v36 = vld [vmem:[#allocation2 + $0x60] sm:$0xff] }
 0x37b   : > { %3677 = vmatpush3.msra.mxu1 %v5686_v25  ;;  %v2265_v25 = vld [vmem:[#allocation2 + $0x40] sm:$0xff] }
 0x37c   : > { %3678 = vmatprep.subr.mxu1 %v5689_v63  ;;  %v2268_v63 = vld [vmem:[#allocation2 + $0x58] sm:$0xff] }
 0x37d   : > { %3679 = vmatpush3.msra.mxu1 %v5707_v10  ;;  %v2270_v10 = vld [vmem:[#allocation2 + $0x68] sm:$0xff] }
 0x37e   : > { %3680 = vmatprep.subr.mxu1 %v5728_v18  ;;  %v2272_v18 = vld [vmem:[#allocation2 + $0x78] sm:$0xff] }
 0x37f   : > { %3681 = vmatpush3.msra.mxu1 %v5737_v41  ;;  %v2271_v41 = vld [vmem:[#allocation2 + $0x70] sm:$0xff] }
 0x380   : > { %3682 = vmatprep.subr.mxu1 %v5744_v31 }
 0x381   : > { %3683 = vmatpush3.msra.mxu1 %v5761_v55 }
 0x382   : > { %3684 = vmatprep.subr.mxu1 %v5770_v44  ;;  %v2284_v44 = vpop.permute.xlu1 %2283 }
 0x383   : > { %3685 = vmatpush3.msra.mxu1 %v5780_v22 }
 0x384   : > { %3686 = vmatprep.subr.mxu1 %v5797_v32 }
 0x385   : > { %3687 = vmatpush3.msra.mxu1 %v5807_v19 }
 0x386   : > { %3688 = vmatprep.subr.mxu1 %v5814_v17  ;;  %v4156_v17 = vld [vmem:[%s4397_s26] sm:$0xff]  ;;  %v2294_v58 = vpop.permute.xlu1 %2293 }
 0x387   : > { %3689 = vmatpush3.msra.mxu1 %v5827_v5 }
 0x388   : > { %3690 = vmatprep.subr.mxu1 %v5830_v35  ;;  %v2289_v35 = vpop.permute.xlu0 %2288 }
 0x389   : > { %3691 = vmatpush3.msra.mxu1 %v5833_v34 }
 0x38a   : > { %3692 = vmatprep.subr.mxu1 %v2243_v24  ;;  %v2304_v2 = vpop.permute.xlu1 %2303 }
 0x38b   : > { %3693 = vmatpush3.msra.mxu1 %v2227_v60 }
 0x38c   : > { %3694 = vmatprep.subr.mxu1 %v2242_v4  ;;  %v2299_v13 = vpop.permute.xlu0 %2298 }
 0x38d   : > { %3695 = vmatpush3.msra.mxu1 %v2226_v46  ;;  %v4159_v46 = vld [vmem:[%s4397_s26 + $0x18] sm:$0xff] }
 0x38e   : > { %3696 = vmatprep.subr.mxu1 %v2241_v51  ;;  %v2314_v50 = vpop.permute.xlu1 %2313 }
 0x38f   : > { %3697 = vmatpush3.msra.mxu1 %v2225_v62 }
 0x390   : > { %2386 = vmatmul.mubr.f32.vlgmr.msra.gmra.mxu1 %v2257_v16  ;;  %v2309_v59 = vpop.permute.xlu0 %2308 }
 0x391   : > { %2390 = vmatprep.mubr.f32.mxu1 %v2260_v6  ;;  %v4162_v6 = vld [vmem:[%s4397_s26 + $0x30] sm:$0xff] }
 0x394   : > { %2391 = vmatmul.mubr.f32.gmra.mxu1 %v2259_v54 }
 0x395   : > { %2395 = vmatprep.mubr.f32.mxu1 %v2262_v43  ;;  %v2319_v43 = vpop.permute.xlu0 %2318 }
 0x398   : > { %2396 = vmatmul.mubr.f32.gmra.mxu1 %v2261_v21 }
 0x399   : > { %2400 = vmatprep.mubr.f32.mxu1 %v2264_v3  ;;  %v4163_v3 = vld [vmem:[%s4397_s26 + $0x38] sm:$0xff]  ;;  %s3625_s26 = sshll.u32 %s4347_s21, 10  ;;  %s4263_s21 = smov [#allocation5]  }
 0x39a   : > { %s6698_s30 = scalar_lea.hbm %s6754_s11, %s3625_s26  ;;  %s4196_s14 = sshll.u32 %s4263_s21, 4  ;;  %s4197_s14 = int_to_ptr.vmem [resolvable:$false] %s4196_s14 }
 0x39b   : > { %s4198_s15 = scalar_lea.vmem %s4197_s14, 2048  ;;  %p4199_p11 = scmp.lt.s32.totalorder %s6693_s22, %s4197_s14 }
 0x39c   : > { %2401 = vmatmul.mubr.f32.gmra.mxu1 %v2263_v42  ;;  %p4200_p12 = scmp.lt.s32.totalorder %s4198_s15, %s4192_s12 }
 0x39d   : > { %2405 = vmatprep.mubr.f32.mxu1 %v2266_v57  ;;  %v2569_v57 = vld [vmem:[%s6750_s7 + $0xf8] sm:$0xff] }
 0x39e   : > { %2582 = vmatprep.subr.mxu1 %v2569_v57  ;;  %v2538_v57 = vld [vmem:[%s6750_s7] sm:$0xff]  ;;  %p4201_p13 = por %p4200_p12, %p4199_p11 }
 0x3a0   : > { %2406 = vmatmul.mubr.f32.gmra.mxu1 %v2265_v25  ;;  %v2568_v25 = vld [vmem:[%s6750_s7 + $0xf0] sm:$0xff]  ;;  %p4202_p0 = pnand %p4201_p13, %p4195_p10 }
 0x3a1   : > { %2410 = vmatprep.mubr.f32.mxu1 %v2268_v63  ;;  %v2567_v63 = vld [vmem:[%s6750_s7 + $0xe8] sm:$0xff]  ;;  %2583 = vmatpush1.msra.mxu1 %v2568_v25 }
 0x3a2   : > { %2584 = vmatprep.subr.mxu1 %v2567_v63 }
 0x3a4   : > { %2411 = vmatmul.mubr.f32.gmra.mxu1 %v2267_v61  ;;  %v2566_v61 = vld [vmem:[%s6750_s7 + $0xe0] sm:$0xff] }
 0x3a5   : > { %2415 = vmatprep.mubr.f32.mxu1 %v2270_v10  ;;  %v2565_v10 = vld [vmem:[%s6750_s7 + $0xd8] sm:$0xff]  ;;  %2585 = vmatpush1.msra.mxu1 %v2566_v61 }
 0x3a6   : > { %2586 = vmatprep.subr.mxu1 %v2565_v10 }
 0x3a8   : > { %2416 = vmatmul.mubr.f32.gmra.mxu1 %v2269_v36  ;;  %v2564_v36 = vld [vmem:[%s6750_s7 + $0xd0] sm:$0xff] }
 0x3a9   : > { %2420 = vmatprep.mubr.f32.mxu1 %v2272_v18  ;;  %v2563_v18 = vld [vmem:[%s6750_s7 + $0xc8] sm:$0xff]  ;;  %2587 = vmatpush1.msra.mxu1 %v2564_v36 }
 0x3aa   : > { %2588 = vmatprep.subr.mxu1 %v2563_v18 }
 0x3ac   : > { %2421 = vmatmul.mubr.f32.gmra.mxu1 %v2271_v41  ;;  %v2562_v41 = vld [vmem:[%s6750_s7 + $0xc0] sm:$0xff] }
 0x3ad   : > { %2589 = vmatpush1.msra.mxu1 %v2562_v41 }
 0x450   : > { %v3698_v31 = vpop.f32.mrf.mxu1 }
 0x452   : > { %v3699_v52 = vpop.f32.mrf.mxu1 }
 0x453   : > { %v3700_v55 = vadd.f32 %v3699_v52, %v3698_v31  ;;  %v2561_v31 = vld [vmem:[%s6750_s7 + $0xb8] sm:$0xff] }
 0x454   : > { %v3701_v22 = vpop.f32.mrf.mxu1  ;;  %2590 = vmatprep.subr.mxu1 %v2561_v31 }
 0x455   : > { %v2388_v28 = vadd.f32 %v3700_v55, %v2284_v44 }
 0x456   : > { %v3702_v32 = vpop.f32.mrf.mxu1 }
 0x457   : > { %v3703_v19 = vadd.f32 %v3702_v32, %v3701_v22  ;;  %v5890_v5 = vadd.f32 %v4156_v17, %v2388_v28 }
 0x458   : > { %v3704_v34 = vpop.f32.mrf.mxu1 }
 0x459   : > { %v2393_v24 = vadd.f32 %v3703_v19, %v2289_v35  ;;  %2434 = vadd.xlane.f32.xlu1 %v5890_v5 }
 0x45a   : > { %v3705_v60 = vpop.f32.mrf.mxu1 }
 0x45b   : > { %v3706_v45 = vadd.f32 %v3705_v60, %v3704_v34  ;;  %v5894_v1 = vadd.f32 %v4157_v47, %v2393_v24 }
 0x45c   : > { %v3707_v23 = vpop.f32.mrf.mxu1 }
 0x45d   : > { %v2398_v29 = vadd.f32 %v3706_v45, %v2294_v58  ;;  %2436 = vadd.xlane.f32.xlu0 %v5894_v1 }
 0x45e   : > { %v3708_v4 = vpop.f32.mrf.mxu1 }
 0x45f   : > { %v3709_v49 = vadd.f32 %v3708_v4, %v3707_v23  ;;  %v5898_v53 = vadd.f32 %v4158_v15, %v2398_v29 }
 0x460   : > { %v3710_v7 = vpop.f32.mrf.mxu1 }
 0x461   : > { %v2403_v11 = vadd.f32 %v3709_v49, %v2299_v13  ;;  %2438 = vadd.xlane.f32.xlu0 %v5898_v53 }
 0x462   : > { %v3711_v14 = vpop.f32.mrf.mxu1 }
 0x463   : > { %v3712_v40 = vadd.f32 %v3711_v14, %v3710_v7  ;;  %v5902_v39 = vadd.f32 %v4159_v46, %v2403_v11 }
 0x464   : > { %v3713_v33 = vpop.f32.mrf.mxu1 }
 0x465   : > { %v2408_v12 = vadd.f32 %v3712_v40, %v2304_v2  ;;  %2440 = vadd.xlane.f32.xlu1 %v5902_v39 }
 0x466   : > { %v3714_v8 = vpop.f32.mrf.mxu1 }
 0x467   : > { %v3715_v37 = vadd.f32 %v3714_v8, %v3713_v33  ;;  %v2430_v51 = vadd.f32 %v4160_v26, %v2408_v12  ;;  %v2560_v12 = vld [vmem:[%s6750_s7 + $0xb0] sm:$0xff]  ;;  %v2559_v8 = vld [vmem:[%s6750_s7 + $0xa8] sm:$0xff]  ;;  %v2557_v26 = vld [vmem:[%s6750_s7 + $0x98] sm:$0xff] }
 0x468   : > { %v3716_v48 = vpop.f32.mrf.mxu1  ;;  %2591 = vmatpush1.msra.mxu1 %v2560_v12 }
 0x469   : > { %v2413_v62 = vadd.f32 %v3715_v37, %v2309_v59  ;;  %2442 = vadd.xlane.f32.xlu0 %v2430_v51  ;;  %v2558_v37 = vld [vmem:[%s6750_s7 + $0xa0] sm:$0xff]  ;;  %2592 = vmatprep.subr.mxu1 %v2559_v8  ;;  %v2555_v59 = vld [vmem:[%s6750_s7 + $0x88] sm:$0xff] }
 0x46a   : > { %v3717_v56 = vpop.f32.mrf.mxu1  ;;  %2593 = vmatpush1.msra.mxu1 %v2558_v37 }
 0x46b   : > { %v3718_v9 = vadd.f32 %v3717_v56, %v3716_v48  ;;  %v2431_v20 = vadd.f32 %v4161_v38, %v2413_v62  ;;  %2594 = vmatprep.subr.mxu1 %v2557_v26  ;;  %v2554_v48 = vld [vmem:[%s6750_s7 + $0x80] sm:$0xff]  ;;  %v2553_v62 = vld [vmem:[%s6750_s7 + $0x78] sm:$0xff]  ;;  %v2552_v56 = vld [vmem:[%s6750_s7 + $0x70] sm:$0xff]  ;;  %v4262_v38 = vmov 0.0  }
 0x46c   : > { %v3719_v27 = vpop.f32.mrf.mxu1  ;;  %2646 = vmatprep.mubr.f32.mxu1 %v4262_v38 }
 0x46d   : > { %v2418_v30 = vadd.f32 %v3718_v9, %v2314_v50  ;;  %2444 = vadd.xlane.f32.xlu1 %v2431_v20  ;;  %v2551_v9 = vld [vmem:[%s6750_s7 + $0x68] sm:$0xff]  ;;  %v2549_v50 = vld [vmem:[%s6750_s7 + $0x58] sm:$0xff] }
 0x46e   : > { %v3720_v0 = vpop.f32.mrf.mxu1 }
 0x46f   : > { %v3721_v16 = vadd.f32 %v3720_v0, %v3719_v27  ;;  %v2432_v54 = vadd.f32 %v4162_v6, %v2418_v30  ;;  %v2548_v27 = vld [vmem:[%s6750_s7 + $0x50] sm:$0xff]  ;;  %v2547_v30 = vld [vmem:[%s6750_s7 + $0x48] sm:$0xff]  ;;  %v2546_v0 = vld [vmem:[%s6750_s7 + $0x40] sm:$0xff] }
 0x470   : > { %v2544_v6 = vld [vmem:[%s6750_s7 + $0x30] sm:$0xff] }
 0x471   : > { %v2423_v21 = vadd.f32 %v3721_v16, %v2319_v43  ;;  %2446 = vadd.xlane.f32.xlu0 %v2432_v54  ;;  %v2545_v16 = vld [vmem:[%s6750_s7 + $0x38] sm:$0xff]  ;;  %v2542_v43 = vld [vmem:[%s6750_s7 + $0x20] sm:$0xff] }
 0x473   : > { %v2433_v42 = vadd.f32 %v4163_v3, %v2423_v21  ;;  %v2541_v21 = vld [vmem:[%s6750_s7 + $0x18] sm:$0xff]  ;;  %v2540_v3 = vld [vmem:[%s6750_s7 + $0x10] sm:$0xff] }
 0x475   : > { %2448 = vadd.xlane.f32.xlu1 %v2433_v42 }
 0x4e2   : > { %v2435_v52 = vpop.xlane.xlu1 %2434 }
 0x4e3   : > { %v2450_v55 = vmul.f32 0.0078125, %v2435_v52 }
 0x4e5   : > { %v5937_v44 = vsub.f32 %v5890_v5, %v2450_v55 }
 0x4e6   : > { %v2437_v22 = vpop.xlane.xlu0 %2436 }
 0x4e7   : > { %v2451_v28 = vmul.f32 0.0078125, %v2437_v22  ;;  %v2466_v32 = vmul.f32 %v5937_v44, %v5937_v44 }
 0x4e9   : > { %v5942_v19 = vsub.f32 %v5894_v1, %v2451_v28  ;;  %2474 = vadd.xlane.f32.xlu0 %v2466_v32 }
 0x4ea   : > { %v2439_v17 = vpop.xlane.xlu0 %2438 }
 0x4eb   : > { %v2452_v35 = vmul.f32 0.0078125, %v2439_v17  ;;  %v2467_v34 = vmul.f32 %v5942_v19, %v5942_v19 }
 0x4ed   : > { %v5947_v24 = vsub.f32 %v5898_v53, %v2452_v35  ;;  %2476 = vadd.xlane.f32.xlu1 %v2467_v34 }
 0x4ee   : > { %v2441_v5 = vpop.xlane.xlu1 %2440 }
 0x4ef   : > { %v2453_v60 = vmul.f32 0.0078125, %v2441_v5  ;;  %v2468_v45 = vmul.f32 %v5947_v24, %v5947_v24 }
 0x4f1   : > { %v5952_v47 = vsub.f32 %v5902_v39, %v2453_v60  ;;  %2478 = vadd.xlane.f32.xlu0 %v2468_v45 }
 0x4f2   : > { %v2443_v1 = vpop.xlane.xlu0 %2442 }
 0x4f3   : > { %v2454_v58 = vmul.f32 0.0078125, %v2443_v1  ;;  %v2469_v23 = vmul.f32 %v5952_v47, %v5952_v47  ;;  %v4164_v1 = vld [vmem:[%s6744_s1] ss:$0 sm:$0xff] }
 0x4f5   : > { %v5956_v29 = vsub.f32 %v2430_v51, %v2454_v58  ;;  %2480 = vadd.xlane.f32.xlu1 %v2469_v23  ;;  %v2556_v51 = vld [vmem:[%s6750_s7 + $0x90] sm:$0xff] }
 0x4f6   : > { %v2445_v4 = vpop.xlane.xlu1 %2444  ;;  %2595 = vmatpush1.msra.mxu1 %v2556_v51 }
 0x4f7   : > { %v2455_v49 = vmul.f32 0.0078125, %v2445_v4  ;;  %v2470_v15 = vmul.f32 %v5956_v29, %v5956_v29  ;;  %2596 = vmatprep.subr.mxu1 %v2555_v59 }
 0x4f8   : > { %2597 = vmatpush1.msra.mxu1 %v2554_v48 }
 0x4f9   : > { %v5960_v53 = vsub.f32 %v2431_v20, %v2455_v49  ;;  %2482 = vadd.xlane.f32.xlu0 %v2470_v15  ;;  %2598 = vmatprep.subr.mxu1 %v2553_v62  ;;  %v2550_v20 = vld [vmem:[%s6750_s7 + $0x60] sm:$0xff] }
 0x4fa   : > { %v2447_v13 = vpop.xlane.xlu0 %2446  ;;  %2599 = vmatpush1.msra.mxu1 %v2552_v56  ;;  %v4165_v49 = vld [vmem:[%s6745_s2] ss:$0 sm:$0xff] }
 0x4fb   : > { %v2456_v7 = vmul.f32 0.0078125, %v2447_v13  ;;  %v2471_v11 = vmul.f32 %v5960_v53, %v5960_v53  ;;  %2600 = vmatprep.subr.mxu1 %v2551_v9 }
 0x4fc   : > { %2601 = vmatpush1.msra.mxu1 %v2550_v20 }
 0x4fd   : > { %v5964_v14 = vsub.f32 %v2432_v54, %v2456_v7  ;;  %2484 = vadd.xlane.f32.xlu1 %v2471_v11  ;;  %2602 = vmatprep.subr.mxu1 %v2549_v50  ;;  %v2543_v54 = vld [vmem:[%s6750_s7 + $0x28] sm:$0xff] }
 0x4fe   : > { %v2449_v40 = vpop.xlane.xlu1 %2448  ;;  %2603 = vmatpush1.msra.mxu1 %v2548_v27 }
 0x4ff   : > { %v2457_v46 = vmul.f32 0.0078125, %v2449_v40  ;;  %v2472_v39 = vmul.f32 %v5964_v14, %v5964_v14  ;;  %2604 = vmatprep.subr.mxu1 %v2547_v30 }
 0x500   : > { %2605 = vmatpush1.msra.mxu1 %v2546_v0 }
 0x501   : > { %v5968_v2 = vsub.f32 %v2433_v42, %v2457_v46  ;;  %2486 = vadd.xlane.f32.xlu0 %v2472_v39  ;;  %2606 = vmatprep.subr.mxu1 %v2545_v16  ;;  %v2539_v42 = vld [vmem:[%s6750_s7 + $0x8] sm:$0xff] }
 0x502   : > { %2607 = vmatpush1.msra.mxu1 %v2544_v6 }
 0x503   : > { %v2473_v33 = vmul.f32 %v5968_v2, %v5968_v2  ;;  %2608 = vmatprep.subr.mxu1 %v2543_v54 }
 0x504   : > { %2609 = vmatpush1.msra.mxu1 %v2542_v43 }
 0x505   : > { %2488 = vadd.xlane.f32.xlu1 %v2473_v33  ;;  %2610 = vmatprep.subr.mxu1 %v2541_v21 }
 0x506   : > { %2611 = vmatpush1.msra.mxu1 %v2540_v3  ;;  %v2572_v3 = vlaneseq }
 0x507   : > { %2612 = vmatprep.subr.mxu1 %v2539_v42 }
 0x508   : > { %2613 = vmatpush1.msra.mxu1 %v2538_v57  ;;  %v2573_v42 = vshrl.u32 %v2572_v3, 7 }
 0x50a   : > { %v2574_v57 = vsub.s32 0, %v2573_v42 }
 0x572   : > { %v2475_v25 = vpop.xlane.xlu0 %2474 }
 0x573   : > { %v2490_v63 = vmul.f32 0.0078125, %v2475_v25  ;;  %v2578_v25 = vsub.s32 1, %v2573_v42 }
 0x575   : > { %v2498_v61 = vadd.f32 1e-05, %v2490_v63  ;;  %v3318_v63 = vld [vmem:[%s6752_s9 + $0xf8] sm:$0xff] }
 0x576   : > { %v2477_v10 = vpop.xlane.xlu1 %2476  ;;  %3722 = vmatprep.subr.mxu0 %v3318_v63  ;;  %3842 = vmatprep.subr.mxu1 %v3318_v63  ;;  %v3291_v63 = vld [vmem:[%s6752_s9 + $0x20] sm:$0xff] }
 0x577   : > { %4076 = vrsqrt.f32 %v2498_v61  ;;  %v2491_v36 = vmul.f32 0.0078125, %v2477_v10  ;;  %v3317_v61 = vld [vmem:[%s6752_s9 + $0xf0] sm:$0xff] }
 0x578   : > { %v3301_v10 = vld [vmem:[%s6752_s9 + $0x70] sm:$0xff] }
 0x579   : > { %v2499_v18 = vadd.f32 1e-05, %v2491_v36 }
 0x57a   : > { %v2479_v41 = vpop.xlane.xlu0 %2478 }
 0x57b   : > { %4078 = vrsqrt.f32 %v2499_v18  ;;  %v2492_v31 = vmul.f32 0.0078125, %v2479_v41  ;;  %v3316_v18 = vld [vmem:[%s6752_s9 + $0xe8] sm:$0xff] }
 0x57d   : > { %v2500_v52 = vadd.f32 1e-05, %v2492_v31  ;;  %v3300_v31 = vld [vmem:[%s6752_s9 + $0x68] sm:$0xff] }
 0x57e   : > { %v2481_v55 = vpop.xlane.xlu1 %2480 }
 0x57f   : > { %4080 = vrsqrt.f32 %v2500_v52  ;;  %v2493_v22 = vmul.f32 0.0078125, %v2481_v55  ;;  %v3315_v55 = vld [vmem:[%s6752_s9 + $0xe0] sm:$0xff] }
 0x581   : > { %v2501_v28 = vadd.f32 1e-05, %v2493_v22 }
 0x582   : > { %v2483_v32 = vpop.xlane.xlu0 %2482 }
 0x583   : > { %4082 = vrsqrt.f32 %v2501_v28  ;;  %v2494_v17 = vmul.f32 0.0078125, %v2483_v32  ;;  %v3299_v28 = vld [vmem:[%s6752_s9 + $0x60] sm:$0xff] }
 0x584   : > { %v4077_v35 = vpop.eup %4076 }
 0x585   : > { %v2514_v34 = vmul.f32 %v4077_v35, %v5937_v44  ;;  %v2502_v5 = vadd.f32 1e-05, %v2494_v17  ;;  %v3314_v35 = vld [vmem:[%s6752_s9 + $0xd8] sm:$0xff] }
 0x586   : > { %v2485_v60 = vpop.xlane.xlu1 %2484 }
 0x587   : > { %4084 = vrsqrt.f32 %v2502_v5  ;;  %v2495_v45 = vmul.f32 0.0078125, %v2485_v60  ;;  %v2522_v58 = vmul.f32 %v4164_v1, %v2514_v34  ;;  %v3298_v5 = vld [vmem:[%s6752_s9 + $0x58] sm:$0xff] }
 0x588   : > { %v4079_v23 = vpop.eup %4078 }
 0x589   : > { %v2503_v4 = vadd.f32 1e-05, %v2495_v45  ;;  %v2530_v15 = vadd.f32 %v4165_v49, %v2522_v58  ;;  %v2515_v13 = vmul.f32 %v4079_v23, %v5942_v19  ;;  %v3313_v23 = vld [vmem:[%s6752_s9 + $0xd0] sm:$0xff] }
 0x58a   : > { %v2487_v7 = vpop.xlane.xlu0 %2486 }
 0x58b   : > { %4086 = vrsqrt.f32 %v2503_v4  ;;  %v2496_v44 = vmul.f32 0.0078125, %v2487_v7  ;;  %2647 = vmatmul.mubr.f32.vlgmr.msra.gmra.mxu1 %v2530_v15  ;;  %v2523_v11 = vmul.f32 %v4164_v1, %v2515_v13  ;;  %v3297_v4 = vld [vmem:[%s6752_s9 + $0x50] sm:$0xff]  ;;  %v3312_v13 = vld [vmem:[%s6752_s9 + $0xc8] sm:$0xff] }
 0x58c   : > { %v4081_v40 = vpop.eup %4080  ;;  %2652 = vmatprep.mubr.f32.mxu1 %v4262_v38 }
 0x58d   : > { %v2504_v46 = vadd.f32 1e-05, %v2496_v44  ;;  %v2531_v39 = vadd.f32 %v4165_v49, %v2523_v11  ;;  %v2516_v33 = vmul.f32 %v4081_v40, %v5947_v24  ;;  %v3296_v40 = vld [vmem:[%s6752_s9 + $0x48] sm:$0xff] }
 0x58e   : > { %v2489_v12 = vpop.xlane.xlu1 %2488 }
 0x58f   : > { %4088 = vrsqrt.f32 %v2504_v46  ;;  %v2497_v8 = vmul.f32 0.0078125, %v2489_v12  ;;  %2653 = vmatmul.mubr.f32.gmra.mxu1 %v2531_v39  ;;  %v2524_v37 = vmul.f32 %v4164_v1, %v2516_v33  ;;  %v3311_v33 = vld [vmem:[%s6752_s9 + $0xc0] sm:$0xff] }
 0x590   : > { %v4083_v26 = vpop.eup %4082  ;;  %2658 = vmatprep.mubr.f32.mxu1 %v4262_v38 }
 0x591   : > { %v2505_v19 = vadd.f32 1e-05, %v2497_v8  ;;  %v2532_v51 = vadd.f32 %v4165_v49, %v2524_v37  ;;  %v2517_v59 = vmul.f32 %v4083_v26, %v5952_v47 }
 0x593   : > { %4090 = vrsqrt.f32 %v2505_v19  ;;  %2659 = vmatmul.mubr.f32.gmra.mxu1 %v2532_v51  ;;  %v2525_v48 = vmul.f32 %v4164_v1, %v2517_v59  ;;  %v3295_v51 = vld [vmem:[%s6752_s9 + $0x40] sm:$0xff]  ;;  %v3310_v59 = vld [vmem:[%s6752_s9 + $0xb8] sm:$0xff] }
 0x594   : > { %v4085_v62 = vpop.eup %4084  ;;  %2664 = vmatprep.mubr.f32.mxu1 %v4262_v38 }
 0x595   : > { %v2533_v56 = vadd.f32 %v4165_v49, %v2525_v48  ;;  %v2518_v24 = vmul.f32 %v4085_v62, %v5956_v29 }
 0x597   : > { %2665 = vmatmul.mubr.f32.gmra.mxu1 %v2533_v56  ;;  %v2526_v9 = vmul.f32 %v4164_v1, %v2518_v24  ;;  %v3294_v24 = vld [vmem:[%s6752_s9 + $0x38] sm:$0xff] }
 0x598   : > { %v4087_v20 = vpop.eup %4086  ;;  %2670 = vmatprep.mubr.f32.mxu1 %v4262_v38 }
 0x599   : > { %v2534_v50 = vadd.f32 %v4165_v49, %v2526_v9  ;;  %v2519_v27 = vmul.f32 %v4087_v20, %v5960_v53 }
 0x59b   : > { %2671 = vmatmul.mubr.f32.gmra.mxu1 %v2534_v50  ;;  %v2527_v30 = vmul.f32 %v4164_v1, %v2519_v27  ;;  %v3309_v50 = vld [vmem:[%s6752_s9 + $0xb0] sm:$0xff] }
 0x59c   : > { %v4089_v47 = vpop.eup %4088  ;;  %2676 = vmatprep.mubr.f32.mxu1 %v4262_v38 }
 0x59d   : > { %v2535_v0 = vadd.f32 %v4165_v49, %v2527_v30  ;;  %v2520_v16 = vmul.f32 %v4089_v47, %v5964_v14  ;;  %v2570_v14 = vld [vmem:[%s6751_s8] sm:$0x3] }
 0x59e   : > { %v6080_v36 = vrot.slane %v2570_v14, %v2578_v25 }
 0x59f   : > { %2677 = vmatmul.mubr.f32.gmra.mxu1 %v2535_v0  ;;  %v2528_v6 = vmul.f32 %v4164_v1, %v2520_v16  ;;  %v3293_v0 = vld [vmem:[%s6752_s9 + $0x30] sm:$0xff] }
 0x5a0   : > { %v4091_v54 = vpop.eup %4090  ;;  %2682 = vmatprep.mubr.f32.mxu1 %v4262_v38 }
 0x5a1   : > { %v2536_v29 = vadd.f32 %v4165_v49, %v2528_v6  ;;  %v2521_v43 = vmul.f32 %v4091_v54, %v5968_v2  ;;  %v3302_v2 = vld [vmem:[%s6752_s9 + $0x78] sm:$0xff] }
 0x5a2   : > { %3723 = vmatpush3.msra.mxu0 %v3302_v2  ;;  %3858 = vmatpush3.msra.mxu1 %v3302_v2 }
 0x5a3   : > { %2683 = vmatmul.mubr.f32.gmra.mxu1 %v2536_v29  ;;  %v2529_v21 = vmul.f32 %v4164_v1, %v2521_v43  ;;  %3724 = vmatprep.subr.mxu0 %v3317_v61 }
 0x5a4   : > { %2688 = vmatprep.mubr.f32.mxu1 %v4262_v38  ;;  %v6072_v38 = vrot.slane %v2570_v14, %v2574_v57  ;;  %3843 = vmatprep.subr.mxu1 %v3317_v61  ;;  %v3307_v57 = vld [vmem:[%s6752_s9 + $0xa0] sm:$0xff] }
 0x5a5   : > { %v2537_v53 = vadd.f32 %v4165_v49, %v2529_v21  ;;  %3725 = vmatpush3.msra.mxu0 %v3301_v10  ;;  %3859 = vmatpush3.msra.mxu1 %v3301_v10  ;;  %v3308_v21 = vld [vmem:[%s6752_s9 + $0xa8] sm:$0xff]  ;;  %v3306_v10 = vld [vmem:[%s6752_s9 + $0x98] sm:$0xff] }
 0x5a6   : > { %3726 = vmatprep.subr.mxu0 %v3316_v18  ;;  %3844 = vmatprep.subr.mxu1 %v3316_v18 }
 0x5a7   : > { %2689 = vmatmul.mubr.f32.gmra.mxu1 %v2537_v53  ;;  %3727 = vmatpush3.msra.mxu0 %v3300_v31  ;;  %v3292_v53 = vld [vmem:[%s6752_s9 + $0x28] sm:$0xff] }
 0x5a8   : > { %3860 = vmatpush3.msra.mxu1 %v3300_v31  ;;  %3728 = vmatprep.subr.mxu0 %v3315_v55 }
 0x5a9   : > { %3845 = vmatprep.subr.mxu1 %v3315_v55  ;;  %3729 = vmatpush3.msra.mxu0 %v3299_v28 }
 0x5aa   : > { %3861 = vmatpush3.msra.mxu1 %v3299_v28  ;;  %3730 = vmatprep.subr.mxu0 %v3314_v35  ;;  %v3290_v28 = vld [vmem:[%s6752_s9 + $0x18] sm:$0xff] }
 0x5ab   : > { %3846 = vmatprep.subr.mxu1 %v3314_v35  ;;  %3731 = vmatpush3.msra.mxu0 %v3298_v5  ;;  %v3305_v35 = vld [vmem:[%s6752_s9 + $0x90] sm:$0xff] }
 0x5ac   : > { %3862 = vmatpush3.msra.mxu1 %v3298_v5  ;;  %3732 = vmatprep.subr.mxu0 %v3313_v23 }
 0x5ad   : > { %3847 = vmatprep.subr.mxu1 %v3313_v23  ;;  %3733 = vmatpush3.msra.mxu0 %v3297_v4 }
 0x5ae   : > { %3863 = vmatpush3.msra.mxu1 %v3297_v4  ;;  %3734 = vmatprep.subr.mxu0 %v3312_v13 }
 0x5af   : > { %3848 = vmatprep.subr.mxu1 %v3312_v13  ;;  %3735 = vmatpush3.msra.mxu0 %v3296_v40  ;;  %v3304_v13 = vld [vmem:[%s6752_s9 + $0x88] sm:$0xff] }
 0x5b0   : > { %3864 = vmatpush3.msra.mxu1 %v3296_v40  ;;  %3736 = vmatprep.subr.mxu0 %v3311_v33 }
 0x5b1   : > { %3849 = vmatprep.subr.mxu1 %v3311_v33  ;;  %3737 = vmatpush3.msra.mxu0 %v3295_v51 }
 0x5b2   : > { %3865 = vmatpush3.msra.mxu1 %v3295_v51  ;;  %3738 = vmatprep.subr.mxu0 %v3310_v59 }
 0x5b3   : > { %3850 = vmatprep.subr.mxu1 %v3310_v59  ;;  %3739 = vmatpush3.msra.mxu0 %v3294_v24 }
 0x5b4   : > { %3866 = vmatpush3.msra.mxu1 %v3294_v24  ;;  %3740 = vmatprep.subr.mxu0 %v3309_v50 }
 0x5b5   : > { %3851 = vmatprep.subr.mxu1 %v3309_v50  ;;  %3741 = vmatpush3.msra.mxu0 %v3293_v0 }
 0x5b6   : > { %3867 = vmatpush3.msra.mxu1 %v3293_v0  ;;  %3742 = vmatprep.subr.mxu0 %v3308_v21 }
 0x5b7   : > { %3852 = vmatprep.subr.mxu1 %v3308_v21  ;;  %3743 = vmatpush3.msra.mxu0 %v3292_v53 }
 0x5b8   : > { %3868 = vmatpush3.msra.mxu1 %v3292_v53  ;;  %3744 = vmatprep.subr.mxu0 %v3307_v57 }
 0x5b9   : > { %3853 = vmatprep.subr.mxu1 %v3307_v57  ;;  %3745 = vmatpush3.msra.mxu0 %v3291_v63 }
 0x5ba   : > { %3869 = vmatpush3.msra.mxu1 %v3291_v63  ;;  %3746 = vmatprep.subr.mxu0 %v3306_v10 }
 0x5bb   : > { %3854 = vmatprep.subr.mxu1 %v3306_v10  ;;  %3747 = vmatpush3.msra.mxu0 %v3290_v28 }
 0x5bc   : > { %3870 = vmatpush3.msra.mxu1 %v3290_v28  ;;  %3748 = vmatprep.subr.mxu0 %v3305_v35 }
 0x5bd   : > { %3855 = vmatprep.subr.mxu1 %v3305_v35 }
 0x64b   : > { %v2648_v41 = vpop.f32.mrf.mxu1 }
 0x64c   : > { %v6089_v52 = vadd.f32 %v2648_v41, %v6072_v38 }
 0x64d   : > { %v2650_v22 = vpop.f32.mrf.mxu1 }
 0x64e   : > { %v6098_v32 = vmul.f32 0.70710677, %v6089_v52  ;;  %v6101_v17 = vadd.f32 %v2650_v22, %v6080_v36  ;;  %v6249_v40 = vmul.f32 0.5, %v6089_v52 }
 0x64f   : > { %v2654_v34 = vpop.f32.mrf.mxu1 }
 0x650   : > { %v6110_v60 = vand.u32 2147483647, %v6098_v32  ;;  %v6113_v45 = vmul.f32 0.70710677, %v6101_v17  ;;  %v6116_v1 = vadd.f32 %v2654_v34, %v6072_v38  ;;  %vm3191_vm1 = vcmp.ge.f32.partialorder %v6098_v32, 0.0 }
 0x651   : > { %v2656_v58 = vpop.f32.mrf.mxu1 }
 0x652   : > { %v2743_v49 = vmul.f32 0.5, %v6110_v60  ;;  %v6126_v15 = vand.u32 2147483647, %v6113_v45  ;;  %v6132_v7 = vmul.f32 0.70710677, %v6116_v1  ;;  %v6135_v44 = vadd.f32 %v2656_v58, %v6080_v36  ;;  %v3289_v58 = vld [vmem:[%s6752_s9 + $0x10] sm:$0xff] }
 0x653   : > { %v2660_v11 = vpop.f32.mrf.mxu1  ;;  %v3095_v23 = vsub.f32 0.0, %v6110_v60  ;;  %3749 = vmatpush3.msra.mxu0 %v3289_v58  ;;  %3871 = vmatpush3.msra.mxu1 %v3289_v58  ;;  %v6261_v59 = vmul.f32 0.5, %v6116_v1  ;;  %v3303_v1 = vld [vmem:[%s6752_s9 + $0x80] sm:$0xff]  ;;  %vm3192_vm2 = vcmp.ge.f32.partialorder %v6113_v45, 0.0 }
 0x654   : > { %v2759_v46 = vadd.f32 1.0, %v2743_v49  ;;  %v2744_v39 = vmul.f32 0.5, %v6126_v15  ;;  %v6145_v12 = vand.u32 2147483647, %v6132_v7  ;;  %v6148_v8 = vmul.f32 0.70710677, %v6135_v44  ;;  %3750 = vmatprep.subr.mxu0 %v3304_v13  ;;  %3856 = vmatprep.subr.mxu1 %v3304_v13 }
 0x655   : > { %v2662_v37 = vpop.f32.mrf.mxu1  ;;  %v6151_v19 = vadd.f32 %v2660_v11, %v6072_v38  ;;  %v3096_v51 = vsub.f32 0.0, %v6126_v15  ;;  %vm3193_vm4 = vcmp.ge.f32.partialorder %v6132_v7, 0.0 }
 0x656   : > { %4092 = vrcp.f32 %v2759_v46  ;;  %v2760_v26 = vadd.f32 1.0, %v2744_v39  ;;  %v2745_v48 = vmul.f32 0.5, %v6145_v12  ;;  %v6161_v62 = vand.u32 2147483647, %v6148_v8 }
 0x657   : > { %v2666_v56 = vpop.f32.mrf.mxu1  ;;  %v6167_v9 = vmul.f32 0.70710677, %v6151_v19  ;;  %v6170_v20 = vadd.f32 %v2662_v37, %v6080_v36  ;;  %v6252_v46 = vmul.f32 0.5, %v6101_v17  ;;  %v3288_v37 = vld [vmem:[%s6752_s9 + $0x8] sm:$0xff]  ;;  %v6304_v10 = vmul.f32 0.5, %v6151_v19 }
 0x658   : > { %4094 = vrcp.f32 %v2760_v26  ;;  %v2761_v27 = vadd.f32 1.0, %v2745_v48  ;;  %v2746_v30 = vmul.f32 0.5, %v6161_v62  ;;  %v6186_v29 = vadd.f32 %v2666_v56, %v6072_v38  ;;  %3751 = vmatpush3.msra.mxu0 %v3288_v37  ;;  %3872 = vmatpush3.msra.mxu1 %v3288_v37 }
 0x659   : > { %v2668_v47 = vpop.f32.mrf.mxu1  ;;  %v6180_v16 = vand.u32 2147483647, %v6167_v9  ;;  %v6183_v6 = vmul.f32 0.70710677, %v6170_v20  ;;  %v3097_v56 = vsub.f32 0.0, %v6145_v12  ;;  %3752 = vmatprep.subr.mxu0 %v3303_v1  ;;  %3857 = vmatprep.subr.mxu1 %v3303_v1  ;;  %v3098_v63 = vsub.f32 0.0, %v6161_v62 }
 0x65a   : > { %4096 = vrcp.f32 %v2761_v27  ;;  %v2762_v54 = vadd.f32 1.0, %v2746_v30  ;;  %v6202_v14 = vmul.f32 0.70710677, %v6186_v29  ;;  %v6205_v25 = vadd.f32 %v2668_v47, %v6080_v36  ;;  %v3287_v27 = vld [vmem:[%s6752_s9] sm:$0xff]  ;;  %6991 = vst [vmem:[#allocation47_spill] sm:$0xff] %v6304_v10 }
 0x65b   : > { %v2672_v43 = vpop.f32.mrf.mxu1  ;;  %v2747_v3 = vmul.f32 0.5, %v6180_v16  ;;  %v6196_v42 = vand.u32 2147483647, %v6183_v6  ;;  %v6279_v47 = vmul.f32 %v3095_v23, %v6110_v60  ;;  %3753 = vmatpush3.msra.mxu0 %v3287_v27  ;;  %3873 = vmatpush3.msra.mxu1 %v3287_v27  ;;  %v3099_v23 = vsub.f32 0.0, %v6180_v16 }
 0x65c   : > { %4098 = vrcp.f32 %v2762_v54  ;;  %v6215_v18 = vand.u32 2147483647, %v6202_v14  ;;  %v6218_v41 = vmul.f32 0.70710677, %v6205_v25  ;;  %v6221_v22 = vadd.f32 %v2672_v43, %v6072_v38 }
 0x65d   : > { %v2763_v2 = vadd.f32 1.0, %v2747_v3  ;;  %v2748_v61 = vmul.f32 0.5, %v6196_v42  ;;  %v2674_v31 = vpop.f32.mrf.mxu1  ;;  %v6283_v54 = vmul.f32 0.5, %v6135_v44  ;;  %v6296_v44 = vmul.f32 %v3096_v51, %v6126_v15 }
 0x65e   : > { %v2749_v34 = vmul.f32 0.5, %v6215_v18  ;;  %v6231_v5 = vand.u32 2147483647, %v6218_v41  ;;  %v6238_v4 = vmul.f32 0.70710677, %v6221_v22  ;;  %v6241_v49 = vadd.f32 %v2674_v31, %v6080_v36 }
 0x65f   : > { %4100 = vrcp.f32 %v2763_v2  ;;  %v2764_v55 = vadd.f32 1.0, %v2748_v61  ;;  %v2678_v17 = vpop.f32.mrf.mxu1  ;;  %v6301_v61 = vmul.f32 %v3097_v56, %v6145_v12  ;;  %v6311_v15 = vmul.f32 0.5, %v6170_v20 }
 0x660   : > { %6990 = vst [vmem:[#allocation43_spill] sm:$0xff] %v6238_v4  ;;  %v2765_v39 = vadd.f32 1.0, %v2749_v34  ;;  %v2750_v33 = vmul.f32 0.5, %v6231_v5  ;;  %v6264_v52 = vand.u32 2147483647, %v6238_v4  ;;  %v6290_v53 = vadd.f32 %v2678_v17, %v6072_v38 }
 0x661   : > { %4102 = vrcp.f32 %v2764_v55  ;;  %v6270_v50 = vmul.f32 0.70710677, %v6241_v49  ;;  %v6329_v17 = vmul.f32 0.5, %v6186_v29  ;;  %vm3194_vm3 = vcmp.ge.f32.partialorder %v6148_v8, 0.0 }
 0x662   : > { %4104 = vrcp.f32 %v2765_v39  ;;  %v2766_v24 = vadd.f32 1.0, %v2750_v33  ;;  %v2751_v43 = vmul.f32 0.5, %v6264_v52  ;;  %v6314_v34 = vmul.f32 0.70710677, %v6290_v53 }
 0x663   : > { %v6246_v11 = vpop.eup %4092  ;;  %v6287_v21 = vand.u32 2147483647, %v6270_v50  ;;  %v6320_v33 = vmul.f32 %v3098_v63, %v6161_v62  ;;  %6993 = vst [vmem:[#allocation39_spill] sm:$0xff] %v6329_v17  ;;  %vm3196_vm5 = vcmp.ge.f32.partialorder %v6183_v6, 0.0  ;;  %vm3195_vm6 = vcmp.ge.f32.partialorder %v6167_v9, 0.0 }
 0x664   : > { %v2807_v26 = vmul.f32 0.17087276, %v6246_v11  ;;  %4106 = vrcp.f32 %v2766_v24  ;;  %6992 = vst [vmem:[#allocation18_spill] sm:$0xff] %v6314_v34  ;;  %v2767_v19 = vadd.f32 1.0, %v2751_v43  ;;  %v6323_v37 = vand.u32 2147483647, %v6314_v34 }
 0x665   : > { %v6266_v48 = vpop.eup %4094  ;;  %v2752_v31 = vmul.f32 0.5, %v6287_v21  ;;  %vm3198_vm7 = vcmp.ge.f32.partialorder %v6218_v41, 0.0  ;;  %vm3197_vm8 = vcmp.ge.f32.partialorder %v6202_v14, 0.0  ;;  %vm3200_vm9 = vcmp.ge.f32.partialorder %v6270_v50, 0.0 }
 0x666   : > { %v2823_v30 = vadd.f32 -0.82215226, %v2807_v26  ;;  %v2808_v0 = vmul.f32 0.17087276, %v6266_v48  ;;  %v2753_v62 = vmul.f32 0.5, %v6323_v37  ;;  %4108 = vrcp.f32 %v2767_v19 }
 0x667   : > { %v6292_v60 = vpop.eup %4096  ;;  %v2768_v56 = vadd.f32 1.0, %v2752_v31 }
 0x668   : > { %v2839_v3 = vmul.f32 %v6246_v11, %v2823_v30  ;;  %v2824_v57 = vadd.f32 -0.82215226, %v2808_v0  ;;  %v2809_v2 = vmul.f32 0.17087276, %v6292_v60 }
 0x669   : > { %v6307_v55 = vpop.eup %4098  ;;  %4110 = vrcp.f32 %v2768_v56 }
 0x66a   : > { %v2855_v28 = vadd.f32 1.4885159, %v2839_v3  ;;  %v2840_v35 = vmul.f32 %v6266_v48, %v2824_v57  ;;  %v2825_v58 = vadd.f32 -0.82215226, %v2809_v2  ;;  %v2810_v12 = vmul.f32 0.17087276, %v6307_v55 }
 0x66b   : > { %v6338_v3 = vmul.f32 %v3099_v23, %v6180_v16 }
 0x66c   : > { %v2871_v13 = vmul.f32 %v6246_v11, %v2855_v28  ;;  %v2856_v39 = vadd.f32 1.4885159, %v2840_v35  ;;  %v6325_v20 = vpop.eup %4100  ;;  %v2841_v26 = vmul.f32 %v6292_v60, %v2825_v58  ;;  %v2826_v51 = vadd.f32 -0.82215226, %v2810_v12 }
 0x66d   : > { %v2811_v27 = vmul.f32 0.17087276, %v6325_v20  ;;  %v2769_v35 = vadd.f32 1.0, %v2753_v62 }
 0x66e   : > { %v2887_v24 = vadd.f32 -1.135204, %v2871_v13  ;;  %v2872_v1 = vmul.f32 %v6266_v48, %v2856_v39  ;;  %v6334_v30 = vpop.eup %4102  ;;  %v2857_v0 = vadd.f32 1.4885159, %v2841_v26  ;;  %v2842_v43 = vmul.f32 %v6307_v55, %v2826_v51 }
 0x66f   : > { %v2827_v63 = vadd.f32 -0.82215226, %v2811_v27  ;;  %v2812_v2 = vmul.f32 0.17087276, %v6334_v30  ;;  %v6343_v58 = vpop.eup %4104  ;;  %4112 = vrcp.f32 %v2769_v35 }
 0x670   : > { %v2903_v29 = vmul.f32 %v6246_v11, %v2887_v24  ;;  %v2888_v57 = vadd.f32 -1.135204, %v2872_v1  ;;  %v2873_v31 = vmul.f32 %v6292_v60, %v2857_v0  ;;  %v2858_v28 = vadd.f32 1.4885159, %v2842_v43 }
 0x671   : > { %v2843_v16 = vmul.f32 %v6325_v20, %v2827_v63  ;;  %v2828_v23 = vadd.f32 -0.82215226, %v2812_v2  ;;  %v2813_v26 = vmul.f32 0.17087276, %v6343_v58  ;;  %v6349_v51 = vpop.eup %4106 }
 0x672   : > { %v2919_v12 = vadd.f32 0.27886808, %v2903_v29  ;;  %v2904_v13 = vmul.f32 %v6266_v48, %v2888_v57  ;;  %v2889_v19 = vadd.f32 -1.135204, %v2873_v31  ;;  %v2874_v39 = vmul.f32 %v6307_v55, %v2858_v28 }
 0x673   : > { %v2859_v1 = vadd.f32 1.4885159, %v2843_v16  ;;  %v2844_v27 = vmul.f32 %v6334_v30, %v2828_v23  ;;  %v2829_v43 = vadd.f32 -0.82215226, %v2813_v26  ;;  %v2814_v29 = vmul.f32 0.17087276, %v6349_v51 }
 0x674   : > { %v2935_v24 = vmul.f32 %v6246_v11, %v2919_v12  ;;  %v2920_v56 = vadd.f32 0.27886808, %v2904_v13  ;;  %v2905_v62 = vmul.f32 %v6292_v60, %v2889_v19  ;;  %v2890_v0 = vadd.f32 -1.135204, %v2874_v39 }
 0x675   : > { %v2875_v2 = vmul.f32 %v6325_v20, %v2859_v1  ;;  %v2860_v31 = vadd.f32 1.4885159, %v2844_v27  ;;  %v2845_v12 = vmul.f32 %v6343_v58, %v2829_v43  ;;  %v2830_v13 = vadd.f32 -0.82215226, %v2814_v29 }
 0x676   : > { %v2951_v57 = vadd.f32 -0.18628806, %v2935_v24  ;;  %v2936_v63 = vmul.f32 %v6266_v48, %v2920_v56  ;;  %v2921_v28 = vadd.f32 0.27886808, %v2905_v62  ;;  %v2906_v35 = vmul.f32 %v6307_v55, %v2890_v0 }
 0x677   : > { %v2891_v19 = vadd.f32 -1.135204, %v2875_v2  ;;  %v2876_v39 = vmul.f32 %v6334_v30, %v2860_v31  ;;  %v2861_v17 = vadd.f32 1.4885159, %v2845_v12  ;;  %v2846_v56 = vmul.f32 %v6349_v51, %v2830_v13  ;;  %v6367_v2 = vpop.eup %4108 }
 0x678   : > { %v2967_v16 = vmul.f32 %v6246_v11, %v2951_v57  ;;  %v2952_v23 = vadd.f32 -0.18628806, %v2936_v63  ;;  %v2937_v26 = vmul.f32 %v6292_v60, %v2921_v28  ;;  %v2922_v24 = vadd.f32 0.27886808, %v2906_v35 }
 0x679   : > { %v2907_v62 = vmul.f32 %v6325_v20, %v2891_v19  ;;  %v2892_v0 = vadd.f32 -1.135204, %v2876_v39  ;;  %v2877_v57 = vmul.f32 %v6343_v58, %v2861_v17  ;;  %v2862_v63 = vadd.f32 1.4885159, %v2846_v56  ;;  %v6373_v39 = vpop.eup %4110 }
 0x67a   : > { %v2983_v1 = vadd.f32 0.09678418, %v2967_v16  ;;  %v2968_v27 = vmul.f32 %v6266_v48, %v2952_v23  ;;  %v2953_v43 = vadd.f32 -0.18628806, %v2937_v26  ;;  %v2938_v29 = vmul.f32 %v6307_v55, %v2922_v24 }
 0x67b   : > { %v2923_v35 = vadd.f32 0.27886808, %v2907_v62  ;;  %v2908_v12 = vmul.f32 %v6334_v30, %v2892_v0  ;;  %v2893_v23 = vadd.f32 -1.135204, %v2877_v57  ;;  %v2878_v19 = vmul.f32 %v6349_v51, %v2862_v63 }
 0x67c   : > { %v2999_v31 = vmul.f32 %v6246_v11, %v2983_v1  ;;  %v2984_v28 = vadd.f32 0.09678418, %v2968_v27  ;;  %v2969_v13 = vmul.f32 %v6292_v60, %v2953_v43  ;;  %v2954_v16 = vadd.f32 -0.18628806, %v2938_v29  ;;  %v6379_v0 = vpop.eup %4112 }
 0x67d   : > { %v2939_v24 = vmul.f32 %v6325_v20, %v2923_v35  ;;  %v2924_v56 = vadd.f32 0.27886808, %v2908_v12  ;;  %v2909_v27 = vmul.f32 %v6343_v58, %v2893_v23  ;;  %v2894_v62 = vadd.f32 -1.135204, %v2878_v19 }
 0x67e   : > { %v3015_v26 = vadd.f32 0.37409195, %v2999_v31  ;;  %v3000_v17 = vmul.f32 %v6266_v48, %v2984_v28  ;;  %v2985_v34 = vadd.f32 0.09678418, %v2969_v13  ;;  %v2970_v1 = vmul.f32 %v6307_v55, %v2954_v16 }
 0x67f   : > { %v2955_v57 = vadd.f32 -0.18628806, %v2939_v24  ;;  %v2940_v63 = vmul.f32 %v6334_v30, %v2924_v56  ;;  %v2925_v4 = vadd.f32 0.27886808, %v2909_v27  ;;  %v2910_v35 = vmul.f32 %v6349_v51, %v2894_v62 }
 0x680   : > { %v3031_v43 = vmul.f32 %v6246_v11, %v3015_v26  ;;  %v3016_v29 = vadd.f32 0.37409195, %v3000_v17  ;;  %v3001_v31 = vmul.f32 %v6292_v60, %v2985_v34  ;;  %v2986_v28 = vadd.f32 0.09678418, %v2970_v1 }
 0x681   : > { %v2971_v16 = vmul.f32 %v6325_v20, %v2955_v57  ;;  %v2956_v23 = vadd.f32 -0.18628806, %v2940_v63  ;;  %v2941_v26 = vmul.f32 %v6343_v58, %v2925_v4  ;;  %v2926_v17 = vadd.f32 0.27886808, %v2910_v35 }
 0x682   : > { %v3047_v12 = vadd.f32 1.0000237, %v3031_v43  ;;  %v3032_v13 = vmul.f32 %v6266_v48, %v3016_v29  ;;  %v3017_v19 = vadd.f32 0.37409195, %v3001_v31  ;;  %v3002_v10 = vmul.f32 %v6307_v55, %v2986_v28 }
 0x683   : > { %v2987_v34 = vadd.f32 0.09678418, %v2971_v16  ;;  %v2972_v1 = vmul.f32 %v6334_v30, %v2956_v23  ;;  %v2957_v43 = vadd.f32 -0.18628806, %v2941_v26  ;;  %v2942_v29 = vmul.f32 %v6349_v51, %v2926_v17 }
 0x684   : > { %v3063_v24 = vmul.f32 %v6246_v11, %v3047_v12  ;;  %v3048_v56 = vadd.f32 1.0000237, %v3032_v13  ;;  %v3033_v27 = vmul.f32 %v6292_v60, %v3017_v19  ;;  %v3018_v62 = vadd.f32 0.37409195, %v3002_v10 }
 0x685   : > { %v3003_v63 = vmul.f32 %v6325_v20, %v2987_v34  ;;  %v2988_v31 = vadd.f32 0.09678418, %v2972_v1  ;;  %v3100_v28 = vsub.f32 0.0, %v6196_v42  ;;  %v2973_v12 = vmul.f32 %v6343_v58, %v2957_v43 }
 0x686   : > { %v3079_v57 = vadd.f32 -1.2655122, %v3063_v24  ;;  %v3049_v4 = vadd.f32 1.0000237, %v3033_v27  ;;  %v3034_v35 = vmul.f32 %v6307_v55, %v3018_v62  ;;  %v2958_v13 = vadd.f32 -0.18628806, %v2942_v29 }
 0x687   : > { %v3019_v23 = vadd.f32 0.37409195, %v3003_v63  ;;  %v3004_v10 = vmul.f32 %v6334_v30, %v2988_v31  ;;  %v3101_v19 = vsub.f32 0.0, %v6215_v18  ;;  %v3064_v26 = vmul.f32 %v6266_v48, %v3048_v56 }
 0x688   : > { %v3127_v16 = vadd.f32 %v6279_v47, %v3079_v57  ;;  %v3050_v17 = vadd.f32 1.0000237, %v3034_v35  ;;  %v2989_v24 = vadd.f32 0.09678418, %v2973_v12  ;;  %v2974_v34 = vmul.f32 %v6349_v51, %v2958_v13 }
 0x689   : > { %v3035_v27 = vmul.f32 %v6325_v20, %v3019_v23  ;;  %v6404_v62 = vmul.f32 0.5, %v6205_v25  ;;  %v3102_v43 = vsub.f32 0.0, %v6231_v5  ;;  %v3065_v47 = vmul.f32 %v6292_v60, %v3049_v4 }
 0x68a   : > { %v3143_v1 = vmul.f32 1.442695, %v3127_v16  ;;  %v3020_v29 = vadd.f32 0.37409195, %v3004_v10  ;;  %v6409_v57 = vmul.f32 %v3100_v28, %v6196_v42  ;;  %v2990_v63 = vadd.f32 0.09678418, %v2974_v34 }
 0x68b   : > { %v3066_v56 = vmul.f32 %v6307_v55, %v3050_v17  ;;  %v6413_v31 = vmul.f32 0.5, %v6221_v22  ;;  %v3103_v35 = vsub.f32 0.0, %v6264_v52  ;;  %v3080_v12 = vadd.f32 -1.2655122, %v3064_v26  ;;  %v2680_v22 = vpop.f32.mrf.mxu1 }
 0x68c   : > { %4114 = vpow2.f32 %v3143_v1  ;;  %v3005_v25 = vmul.f32 %v6343_v58, %v2989_v24  ;;  %v6418_v13 = vmul.f32 %v3101_v19, %v6215_v18  ;;  %v3006_v4 = vmul.f32 %v6349_v51, %v2990_v63 }
 0x68d   : > { %v3051_v16 = vadd.f32 1.0000237, %v3035_v27  ;;  %v6422_v42 = vmul.f32 %v3102_v43, %v6231_v5  ;;  %v2815_v28 = vmul.f32 0.17087276, %v6367_v2  ;;  %v6426_v23 = vmul.f32 0.5, %v6241_v49 }
 0x68e   : > { %v3081_v10 = vadd.f32 -1.2655122, %v3065_v47  ;;  %v3036_v26 = vmul.f32 %v6334_v30, %v3020_v29  ;;  %v3022_v17 = vadd.f32 0.37409195, %v3006_v4  ;;  %v3104_v24 = vsub.f32 0.0, %v6287_v21 }
 0x68f   : > { %v3082_v18 = vadd.f32 -1.2655122, %v3066_v56  ;;  %v2831_v19 = vadd.f32 -0.82215226, %v2815_v28  ;;  %v6431_v34 = vmul.f32 %v3103_v35, %v6264_v52  ;;  %v2816_v5 = vmul.f32 0.17087276, %v6373_v39 }
 0x690   : > { %v3128_v1 = vadd.f32 %v6296_v44, %v3080_v12  ;;  %v3021_v27 = vadd.f32 0.37409195, %v3005_v25  ;;  %v6436_v49 = vmul.f32 0.5, %v6290_v53  ;;  %v6439_v43 = vadd.f32 %v2680_v22, %v6080_v36 }
 0x691   : > { %v3067_v47 = vmul.f32 %v6325_v20, %v3051_v16  ;;  %v2847_v29 = vmul.f32 %v6367_v2, %v2831_v19  ;;  %v2832_v63 = vadd.f32 -0.82215226, %v2816_v5  ;;  %v3105_v56 = vsub.f32 0.0, %v6323_v37 }
 0x692   : > { %6994 = vst [vmem:[#allocation74_spill] sm:$0xff] %v6439_v43  ;;  %v3052_v52 = vadd.f32 1.0000237, %v3036_v26  ;;  %v3038_v35 = vmul.f32 %v6349_v51, %v3022_v17  ;;  %v6446_v4 = vmul.f32 %v3104_v24, %v6287_v21  ;;  %v2817_v44 = vmul.f32 0.17087276, %v6379_v0 }
 0x693   : > { %v3129_v53 = vadd.f32 %v6301_v61, %v3081_v10  ;;  %v3130_v12 = vadd.f32 %v6320_v33, %v3082_v18  ;;  %v2863_v25 = vadd.f32 1.4885159, %v2847_v29  ;;  %v2848_v16 = vmul.f32 %v6373_v39, %v2832_v63  ;;  %v2684_v33 = vpop.f32.mrf.mxu1 }
 0x694   : > { %v3145_v28 = vmul.f32 1.442695, %v3128_v1  ;;  %v3037_v22 = vmul.f32 %v6343_v58, %v3021_v27  ;;  %v2833_v26 = vadd.f32 -0.82215226, %v2817_v44  ;;  %v6455_v17 = vmul.f32 0.70710677, %v6439_v43 }
 0x695   : > { %v3083_v21 = vadd.f32 -1.2655122, %v3067_v47  ;;  %v2879_v24 = vmul.f32 %v6367_v2, %v2863_v25  ;;  %v2864_v19 = vadd.f32 1.4885159, %v2848_v16  ;;  %v6459_v61 = vmul.f32 %v3105_v56, %v6323_v37  ;;  %v2686_v43 = vpop.f32.mrf.mxu1 }
 0x696   : > { %6995 = vst [vmem:[#allocation79_spill] sm:$0xff] %v6455_v17  ;;  %v3068_v10 = vmul.f32 %v6334_v30, %v3052_v52  ;;  %v3054_v18 = vadd.f32 1.0000237, %v3038_v35  ;;  %v2849_v5 = vmul.f32 %v6379_v0, %v2833_v26  ;;  %v6464_v1 = vand.u32 2147483647, %v6455_v17 }
 0x697   : > { %v3147_v27 = vmul.f32 1.442695, %v3129_v53  ;;  %v3149_v29 = vmul.f32 1.442695, %v3130_v12  ;;  %v2895_v63 = vadd.f32 -1.135204, %v2879_v24  ;;  %v2880_v47 = vmul.f32 %v6373_v39, %v2864_v19 }
 0x698   : > { %4116 = vpow2.f32 %v3145_v28  ;;  %v3053_v25 = vadd.f32 1.0000237, %v3037_v22  ;;  %v2865_v16 = vadd.f32 1.4885159, %v2849_v5  ;;  %v2754_v37 = vmul.f32 0.5, %v6464_v1 }
 0x699   : > { %v4115_v44 = vpop.eup %4114  ;;  %v3131_v52 = vadd.f32 %v6338_v3, %v3083_v21  ;;  %v2911_v35 = vmul.f32 %v6367_v2, %v2895_v63  ;;  %v2896_v26 = vadd.f32 -1.135204, %v2880_v47  ;;  %v3084_v17 = vadd.f32 -1.2655122, %v3068_v10  ;;  %v2690_v63 = vpop.f32.mrf.mxu1 }
 0x69a   : > { %v3175_v56 = vmul.f32 %v4115_v44, %v6246_v11  ;;  %v3070_v53 = vmul.f32 %v6349_v51, %v3054_v18  ;;  %v2881_v12 = vmul.f32 %v6379_v0, %v2865_v16  ;;  %v2770_v24 = vadd.f32 1.0, %v2754_v37 }
 0x69b   : > { %v2927_v22 = vadd.f32 0.27886808, %v2911_v35  ;;  %v2912_v5 = vmul.f32 %v6373_v39, %v2896_v26  ;;  %4118 = vpow2.f32 %v3149_v29  ;;  %v3069_v11 = vmul.f32 %v6343_v58, %v3053_v25 }
 0x69c   : > { %v3207_v19 = vsub.f32 1.0, %v3175_v56  ;;  %v3602_v28 = vadd.f32 -1.0, %v3175_v56  ;;  %v2897_v44 = vadd.f32 -1.135204, %v2881_v12  ;;  %v6476_v3 = vadd.f32 %v2684_v33, %v6072_v38 }
 0x69d   : > { %v2943_v10 = vmul.f32 %v6367_v2, %v2927_v22  ;;  %v2928_v18 = vadd.f32 0.27886808, %v2912_v5  ;;  %4120 = vrcp.f32 %v2770_v24  ;;  %v3086_v16 = vadd.f32 -1.2655122, %v3070_v53 }
 0x69e   : > { %v3239_v21 = vsel %vm3191_vm1, %v3207_v19, %v3602_v28  ;;  %v2913_v37 = vmul.f32 %v6379_v0, %v2897_v44  ;;  %v6483_v29 = vmul.f32 0.70710677, %v6476_v3  ;;  %v3132_v25 = vadd.f32 %v6409_v57, %v3084_v17 }
 0x69f   : > { %v3255_v47 = vadd.f32 1.0, %v3239_v21  ;;  %v2959_v56 = vadd.f32 -0.18628806, %v2943_v10  ;;  %v2944_v33 = vmul.f32 %v6373_v39, %v2928_v18  ;;  %v6488_v32 = vadd.f32 %v2686_v43, %v6080_v36 }
 0x6a0   : > { %v2929_v26 = vadd.f32 0.27886808, %v2913_v37  ;;  %v6494_v12 = vand.u32 2147483647, %v6483_v29  ;;  %v6497_v53 = vadd.f32 %v2690_v63, %v6072_v38  ;;  %v3085_v24 = vadd.f32 -1.2655122, %v3069_v11  ;;  %v2692_v37 = vpop.f32.mrf.mxu1 }
 0x6a1   : > { %v6491_v35 = vmul.f32 %v3255_v47, %v6249_v40  ;;  %v2975_v19 = vmul.f32 %v6367_v2, %v2959_v56  ;;  %v2960_v57 = vadd.f32 -0.18628806, %v2944_v33  ;;  %v6501_v17 = vmul.f32 0.70710677, %v6488_v32 }
 0x6a2   : > { %v3151_v28 = vmul.f32 1.442695, %v3131_v52  ;;  %v3134_v43 = vadd.f32 %v6422_v42, %v3086_v16  ;;  %v2945_v40 = vmul.f32 %v6379_v0, %v2929_v26  ;;  %v2755_v22 = vmul.f32 0.5, %v6494_v12 }
 0x6a3   : > { %v3153_v5 = vmul.f32 1.442695, %v3132_v25  ;;  %v2991_v44 = vadd.f32 0.09678418, %v2975_v19  ;;  %v2976_v21 = vmul.f32 %v6373_v39, %v2960_v57  ;;  %v6508_v38 = vand.u32 2147483647, %v6501_v17 }
 0x6a4   : > { %4122 = vpow2.f32 %v3147_v27  ;;  %v2961_v11 = vadd.f32 -0.18628806, %v2945_v40  ;;  %v2771_v10 = vadd.f32 1.0, %v2755_v22  ;;  %v6511_v18 = vmul.f32 0.70710677, %v6497_v53 }
 0x6a5   : > { %v4117_v52 = vpop.eup %4116  ;;  %v3133_v42 = vadd.f32 %v6418_v13, %v3085_v24  ;;  %v3007_v63 = vmul.f32 %v6367_v2, %v2991_v44  ;;  %v2992_v47 = vadd.f32 0.09678418, %v2976_v21  ;;  %v2756_v16 = vmul.f32 0.5, %v6508_v38 }
 0x6a6   : > { %v3157_v25 = vmul.f32 1.442695, %v3134_v43  ;;  %v2977_v56 = vmul.f32 %v6379_v0, %v2961_v11  ;;  %4124 = vrcp.f32 %v2771_v10  ;;  %v6519_v27 = vand.u32 2147483647, %v6511_v18 }
 0x6a7   : > { %4126 = vpow2.f32 %v3151_v28  ;;  %v3023_v33 = vadd.f32 0.37409195, %v3007_v63  ;;  %v3008_v26 = vmul.f32 %v6373_v39, %v2992_v47  ;;  %v2772_v19 = vadd.f32 1.0, %v2756_v16 }
 0x6a8   : > { %4128 = vpow2.f32 %v3153_v5  ;;  %v2993_v13 = vadd.f32 0.09678418, %v2977_v56  ;;  %v2757_v24 = vmul.f32 0.5, %v6519_v27  ;;  %v6524_v57 = vadd.f32 %v2692_v37, %v6080_v36  ;;  %v4119_v40 = vpop.eup %4118 }
 0x6a9   : > { %v3039_v43 = vmul.f32 %v6367_v2, %v3023_v33  ;;  %v3024_v22 = vadd.f32 0.37409195, %v3008_v26  ;;  %4130 = vrcp.f32 %v2772_v19  ;;  %v3176_v44 = vmul.f32 %v4117_v52, %v6266_v48 }
 0x6aa   : > { %v6528_v21 = vpop.eup %4120  ;;  %v3155_v28 = vmul.f32 1.442695, %v3133_v42  ;;  %4132 = vpow2.f32 %v3157_v25  ;;  %v3009_v11 = vmul.f32 %v6379_v0, %v2993_v13  ;;  %v2773_v5 = vadd.f32 1.0, %v2757_v24 }
 0x6ab   : > { %v3055_v10 = vadd.f32 1.0000237, %v3039_v43  ;;  %v3040_v36 = vmul.f32 %v6373_v39, %v3024_v22  ;;  %v2818_v63 = vmul.f32 0.17087276, %v6528_v21  ;;  %v6535_v47 = vmul.f32 0.70710677, %v6524_v57 }
 0x6ac   : > { %v3025_v16 = vadd.f32 0.37409195, %v3009_v11  ;;  %4134 = vrcp.f32 %v2773_v5  ;;  %v3208_v48 = vsub.f32 1.0, %v3176_v44  ;;  %v3603_v52 = vadd.f32 -1.0, %v3176_v44 }
 0x6ad   : > { %v3071_v42 = vmul.f32 %v6367_v2, %v3055_v10  ;;  %v3056_v37 = vadd.f32 1.0000237, %v3040_v36  ;;  %v2834_v25 = vadd.f32 -0.82215226, %v2818_v63  ;;  %v6539_v56 = vand.u32 2147483647, %v6535_v47 }
 0x6ae   : > { %v3041_v33 = vmul.f32 %v6379_v0, %v3025_v16  ;;  %v3106_v26 = vsub.f32 0.0, %v6464_v1  ;;  %v3240_v19 = vsel %vm3192_vm2, %v3208_v48, %v3603_v52  ;;  %v3178_v13 = vmul.f32 %v4119_v40, %v6307_v55 }
 0x6af   : > { %v3087_v24 = vadd.f32 -1.2655122, %v3071_v42  ;;  %v3072_v43 = vmul.f32 %v6373_v39, %v3056_v37  ;;  %v2850_v22 = vmul.f32 %v6528_v21, %v2834_v25  ;;  %v2758_v44 = vmul.f32 0.5, %v6539_v56 }
 0x6b0   : > { %4136 = vpow2.f32 %v3155_v28  ;;  %v3057_v11 = vadd.f32 1.0000237, %v3041_v33  ;;  %v3256_v5 = vadd.f32 1.0, %v3240_v19  ;;  %v3210_v10 = vsub.f32 1.0, %v3178_v13 }
 0x6b1   : > { %v4123_v36 = vpop.eup %4122  ;;  %v3135_v63 = vadd.f32 %v6431_v34, %v3087_v24  ;;  %v3088_v45 = vadd.f32 -1.2655122, %v3072_v43  ;;  %v2866_v16 = vadd.f32 1.4885159, %v2850_v22  ;;  %v2774_v48 = vadd.f32 1.0, %v2758_v44 }
 0x6b2   : > { %v3073_v55 = vmul.f32 %v6379_v0, %v3057_v11  ;;  %v6553_v40 = vmul.f32 %v3106_v26, %v6464_v1  ;;  %v3272_v52 = vmul.f32 %v3256_v5, %v6252_v46  ;;  %v3605_v42 = vadd.f32 -1.0, %v3178_v13 }
 0x6b3   : > { %v6556_v37 = vpop.eup %4124  ;;  %v3159_v28 = vmul.f32 1.442695, %v3135_v63  ;;  %v3136_v25 = vadd.f32 %v6446_v4, %v3088_v45  ;;  %v2882_v33 = vmul.f32 %v6528_v21, %v2866_v16  ;;  %4138 = vrcp.f32 %v2774_v48 }
 0x6b4   : > { %v4127_v34 = vpop.eup %4126  ;;  %v3089_v19 = vadd.f32 -1.2655122, %v3073_v55  ;;  %v2819_v24 = vmul.f32 0.17087276, %v6556_v37  ;;  %3390 = vmatprep.mubr.f32.mxu0 %v3272_v52  ;;  %v3242_v1 = vsel %vm3194_vm3, %v3210_v10, %v3605_v42  ;;  %v3177_v46 = vmul.f32 %v4123_v36, %v6292_v60 }
 0x6b5   : > { %v4129_v26 = vpop.eup %4128  ;;  %4140 = vpow2.f32 %v3159_v28  ;;  %v3161_v4 = vmul.f32 1.442695, %v3136_v25  ;;  %v2898_v13 = vadd.f32 -1.135204, %v2882_v33  ;;  %3391 = vmatmul.mubr.f32.vlgmr.msra.gmra.mxu0 %v6491_v35  ;;  %v3258_v43 = vadd.f32 1.0, %v3242_v1 }
 0x6b6   : > { %v6567_v22 = vpop.eup %4130  ;;  %v3137_v44 = vadd.f32 %v6459_v61, %v3089_v19  ;;  %v2835_v11 = vadd.f32 -0.82215226, %v2819_v24  ;;  %v3209_v5 = vsub.f32 1.0, %v3177_v46  ;;  %v3604_v63 = vadd.f32 -1.0, %v3177_v46 }
 0x6b7   : > { %v4133_v8 = vpop.eup %4132  ;;  %4142 = vpow2.f32 %v3161_v4  ;;  %v2914_v60 = vmul.f32 %v6528_v21, %v2898_v13  ;;  %v2820_v10 = vmul.f32 0.17087276, %v6567_v22  ;;  %v3274_v36 = vmul.f32 %v3258_v43, %v6283_v54 }
 0x6b8   : > { %v3163_v45 = vmul.f32 1.442695, %v3137_v44  ;;  %v2851_v16 = vmul.f32 %v6556_v37, %v2835_v11  ;;  %v3241_v35 = vsel %vm3193_vm4, %v3209_v5, %v3604_v63  ;;  %v3180_v48 = vmul.f32 %v4129_v26, %v6334_v30 }
 0x6b9   : > { %v6577_v61 = vpop.eup %4134  ;;  %v2930_v55 = vadd.f32 0.27886808, %v2914_v60  ;;  %v2836_v52 = vadd.f32 -0.82215226, %v2820_v10  ;;  %3395 = vmatprep.mubr.f32.mxu0 %v3274_v36  ;;  %v3257_v42 = vadd.f32 1.0, %v3241_v35  ;;  %v3179_v28 = vmul.f32 %v4127_v34, %v6325_v20 }
 0x6ba   : > { %4144 = vpow2.f32 %v3163_v45  ;;  %v2867_v54 = vadd.f32 1.4885159, %v2851_v16  ;;  %v2821_v25 = vmul.f32 0.17087276, %v6577_v61  ;;  %v3212_v33 = vsub.f32 1.0, %v3180_v48 }
 0x6bb   : > { %v2946_v7 = vmul.f32 %v6528_v21, %v2930_v55  ;;  %v2852_v19 = vmul.f32 %v6567_v22, %v2836_v52  ;;  %v3273_v30 = vmul.f32 %v3257_v42, %v6261_v59  ;;  %v3607_v24 = vadd.f32 -1.0, %v3180_v48  ;;  %v6996_v52 = vld [vmem:[#allocation47_spill] sm:$0xff] }
 0x6bc   : > { %v2883_v1 = vmul.f32 %v6556_v37, %v2867_v54  ;;  %v2837_v46 = vadd.f32 -0.82215226, %v2821_v25  ;;  %v3211_v26 = vsub.f32 1.0, %v3179_v28  ;;  %v3606_v4 = vadd.f32 -1.0, %v3179_v28 }
 0x6bd   : > { %v4137_v13 = vpop.eup %4136  ;;  %v2962_v20 = vadd.f32 -0.18628806, %v2946_v7  ;;  %v2868_v34 = vadd.f32 1.4885159, %v2852_v19  ;;  %3396 = vmatmul.mubr.f32.gmra.mxu0 %v3273_v30  ;;  %v3244_v43 = vsel %vm3196_vm5, %v3212_v33, %v3607_v24  ;;  %v3182_v44 = vmul.f32 %v4133_v8, %v6349_v51 }
 0x6be   : > { %v2899_v11 = vadd.f32 -1.135204, %v2883_v1  ;;  %v2853_v59 = vmul.f32 %v6577_v61, %v2837_v46  ;;  %v3260_v5 = vadd.f32 1.0, %v3244_v43  ;;  %v3243_v63 = vsel %vm3195_vm6, %v3211_v26, %v3606_v4 }
 0x6bf   : > { %v2978_v60 = vmul.f32 %v6528_v21, %v2962_v20  ;;  %v2884_v10 = vmul.f32 %v6567_v22, %v2868_v34  ;;  %v3259_v36 = vadd.f32 1.0, %v3243_v63  ;;  %v3214_v45 = vsub.f32 1.0, %v3182_v44  ;;  %v6997_v34 = vld [vmem:[#allocation43_spill] sm:$0xff] }
 0x6c0   : > { %v6595_v16 = vpop.eup %4138  ;;  %v2915_v6 = vmul.f32 %v6556_v37, %v2899_v11  ;;  %v2869_v35 = vadd.f32 1.4885159, %v2853_v59  ;;  %v3276_v51 = vmul.f32 %v3260_v5, %v6311_v15  ;;  %v3609_v8 = vadd.f32 -1.0, %v3182_v44 }
 0x6c1   : > { %v2994_v48 = vadd.f32 0.09678418, %v2978_v60  ;;  %v2900_v55 = vadd.f32 -1.135204, %v2884_v10  ;;  %v2822_v9 = vmul.f32 0.17087276, %v6595_v16  ;;  %v3275_v42 = vmul.f32 %v3259_v36, %v6996_v52 }
 0x6c2   : > { %v4141_v28 = vpop.eup %4140  ;;  %v2931_v54 = vadd.f32 0.27886808, %v2915_v6  ;;  %v2885_v25 = vmul.f32 %v6577_v61, %v2869_v35  ;;  %3400 = vmatprep.mubr.f32.mxu0 %v3276_v51  ;;  %v3246_v33 = vsel %vm3198_vm7, %v3214_v45, %v3609_v8  ;;  %v3181_v7 = vmul.f32 %v4137_v13, %v6343_v58  ;;  %v6998_v8 = vld [vmem:[#allocation18_spill] sm:$0xff] }
 0x6c3   : > { %v3010_v15 = vmul.f32 %v6528_v21, %v2994_v48  ;;  %v2916_v19 = vmul.f32 %v6567_v22, %v2900_v55  ;;  %v2838_v30 = vadd.f32 -0.82215226, %v2822_v9  ;;  %3401 = vmatmul.mubr.f32.gmra.mxu0 %v3275_v42  ;;  %v3262_v24 = vadd.f32 1.0, %v3246_v33 }
 0x6c4   : > { %v4143_v1 = vpop.eup %4142  ;;  %v2947_v46 = vmul.f32 %v6556_v37, %v2931_v54  ;;  %v2901_v26 = vadd.f32 -1.135204, %v2885_v25  ;;  %v3213_v4 = vsub.f32 1.0, %v3181_v7  ;;  %v3608_v20 = vadd.f32 -1.0, %v3181_v7 }
 0x6c5   : > { %vm3199_vm10 = vcmp.ge.f32.partialorder %v6997_v34, 0.0  ;;  %v3026_v43 = vadd.f32 0.37409195, %v3010_v15  ;;  %v2932_v41 = vadd.f32 0.27886808, %v2916_v19  ;;  %v2854_v44 = vmul.f32 %v6595_v16, %v2838_v30 }
 0x6c6   : > { %v3278_v58 = vmul.f32 %v3262_v24, %v6404_v62  ;;  %v2963_v13 = vadd.f32 -0.18628806, %v2947_v46  ;;  %v2917_v11 = vmul.f32 %v6577_v61, %v2901_v26  ;;  %v3245_v59 = vsel %vm3197_vm8, %v3213_v4, %v3608_v20 }
 0x6c7   : > { %v3184_v5 = vmul.f32 %v4143_v1, %v6373_v39  ;;  %v4145_v63 = vpop.eup %4144  ;;  %v3042_v60 = vmul.f32 %v6528_v21, %v3026_v43  ;;  %v2948_v10 = vmul.f32 %v6567_v22, %v2932_v41  ;;  %v2870_v36 = vadd.f32 1.4885159, %v2854_v44  ;;  %v6999_v39 = vld [vmem:[#allocation39_spill] sm:$0xff] }
 0x6c8   : > { %3405 = vmatprep.mubr.f32.mxu0 %v3278_v58  ;;  %v3261_v45 = vadd.f32 1.0, %v3245_v59  ;;  %v2979_v6 = vmul.f32 %v6556_v37, %v2963_v13  ;;  %v2933_v35 = vadd.f32 0.27886808, %v2917_v11  ;;  %vm3201_vm11 = vcmp.ge.f32.partialorder %v6998_v8, 0.0 }
 0x6c9   : > { %v3216_v62 = vsub.f32 1.0, %v3184_v5  ;;  %v3611_v51 = vadd.f32 -1.0, %v3184_v5  ;;  %v3058_v48 = vadd.f32 1.0000237, %v3042_v60  ;;  %v2964_v14 = vadd.f32 -0.18628806, %v2948_v10 }
 0x6ca   : > { %v2886_v55 = vmul.f32 %v6595_v16, %v2870_v36  ;;  %v3277_v9 = vmul.f32 %v3261_v45, %v6999_v39  ;;  %v2995_v52 = vadd.f32 0.09678418, %v2979_v6  ;;  %v2949_v42 = vmul.f32 %v6577_v61, %v2933_v35 }
 0x6cb   : > { %v3248_v54 = vsel %vm3200_vm9, %v3216_v62, %v3611_v51  ;;  %v3183_v25 = vmul.f32 %v4141_v28, %v6367_v2  ;;  %v3074_v33 = vmul.f32 %v6528_v21, %v3058_v48  ;;  %v2980_v7 = vmul.f32 %v6567_v22, %v2964_v14 }
 0x6cc   : > { %v2902_v15 = vadd.f32 -1.135204, %v2886_v55  ;;  %3406 = vmatmul.mubr.f32.gmra.mxu0 %v3277_v9  ;;  %v3264_v19 = vadd.f32 1.0, %v3248_v54  ;;  %v3011_v30 = vmul.f32 %v6556_v37, %v2995_v52  ;;  %v2965_v24 = vadd.f32 -0.18628806, %v2949_v42 }
 0x6cd   : > { %v3215_v1 = vsub.f32 1.0, %v3183_v25  ;;  %v3610_v46 = vadd.f32 -1.0, %v3183_v25  ;;  %v3090_v26 = vadd.f32 -1.2655122, %v3074_v33  ;;  %v2996_v4 = vadd.f32 0.09678418, %v2980_v7 }
 0x6ce   : > { %v2918_v20 = vmul.f32 %v6595_v16, %v2902_v15  ;;  %v3280_v50 = vmul.f32 %v3264_v19, %v6426_v23  ;;  %v3027_v43 = vadd.f32 0.37409195, %v3011_v30  ;;  %v2981_v2 = vmul.f32 %v6577_v61, %v2965_v24 }
 0x6cf   : > { %v3247_v28 = vsel %vm3199_vm10, %v3215_v1, %v3610_v46  ;;  %v3185_v41 = vmul.f32 %v4145_v63, %v6379_v0  ;;  %v3138_v44 = vadd.f32 %v6553_v40, %v3090_v26  ;;  %v3012_v58 = vmul.f32 %v6567_v22, %v2996_v4 }
 0x6d0   : > { %v2934_v13 = vadd.f32 0.27886808, %v2918_v20  ;;  %3410 = vmatprep.mubr.f32.mxu0 %v3280_v50  ;;  %v3263_v11 = vadd.f32 1.0, %v3247_v28  ;;  %v3043_v59 = vmul.f32 %v6556_v37, %v3027_v43  ;;  %v2997_v5 = vadd.f32 0.09678418, %v2981_v2 }
 0x6d1   : > { %v3217_v60 = vsub.f32 1.0, %v3185_v41  ;;  %v3612_v23 = vadd.f32 -1.0, %v3185_v41  ;;  %v3165_v10 = vmul.f32 1.442695, %v3138_v44  ;;  %v3028_v36 = vadd.f32 0.37409195, %v3012_v58 }
 0x6d2   : > { %v2950_v45 = vmul.f32 %v6595_v16, %v2934_v13  ;;  %v3279_v34 = vmul.f32 %v3263_v11, %v6413_v31  ;;  %v3059_v6 = vadd.f32 1.0000237, %v3043_v59  ;;  %v3107_v0 = vsub.f32 0.0, %v6494_v12 }
 0x6d3   : > { %v3013_v40 = vmul.f32 %v6577_v61, %v2997_v5  ;;  %v3249_v63 = vsel %vm3201_vm11, %v3217_v60, %v3612_v23  ;;  %4146 = vpow2.f32 %v3165_v10  ;;  %v3044_v35 = vmul.f32 %v6567_v22, %v3028_v36  ;;  %v7000_v5 = vld [vmem:[#allocation79_spill] sm:$0xff]  ;;  %v7001_v10 = vld [vmem:[#allocation74_spill] sm:$0xff] }
 0x6d4   : > { %v2966_v62 = vadd.f32 -0.18628806, %v2950_v45  ;;  %3411 = vmatmul.mubr.f32.gmra.mxu0 %v3279_v34  ;;  %v3265_v51 = vadd.f32 1.0, %v3249_v63  ;;  %v3075_v48 = vmul.f32 %v6556_v37, %v3059_v6  ;;  %v3108_v31 = vsub.f32 0.0, %v6508_v38 }
 0x6d5   : > { %v3029_v14 = vadd.f32 0.37409195, %v3013_v40  ;;  %v3060_v55 = vadd.f32 1.0000237, %v3044_v35  ;;  %v3123_v8 = vmul.f32 %v3107_v0, %v6494_v12  ;;  %v3109_v15 = vsub.f32 0.0, %v6519_v27 }
 0x6d6   : > { %v2982_v39 = vmul.f32 %v6595_v16, %v2966_v62  ;;  %v3281_v9 = vmul.f32 %v3265_v51, %v6436_v49  ;;  %v3091_v52 = vadd.f32 -1.2655122, %v3075_v48  ;;  %v3124_v30 = vmul.f32 %v3108_v31, %v6508_v38 }
 0x6d7   : > { %v3045_v42 = vmul.f32 %v6577_v61, %v3029_v14  ;;  %v3076_v54 = vmul.f32 %v6567_v22, %v3060_v55  ;;  %v3125_v4 = vmul.f32 %v3109_v15, %v6519_v27  ;;  %v3110_v28 = vsub.f32 0.0, %v6539_v56 }
 0x6d8   : > { %v2998_v25 = vadd.f32 0.09678418, %v2982_v39  ;;  %v3139_v33 = vadd.f32 %v3123_v8, %v3091_v52  ;;  %vm3202_vm12 = vcmp.ge.f32.partialorder %v7000_v5, 0.0  ;;  %v2706_v36 = vmul.f32 0.5, %v7001_v10 }
 0x6d9   : > { %v3061_v7 = vadd.f32 1.0000237, %v3045_v42  ;;  %v3092_v19 = vadd.f32 -1.2655122, %v3076_v54  ;;  %v3126_v11 = vmul.f32 %v3110_v28, %v6539_v56  ;;  %vm3203_vm13 = vcmp.ge.f32.partialorder %v6483_v29, 0.0 }
 0x6da   : > { %v3014_v24 = vmul.f32 %v6595_v16, %v2998_v25  ;;  %v3167_v1 = vmul.f32 1.442695, %v3139_v33  ;;  %v2707_v48 = vmul.f32 0.5, %v6476_v3  ;;  %vm3204_vm14 = vcmp.ge.f32.partialorder %v6501_v17, 0.0 }
 0x6db   : > { %v3077_v49 = vmul.f32 %v6577_v61, %v3061_v7  ;;  %v3140_v46 = vadd.f32 %v3124_v30, %v3092_v19  ;;  %v2708_v52 = vmul.f32 0.5, %v6488_v32  ;;  %vm3205_vm15 = vcmp.ge.f32.partialorder %v6511_v18, 0.0 }
 0x6dc   : > { %v3030_v26 = vadd.f32 0.37409195, %v3014_v24  ;;  %4148 = vpow2.f32 %v3167_v1  ;;  %v2709_v3 = vmul.f32 0.5, %v6497_v53  ;;  %vm3206_vm0 = vcmp.ge.f32.partialorder %v6535_v47, 0.0 }
 0x6dd   : > { %v3093_v12 = vadd.f32 -1.2655122, %v3077_v49  ;;  %v3169_v20 = vmul.f32 1.442695, %v3140_v46  ;;  %v2710_v18 = vmul.f32 0.5, %v6524_v57 }
 0x6de   : > { %v3046_v50 = vmul.f32 %v6595_v16, %v3030_v26 }
 0x6df   : > { %v3141_v43 = vadd.f32 %v3125_v4, %v3093_v12  ;;  %4150 = vpow2.f32 %v3169_v20 }
 0x6e0   : > { %v3062_v2 = vadd.f32 1.0000237, %v3046_v50  ;;  %v4147_v38 = vpop.eup %4146 }
 0x6e1   : > { %v3171_v41 = vmul.f32 1.442695, %v3141_v43  ;;  %v3186_v58 = vmul.f32 %v4147_v38, %v6528_v21 }
 0x6e2   : > { %v3078_v44 = vmul.f32 %v6595_v16, %v3062_v2 }
 0x6e3   : > { %4152 = vpow2.f32 %v3171_v41  ;;  %v3218_v59 = vsub.f32 1.0, %v3186_v58  ;;  %v3613_v27 = vadd.f32 -1.0, %v3186_v58 }
 0x6e4   : > { %v3094_v13 = vadd.f32 -1.2655122, %v3078_v44 }
 0x6e5   : > { %v3250_v23 = vsel %vm3202_vm12, %v3218_v59, %v3613_v27 }
 0x6e6   : > { %v3142_v60 = vadd.f32 %v3126_v11, %v3094_v13  ;;  %v3266_v45 = vadd.f32 1.0, %v3250_v23 }
 0x6e8   : > { %v3173_v34 = vmul.f32 1.442695, %v3142_v60  ;;  %v3282_v6 = vmul.f32 %v3266_v45, %v2706_v36 }
 0x6e9   : > { %v4149_v0 = vpop.eup %4148 }
 0x6ea   : > { %4154 = vpow2.f32 %v3173_v34  ;;  %v3187_v40 = vmul.f32 %v4149_v0, %v6556_v37  ;;  %3415 = vmatprep.mubr.f32.mxu0 %v3282_v6 }
 0x6eb   : > { %3416 = vmatmul.mubr.f32.gmra.mxu0 %v3281_v9 }
 0x6ec   : > { %v4151_v21 = vpop.eup %4150  ;;  %v3219_v63 = vsub.f32 1.0, %v3187_v40  ;;  %v3614_v56 = vadd.f32 -1.0, %v3187_v40 }
 0x6ed   : > { %v3188_v35 = vmul.f32 %v4151_v21, %v6567_v22 }
 0x6ee   : > { %v3251_v62 = vsel %vm3203_vm13, %v3219_v63, %v3614_v56 }
 0x6ef   : > { %v3267_v14 = vadd.f32 1.0, %v3251_v62  ;;  %v3220_v55 = vsub.f32 1.0, %v3188_v35  ;;  %v3615_v31 = vadd.f32 -1.0, %v3188_v35 }
 0x6f0   : > { %v4153_v51 = vpop.eup %4152 }
 0x6f1   : > { %v3189_v37 = vmul.f32 %v4153_v51, %v6577_v61  ;;  %v3283_v39 = vmul.f32 %v3267_v14, %v2707_v48  ;;  %v3252_v9 = vsel %vm3204_vm14, %v3220_v55, %v3615_v31 }
 0x6f2   : > { %v3268_v8 = vadd.f32 1.0, %v3252_v9 }
 0x6f3   : > { %v3221_v42 = vsub.f32 1.0, %v3189_v37  ;;  %v3616_v29 = vadd.f32 -1.0, %v3189_v37 }
 0x6f4   : > { %v3284_v22 = vmul.f32 %v3268_v8, %v2708_v52 }
 0x6f5   : > { %v3253_v54 = vsel %vm3205_vm15, %v3221_v42, %v3616_v29 }
 0x6f6   : > { %v3269_v25 = vadd.f32 1.0, %v3253_v54  ;;  %3420 = vmatprep.mubr.f32.mxu1 %v3284_v22 }
 0x6f7   : > { %v4155_v33 = vpop.eup %4154  ;;  %3421 = vmatmul.mubr.f32.vlgmr.msra.gmra.mxu1 %v3283_v39 }
 0x6f8   : > { %v3190_v17 = vmul.f32 %v4155_v33, %v6595_v16  ;;  %v3285_v61 = vmul.f32 %v3269_v25, %v2709_v3  ;;  %v3618_v16 = vld [vmem:[%s6753_s10] ss:$0 sm:$0xff] }
 0x6fa   : > { %v3222_v7 = vsub.f32 1.0, %v3190_v17  ;;  %v3617_v32 = vadd.f32 -1.0, %v3190_v17 }
 0x6fc   : > { %v3254_v15 = vsel %vm3206_vm0, %v3222_v7, %v3617_v32 }
 0x6fd   : > { %v3270_v19 = vadd.f32 1.0, %v3254_v15 }
 0x6ff   : > { %v3286_v30 = vmul.f32 %v3270_v19, %v2710_v18 }
 0x701   : > { %3425 = vmatprep.mubr.f32.mxu1 %v3286_v30 }
 0x702   : > { %3426 = vmatmul.mubr.f32.gmra.mxu1 %v3285_v61 }
 0x775   : > { %v3754_v53 = vpop.f32.mrf.mxu0 }
 0x777   : > { %v3755_v24 = vpop.f32.mrf.mxu0 }
 0x778   : > { %v3756_v1 = vadd.f32 %v3755_v24, %v3754_v53 }
 0x77a   : > { %v3393_v49 = vadd.f32 %v3756_v1, %v3618_v16 }
 0x77c   : > { %3431 = vst [vmem:[%s6682_s16] sm:$0xff] %v3393_v49 }
 0x77d   : > { %v3757_v57 = vpop.f32.mrf.mxu0 }
 0x77f   : > { %v3758_v47 = vpop.f32.mrf.mxu0 }
 0x780   : > { %v3759_v46 = vadd.f32 %v3758_v47, %v3757_v57 }
 0x782   : > { %v3398_v26 = vadd.f32 %v3759_v46, %v3618_v16 }
 0x783   : > { %v3760_v12 = vpop.f32.mrf.mxu0 }
 0x784   : > { %3432 = vst [vmem:[%s6682_s16 + $0x8] sm:$0xff] %v3398_v26 }
 0x785   : > { %v3761_v4 = vpop.f32.mrf.mxu0 }
 0x786   : > { %v3762_v20 = vadd.f32 %v3761_v4, %v3760_v12 }
 0x788   : > { %v3403_v50 = vadd.f32 %v3762_v20, %v3618_v16 }
 0x78a   : > { %3433 = vst [vmem:[%s6682_s16 + $0x10] sm:$0xff] %v3403_v50 }
 0x78c   : > { %v3763_v43 = vpop.f32.mrf.mxu0 }
 0x78e   : > { %v3764_v2 = vpop.f32.mrf.mxu0 }
 0x78f   : > { %v3765_v28 = vadd.f32 %v3764_v2, %v3763_v43 }
 0x791   : > { %v3408_v38 = vadd.f32 %v3765_v28, %v3618_v16 }
 0x793   : > { %3434 = vst [vmem:[%s6682_s16 + $0x18] sm:$0xff] %v3408_v38 }
 0x794   : > { %v3766_v41 = vpop.f32.mrf.mxu0 }
 0x796   : > { %v3767_v44 = vpop.f32.mrf.mxu0 }
 0x797   : > { %v3768_v58 = vadd.f32 %v3767_v44, %v3766_v41 }
 0x799   : > { %v3413_v13 = vadd.f32 %v3768_v58, %v3618_v16 }
 0x79b   : > { %3435 = vst [vmem:[%s6682_s16 + $0x20] sm:$0xff] %v3413_v13 }
 0x7ab   : > { %v3769_v11 = vpop.f32.mrf.mxu0 }
 0x7ad   : > { %v3770_v59 = vpop.f32.mrf.mxu0 }
 0x7ae   : > { %v3771_v27 = vadd.f32 %v3770_v59, %v3769_v11 }
 0x7b0   : > { %v3418_v5 = vadd.f32 %v3771_v27, %v3618_v16 }
 0x7b2   : > { %3436 = vst [vmem:[%s6682_s16 + $0x28] sm:$0xff] %v3418_v5 }
 0x7b7   : > { %v3772_v60 = vpop.f32.mrf.mxu1 }
 0x7b9   : > { %v3773_v23 = vpop.f32.mrf.mxu1 }
 0x7ba   : > { %v3774_v10 = vadd.f32 %v3773_v23, %v3772_v60 }
 0x7bc   : > { %v3423_v36 = vadd.f32 %v3774_v10, %v3618_v16 }
 0x7be   : > { %3437 = vst [vmem:[%s6682_s16 + $0x30] sm:$0xff] %v3423_v36 }
 0x7c2   : > { %v3775_v45 = vpop.f32.mrf.mxu1 }
 0x7c4   : > { %v3776_v34 = vpop.f32.mrf.mxu1 }
 0x7c5   : > { %v3777_v6 = vadd.f32 %v3776_v34, %v3775_v45 }
 0x7c7   : > { %v3428_v0 = vadd.f32 %v3777_v6, %v3618_v16 }
 0x7c9   : > { %3438 = vst [vmem:[%s6682_s16 + $0x38] sm:$0xff] %v3428_v0 }
 0x7ca   : > { %4205 = shalt.err (!%p4202_p0)
}
 0x7cb   : > { %s4206_s29 = scalar_lea.hbm %s6698_s30, 1024  ;;  %s4210_s24 = scalar_lea.hbm %s6754_s11, 2048 }
 0x7cc   : > { %p4207_p1 = scmp.ne.s32.totalorder %s6698_s30, %s4206_s29  ;;  %p4211_p4 = scmp.lt.s32.totalorder %s6698_s30, %s6754_s11 }
 0x7cd   : > { %p4212_p7 = scmp.lt.s32.totalorder %s4210_s24, %s4206_s29 }
 0x7ce   : > { %p4208_p2 = pnand %p4207_p1, %p4364_p5 }
 0x7cf   : > { %p4213_p8 = por %p4212_p7, %p4211_p4 }
 0x7d0   : > { %p4209_p3 = pneg %p4208_p2 }
 0x7d2   : > { %p4214_p6 = pnand %p4213_p8, %p4209_p3 }
 0x7d4   : > { %4217 = shalt.err (!%p4214_p6)
}
 0x7d5   : > { %s4264_s12 = smov 128   ;;  %s4265_s14 = smov 8  }
 0x7d6   : > { %3878 = dma.vmem_to_hbm [thread:$0]  (%p4364_p5), %s6693_s22, 1024, %s6698_s30, %s6703_s13, %s4264_s12, %s4264_s12, %s4265_s14  }
 0x7d7 PF: > { %p3890_p9 = scmp.ge.s32.totalorder %s4256_s20, 2  ;;  %s3468_s15 = sand.u32 1, %s4244_s17  }
 0x7d8   : > { %p7002_p10 = scmp.ne.s32.totalorder %s6825_s28, 0  ;;  %s3469_s29 = scalar_lea.sflag [#allocation4], %s3468_s15 }
 0x7da   : > { %p3885_p11 = pnand %p3890_p9, %p7002_p10 }
 0x7dc   : > { %p3886_p12 = pneg %p3885_p11 }
 0x7de   : > { %4239 = dma.done.wait (%p3886_p12), %s3469_s29, 1024  }
 0x7df   : > { %4241 = vsyncadd (%p3886_p12), %s3469_s29, 4294966272  ;;  %s7003_s16 = sld [smem:[#allocation8_spill]]  ;;  %p22_p13 = scmp.ge.s32.totalorder %s4351_s23, 4  }
 0x7e0   : > { %s7004_s17 = smov %s4248_s18  ;;  %s7005_s18 = smov %s4252_s19 }
 0x7e1   : > { %s7007_s20 = smov %s4351_s23  ;;  %24 = sbr.rel (!%p22_p13) target bundleno = 4 (0x4), region = 104 }
 0x7e5   : > { %s7006_s19 = smov %s7003_s16 }
 0x7e6   :  { %3474 = vsyncpa [#allocation3], 1 }
 0x7e7   :  { %3476 = vsyncpa [#allocation3 + $0x1], 1 }
 0x7e8   :  { %3477 = vsyncpa [#allocation4], 1 }
 0x7e9   :  { %3479 = vsyncpa [#allocation4 + $0x1], 1 }

</bundles_post_ra>
